<compile_context>
chip_gen: v6e
topology: v6e:2x2x1
jax: 0.10.0
libtpu: 0.0.40
codegen_flags: <defaults>
</compile_context>

<pallas_src>
import jax
import jax.numpy as jnp
from jax.experimental import pallas as pl
from jax.experimental.pallas import tpu as pltpu

B = 2
SEQ_LEN = 8        # seq_len (small test size; spec uses 40)
D_MODEL = 128      # d_model (small test size; spec uses 512) -> full lane width
N_HEADS = 4
D_K = D_MODEL // N_HEADS
D_FF = 256
EPS = 1e-5


# ----------------------------- kernel helpers ------------------------------

def _mha(x_q, x_kv, wq, bq, wk, bk, wv, bv, wo, bo, mask):
    """Multi-head attention. x_q/x_kv: (bb, S, D). Fused weights (D, D)."""
    bb, S, D = x_q.shape
    Sk = x_kv.shape[1]
    scale = 1.0 / jnp.sqrt(jnp.float32(D_K))

    xqf = x_q.reshape(bb * S, D)
    xkf = x_kv.reshape(bb * Sk, D)
    # Lane-dense fused projections: one (bb*S, D) x (D, D) matmul each.
    q = (jnp.dot(xqf, wq, preferred_element_type=jnp.float32) + bq).reshape(bb, S, D)
    k = (jnp.dot(xkf, wk, preferred_element_type=jnp.float32) + bk).reshape(bb, Sk, D)
    v = (jnp.dot(xkf, wv, preferred_element_type=jnp.float32) + bv).reshape(bb, Sk, D)

    acc = None
    for h in range(N_HEADS):                     # static, small head loop
        lo, hi = h * D_K, (h + 1) * D_K
        qh = q[:, :, lo:hi]                      # (bb, S, d_k) — static lane slice
        kh = k[:, :, lo:hi]
        vh = v[:, :, lo:hi]
        # contract on d_k directly (no materialized transpose of K)
        s = jnp.einsum("bqd,bkd->bqk", qh, kh,
                       preferred_element_type=jnp.float32) * scale + mask
        s = s - jnp.max(s, axis=-1, keepdims=True)
        e = jnp.exp(s)
        # divide -> EUP approx reciprocal + multiply
        p = e * pl.reciprocal(jnp.sum(e, axis=-1, keepdims=True), approx=True)
        oh = jnp.einsum("bqk,bkd->bqd", p, vh,
                        preferred_element_type=jnp.float32)     # (bb, S, d_k)
        # fold WO per head and accumulate — no concatenate
        contrib = jnp.dot(oh.reshape(bb * S, D_K), wo[lo:hi, :],
                          preferred_element_type=jnp.float32)   # (bb*S, D)
        acc = contrib if acc is None else acc + contrib
    return (acc + bo).reshape(bb, S, D)


def _mean_sd(x):
    """Mean over the (S, D) slab per batch element. x: (bb, S, D)."""
    n = x.shape[1] * x.shape[2]
    s = jnp.sum(jnp.sum(x, axis=2, keepdims=True), axis=1, keepdims=True)
    return s * (1.0 / n)


def _layernorm(x, g, b):
    """LayerNorm with normalized_shape=(S, D); single-pass statistics."""
    mu = _mean_sd(x)
    var = _mean_sd(x * x) - mu * mu
    return (x - mu) * jax.lax.rsqrt(var + EPS) * g + b


def decoder_layer_kernel(
    x_ref, enc_ref, mask_ref, enc_mask_ref,
    wq_s_ref, bq_s_ref, wk_s_ref, bk_s_ref, wv_s_ref, bv_s_ref, wo_s_ref, bo_s_ref,
    wq_c_ref, bq_c_ref, wk_c_ref, bk_c_ref, wv_c_ref, bv_c_ref, wo_c_ref, bo_c_ref,
    g1_ref, be1_ref, g2_ref, be2_ref, g3_ref, be3_ref,
    w1_ref, b1_ref, w2_ref, b2_ref,
    out_ref,
):
    bb, S, D = x_ref.shape
    x = x_ref[...]          # (bb, S, D)
    enc = enc_ref[...]      # (bb, S, D)
    mask = mask_ref[...]
    enc_mask = enc_mask_ref[...]

    # 1) masked self-attention + residual, LayerNorm over (S, D)
    attn = _mha(x, x,
                wq_s_ref[...], bq_s_ref[...], wk_s_ref[...], bk_s_ref[...],
                wv_s_ref[...], bv_s_ref[...], wo_s_ref[...], bo_s_ref[...],
                mask)
    x1 = _layernorm(x + attn, g1_ref[...], be1_ref[...])

    # 2) cross-attention (K, V from encoder output) + residual, LayerNorm
    cross = _mha(x1, enc,
                 wq_c_ref[...], bq_c_ref[...], wk_c_ref[...], bk_c_ref[...],
                 wv_c_ref[...], bv_c_ref[...], wo_c_ref[...], bo_c_ref[...],
                 enc_mask)
    x2 = _layernorm(x1 + cross, g2_ref[...], be2_ref[...])

    # 3) position-wise FFN (relu) + residual, LayerNorm
    x2f = x2.reshape(bb * S, D)
    h = jnp.maximum(
        jnp.dot(x2f, w1_ref[...], preferred_element_type=jnp.float32) + b1_ref[...],
        0.0)
    y = (jnp.dot(h, w2_ref[...], preferred_element_type=jnp.float32)
         + b2_ref[...]).reshape(bb, S, D)
    x3 = _layernorm(x2 + y, g3_ref[...], be3_ref[...])

    out_ref[...] = x3.astype(out_ref.dtype)


# ------------------------------ wrapper ------------------------------------

def _fuse_heads(w, b):
    """(H, D, d_k)/(H, d_k) per-head params -> (D, H*d_k)/(1, H*d_k) fused."""
    H, D, dk = w.shape
    return (jnp.transpose(w, (1, 0, 2)).reshape(D, H * dk),
            b.reshape(1, H * dk))


def _default_num_blocks(batch):
    # 2-way parallel batch grid only where there are 2 TensorCores (v7x);
    # on single-TC chips (v5e/v6e) collapse to one grid step.
    kind = ""
    try:
        kind = jax.devices()[0].device_kind.lower()
    except Exception:
        pass
    tc_per_chip = 2 if "v7" in kind else 1
    if tc_per_chip > 1 and batch % tc_per_chip == 0:
        return tc_per_chip
    return 1


def decoder_layer(x, enc_out, mask, enc_mask, params, *, num_blocks=None):
    Bx, S, D = x.shape
    if num_blocks is None:
        num_blocks = _default_num_blocks(Bx)
    bb = Bx // num_blocks

    wq_s, bq_s = _fuse_heads(params["wq_s"], params["bq_s"])
    wk_s, bk_s = _fuse_heads(params["wk_s"], params["bk_s"])
    wv_s, bv_s = _fuse_heads(params["wv_s"], params["bv_s"])
    wq_c, bq_c = _fuse_heads(params["wq_c"], params["bq_c"])
    wk_c, bk_c = _fuse_heads(params["wk_c"], params["bk_c"])
    wv_c, bv_c = _fuse_heads(params["wv_c"], params["bv_c"])

    ordered = [
        wq_s, bq_s, wk_s, bk_s, wv_s, bv_s, params["wo_s"], params["bo_s"],
        wq_c, bq_c, wk_c, bk_c, wv_c, bv_c, params["wo_c"], params["bo_c"],
        params["g1"], params["be1"], params["g2"], params["be2"],
        params["g3"], params["be3"],
        params["w1"], params["b1"], params["w2"], params["b2"],
    ]

    def batched_spec(shape):
        return pl.BlockSpec((bb,) + tuple(shape[1:]), lambda i: (i, 0, 0))

    def full_spec(shape):
        n = len(shape)
        return pl.BlockSpec(tuple(shape), lambda i, n=n: (0,) * n)

    in_specs = [
        batched_spec(x.shape),
        batched_spec(enc_out.shape),
        full_spec(mask.shape),
        full_spec(enc_mask.shape),
    ] + [full_spec(p.shape) for p in ordered]

    return pl.pallas_call(
        decoder_layer_kernel,
        out_shape=jax.ShapeDtypeStruct(x.shape, jnp.float32),
        grid_spec=pltpu.PrefetchScalarGridSpec(
            num_scalar_prefetch=0,
            grid=(num_blocks,),
            in_specs=in_specs,
            out_specs=batched_spec(x.shape),
        ),
        compiler_params=pltpu.CompilerParams(
            dimension_semantics=("parallel",)),
    )(x, enc_out, mask, enc_mask, *ordered)


# --------------------------- pure-JAX reference -----------------------------

def ref_decoder(x, enc, mask, enc_mask, p):
    """Matches the PyTorch module: per-head Linears, concat, WO, LN((S, D))."""
    def mha(q_in, kv_in, wq, bq, wk, bk, wv, bv, wo, bo, m):
        outs = []
        for h in range(N_HEADS):
            q = q_in @ wq[h] + bq[h]
            k = kv_in @ wk[h] + bk[h]
            v = kv_in @ wv[h] + bv[h]
            s = jnp.einsum("bqd,bkd->bqk", q, k) / jnp.sqrt(jnp.float32(D_K)) + m
            pr = jax.nn.softmax(s, axis=-1)
            outs.append(jnp.einsum("bqk,bkd->bqd", pr, v))
        cat = jnp.concatenate(outs, axis=-1)
        return cat @ wo + bo

    def ln(z, g, b):
        mu = jnp.mean(z, axis=(1, 2), keepdims=True)
        var = jnp.mean((z - mu) ** 2, axis=(1, 2), keepdims=True)
        return (z - mu) / jnp.sqrt(var + EPS) * g + b

    x1 = ln(x + mha(x, x, p["wq_s"], p["bq_s"], p["wk_s"], p["bk_s"],
                    p["wv_s"], p["bv_s"], p["wo_s"], p["bo_s"], mask),
            p["g1"], p["be1"])
    x2 = ln(x1 + mha(x1, enc, p["wq_c"], p["bq_c"], p["wk_c"], p["bk_c"],
                     p["wv_c"], p["bv_c"], p["wo_c"], p["bo_c"], enc_mask),
            p["g2"], p["be2"])
    h = jax.nn.relu(x2 @ p["w1"] + p["b1"])
    y = h @ p["w2"] + p["b2"]
    return ln(x2 + y, p["g3"], p["be3"])


# --------------------------------- main -------------------------------------

if __name__ == "__main__":
    key = jax.random.PRNGKey(0)
    ks = iter(jax.random.split(key, 48))

    def nrm(shape, scale=0.1):
        return (scale * jax.random.normal(next(ks), shape)).astype(jnp.float32)

    params = {
        # masked self-attention (per-head, as in the PyTorch module)
        "wq_s": nrm((N_HEADS, D_MODEL, D_K)), "bq_s": nrm((N_HEADS, D_K), 0.02),
        "wk_s": nrm((N_HEADS, D_MODEL, D_K)), "bk_s": nrm((N_HEADS, D_K), 0.02),
        "wv_s": nrm((N_HEADS, D_MODEL, D_K)), "bv_s": nrm((N_HEADS, D_K), 0.02),
        "wo_s": nrm((D_MODEL, D_MODEL)),      "bo_s": nrm((1, D_MODEL), 0.02),
        # cross-attention
        "wq_c": nrm((N_HEADS, D_MODEL, D_K)), "bq_c": nrm((N_HEADS, D_K), 0.02),
        "wk_c": nrm((N_HEADS, D_MODEL, D_K)), "bk_c": nrm((N_HEADS, D_K), 0.02),
        "wv_c": nrm((N_HEADS, D_MODEL, D_K)), "bv_c": nrm((N_HEADS, D_K), 0.02),
        "wo_c": nrm((D_MODEL, D_MODEL)),      "bo_c": nrm((1, D_MODEL), 0.02),
        # LayerNorm affine params, shape (seq_len, d_model)
        "g1": 1.0 + nrm((SEQ_LEN, D_MODEL)), "be1": nrm((SEQ_LEN, D_MODEL)),
        "g2": 1.0 + nrm((SEQ_LEN, D_MODEL)), "be2": nrm((SEQ_LEN, D_MODEL)),
        "g3": 1.0 + nrm((SEQ_LEN, D_MODEL)), "be3": nrm((SEQ_LEN, D_MODEL)),
        # FFN
        "w1": nrm((D_MODEL, D_FF)), "b1": nrm((1, D_FF), 0.02),
        "w2": nrm((D_FF, D_MODEL)), "b2": nrm((1, D_MODEL), 0.02),
    }

    x = jax.random.normal(next(ks), (B, SEQ_LEN, D_MODEL), dtype=jnp.float32)
    enc_out = jax.random.normal(next(ks), (B, SEQ_LEN, D_MODEL), dtype=jnp.float32)

    # causal mask for masked self-attention, zero mask for cross-attention
    causal = jnp.tril(jnp.ones((SEQ_LEN, SEQ_LEN), dtype=bool))
    mask = jnp.where(causal, 0.0, -1e9).astype(jnp.float32)
    enc_mask = jnp.zeros((SEQ_LEN, SEQ_LEN), dtype=jnp.float32)

    out = decoder_layer(x, enc_out, mask, enc_mask, params)
    out = jax.block_until_ready(out)

    ref = ref_decoder(x, enc_out, mask, enc_mask, params)
    assert out.shape == (B, SEQ_LEN, D_MODEL)
    if not jnp.allclose(out, ref, atol=2e-2, rtol=2e-2):
        max_err = jnp.max(jnp.abs(out - ref))
        raise AssertionError(f"kernel mismatch, max abs err = {max_err}")
    print("KERNEL_OK")
</pallas_src>

<mosaic_0001>
module attributes {stable_mosaic.version = 11 : i64} {
  func.func @decoder_layer_kernel(%arg0: i32, %arg1: memref<2x8x128xf32, #tpu.memory_space<vmem>>, %arg2: memref<2x8x128xf32, #tpu.memory_space<vmem>>, %arg3: memref<8x8xf32, #tpu.memory_space<vmem>>, %arg4: memref<8x8xf32, #tpu.memory_space<vmem>>, %arg5: memref<128x128xf32, #tpu.memory_space<vmem>>, %arg6: memref<1x128xf32, #tpu.memory_space<vmem>>, %arg7: memref<128x128xf32, #tpu.memory_space<vmem>>, %arg8: memref<1x128xf32, #tpu.memory_space<vmem>>, %arg9: memref<128x128xf32, #tpu.memory_space<vmem>>, %arg10: memref<1x128xf32, #tpu.memory_space<vmem>>, %arg11: memref<128x128xf32, #tpu.memory_space<vmem>>, %arg12: memref<1x128xf32, #tpu.memory_space<vmem>>, %arg13: memref<128x128xf32, #tpu.memory_space<vmem>>, %arg14: memref<1x128xf32, #tpu.memory_space<vmem>>, %arg15: memref<128x128xf32, #tpu.memory_space<vmem>>, %arg16: memref<1x128xf32, #tpu.memory_space<vmem>>, %arg17: memref<128x128xf32, #tpu.memory_space<vmem>>, %arg18: memref<1x128xf32, #tpu.memory_space<vmem>>, %arg19: memref<128x128xf32, #tpu.memory_space<vmem>>, %arg20: memref<1x128xf32, #tpu.memory_space<vmem>>, %arg21: memref<8x128xf32, #tpu.memory_space<vmem>>, %arg22: memref<8x128xf32, #tpu.memory_space<vmem>>, %arg23: memref<8x128xf32, #tpu.memory_space<vmem>>, %arg24: memref<8x128xf32, #tpu.memory_space<vmem>>, %arg25: memref<8x128xf32, #tpu.memory_space<vmem>>, %arg26: memref<8x128xf32, #tpu.memory_space<vmem>>, %arg27: memref<128x256xf32, #tpu.memory_space<vmem>>, %arg28: memref<1x256xf32, #tpu.memory_space<vmem>>, %arg29: memref<256x128xf32, #tpu.memory_space<vmem>>, %arg30: memref<1x128xf32, #tpu.memory_space<vmem>>, %arg31: memref<2x8x128xf32, #tpu.memory_space<vmem>>) attributes {dimension_semantics = [#tpu.dimension_semantics<parallel>], iteration_bounds = array<i64: 1>, scalar_prefetch = 0 : i64, scratch_operands = 0 : i64, tpu.core_type = #tpu.core_type<tc>, window_params = [{transform_indices = @transform_0, window_bounds = array<i64: 2, 8, 128>}, {transform_indices = @transform_1, window_bounds = array<i64: 2, 8, 128>}, {pipeline_mode = #tpu.pipeline_mode<synchronous>, transform_indices = @transform_2, window_bounds = array<i64: 8, 8>}, {pipeline_mode = #tpu.pipeline_mode<synchronous>, transform_indices = @transform_3, window_bounds = array<i64: 8, 8>}, {pipeline_mode = #tpu.pipeline_mode<synchronous>, transform_indices = @transform_4, window_bounds = array<i64: 128, 128>}, {pipeline_mode = #tpu.pipeline_mode<synchronous>, transform_indices = @transform_5, window_bounds = array<i64: 1, 128>}, {pipeline_mode = #tpu.pipeline_mode<synchronous>, transform_indices = @transform_6, window_bounds = array<i64: 128, 128>}, {pipeline_mode = #tpu.pipeline_mode<synchronous>, transform_indices = @transform_7, window_bounds = array<i64: 1, 128>}, {pipeline_mode = #tpu.pipeline_mode<synchronous>, transform_indices = @transform_8, window_bounds = array<i64: 128, 128>}, {pipeline_mode = #tpu.pipeline_mode<synchronous>, transform_indices = @transform_9, window_bounds = array<i64: 1, 128>}, {pipeline_mode = #tpu.pipeline_mode<synchronous>, transform_indices = @transform_10, window_bounds = array<i64: 128, 128>}, {pipeline_mode = #tpu.pipeline_mode<synchronous>, transform_indices = @transform_11, window_bounds = array<i64: 1, 128>}, {pipeline_mode = #tpu.pipeline_mode<synchronous>, transform_indices = @transform_12, window_bounds = array<i64: 128, 128>}, {pipeline_mode = #tpu.pipeline_mode<synchronous>, transform_indices = @transform_13, window_bounds = array<i64: 1, 128>}, {pipeline_mode = #tpu.pipeline_mode<synchronous>, transform_indices = @transform_14, window_bounds = array<i64: 128, 128>}, {pipeline_mode = #tpu.pipeline_mode<synchronous>, transform_indices = @transform_15, window_bounds = array<i64: 1, 128>}, {pipeline_mode = #tpu.pipeline_mode<synchronous>, transform_indices = @transform_16, window_bounds = array<i64: 128, 128>}, {pipeline_mode = #tpu.pipeline_mode<synchronous>, transform_indices = @transform_17, window_bounds = array<i64: 1, 128>}, {pipeline_mode = #tpu.pipeline_mode<synchronous>, transform_indices = @transform_18, window_bounds = array<i64: 128, 128>}, {pipeline_mode = #tpu.pipeline_mode<synchronous>, transform_indices = @transform_19, window_bounds = array<i64: 1, 128>}, {pipeline_mode = #tpu.pipeline_mode<synchronous>, transform_indices = @transform_20, window_bounds = array<i64: 8, 128>}, {pipeline_mode = #tpu.pipeline_mode<synchronous>, transform_indices = @transform_21, window_bounds = array<i64: 8, 128>}, {pipeline_mode = #tpu.pipeline_mode<synchronous>, transform_indices = @transform_22, window_bounds = array<i64: 8, 128>}, {pipeline_mode = #tpu.pipeline_mode<synchronous>, transform_indices = @transform_23, window_bounds = array<i64: 8, 128>}, {pipeline_mode = #tpu.pipeline_mode<synchronous>, transform_indices = @transform_24, window_bounds = array<i64: 8, 128>}, {pipeline_mode = #tpu.pipeline_mode<synchronous>, transform_indices = @transform_25, window_bounds = array<i64: 8, 128>}, {pipeline_mode = #tpu.pipeline_mode<synchronous>, transform_indices = @transform_26, window_bounds = array<i64: 128, 256>}, {pipeline_mode = #tpu.pipeline_mode<synchronous>, transform_indices = @transform_27, window_bounds = array<i64: 1, 256>}, {pipeline_mode = #tpu.pipeline_mode<synchronous>, transform_indices = @transform_28, window_bounds = array<i64: 256, 128>}, {pipeline_mode = #tpu.pipeline_mode<synchronous>, transform_indices = @transform_29, window_bounds = array<i64: 1, 128>}, {transform_indices = @transform_30, window_bounds = array<i64: 2, 8, 128>}]} {
    %c0 = arith.constant 0 : index
    %c0_0 = arith.constant 0 : index
    %c0_1 = arith.constant 0 : index
    %0 = vector.load %arg1[%c0, %c0_0, %c0_1] : memref<2x8x128xf32, #tpu.memory_space<vmem>>, vector<2x8x128xf32>
    %c0_2 = arith.constant 0 : index
    %c0_3 = arith.constant 0 : index
    %c0_4 = arith.constant 0 : index
    %1 = vector.load %arg2[%c0_2, %c0_3, %c0_4] : memref<2x8x128xf32, #tpu.memory_space<vmem>>, vector<2x8x128xf32>
    %c0_5 = arith.constant 0 : index
    %c0_6 = arith.constant 0 : index
    %2 = vector.load %arg3[%c0_5, %c0_6] : memref<8x8xf32, #tpu.memory_space<vmem>>, vector<8x8xf32>
    %c0_7 = arith.constant 0 : index
    %c0_8 = arith.constant 0 : index
    %3 = vector.load %arg4[%c0_7, %c0_8] : memref<8x8xf32, #tpu.memory_space<vmem>>, vector<8x8xf32>
    %c0_9 = arith.constant 0 : index
    %c0_10 = arith.constant 0 : index
    %4 = vector.load %arg5[%c0_9, %c0_10] : memref<128x128xf32, #tpu.memory_space<vmem>>, vector<128x128xf32>
    %c0_11 = arith.constant 0 : index
    %c0_12 = arith.constant 0 : index
    %5 = vector.load %arg6[%c0_11, %c0_12] : memref<1x128xf32, #tpu.memory_space<vmem>>, vector<1x128xf32>
    %c0_13 = arith.constant 0 : index
    %c0_14 = arith.constant 0 : index
    %6 = vector.load %arg7[%c0_13, %c0_14] : memref<128x128xf32, #tpu.memory_space<vmem>>, vector<128x128xf32>
    %c0_15 = arith.constant 0 : index
    %c0_16 = arith.constant 0 : index
    %7 = vector.load %arg8[%c0_15, %c0_16] : memref<1x128xf32, #tpu.memory_space<vmem>>, vector<1x128xf32>
    %c0_17 = arith.constant 0 : index
    %c0_18 = arith.constant 0 : index
    %8 = vector.load %arg9[%c0_17, %c0_18] : memref<128x128xf32, #tpu.memory_space<vmem>>, vector<128x128xf32>
    %c0_19 = arith.constant 0 : index
    %c0_20 = arith.constant 0 : index
    %9 = vector.load %arg10[%c0_19, %c0_20] : memref<1x128xf32, #tpu.memory_space<vmem>>, vector<1x128xf32>
    %c0_21 = arith.constant 0 : index
    %c0_22 = arith.constant 0 : index
    %10 = vector.load %arg11[%c0_21, %c0_22] : memref<128x128xf32, #tpu.memory_space<vmem>>, vector<128x128xf32>
    %c0_23 = arith.constant 0 : index
    %c0_24 = arith.constant 0 : index
    %11 = vector.load %arg12[%c0_23, %c0_24] : memref<1x128xf32, #tpu.memory_space<vmem>>, vector<1x128xf32>
    %cst = arith.constant 3.200000e+01 : f32
    %12 = math.sqrt %cst : f32
    %cst_25 = arith.constant 1.000000e+00 : f32
    %13 = arith.divf %cst_25, %12 : f32
    %14 = vector.shape_cast %0 : vector<2x8x128xf32> to vector<16x128xf32>
    %15 = vector.shape_cast %0 : vector<2x8x128xf32> to vector<16x128xf32>
    %cst_26 = arith.constant dense<0.000000e+00> : vector<16x128xf32>
    %16 = tpu.matmul %14, %4, %cst_26 {dimension_numbers = #tpu.dot_dimension_numbers<[1], [0], [0], [1], [0, 0, 1, 1], [], []>} : vector<16x128xf32>, vector<128x128xf32>, vector<16x128xf32> -> vector<16x128xf32>
    %17 = vector.broadcast %5 : vector<1x128xf32> to vector<16x128xf32>
    %18 = arith.addf %16, %17 : vector<16x128xf32>
    %19 = vector.shape_cast %18 : vector<16x128xf32> to vector<2x8x128xf32>
    %cst_27 = arith.constant dense<0.000000e+00> : vector<16x128xf32>
    %20 = tpu.matmul %15, %6, %cst_27 {dimension_numbers = #tpu.dot_dimension_numbers<[1], [0], [0], [1], [0, 0, 1, 1], [], []>} : vector<16x128xf32>, vector<128x128xf32>, vector<16x128xf32> -> vector<16x128xf32>
    %21 = vector.broadcast %7 : vector<1x128xf32> to vector<16x128xf32>
    %22 = arith.addf %20, %21 : vector<16x128xf32>
    %23 = vector.shape_cast %22 : vector<16x128xf32> to vector<2x8x128xf32>
    %cst_28 = arith.constant dense<0.000000e+00> : vector<16x128xf32>
    %24 = tpu.matmul %15, %8, %cst_28 {dimension_numbers = #tpu.dot_dimension_numbers<[1], [0], [0], [1], [0, 0, 1, 1], [], []>} : vector<16x128xf32>, vector<128x128xf32>, vector<16x128xf32> -> vector<16x128xf32>
    %25 = vector.broadcast %9 : vector<1x128xf32> to vector<16x128xf32>
    %26 = arith.addf %24, %25 : vector<16x128xf32>
    %27 = vector.shape_cast %26 : vector<16x128xf32> to vector<2x8x128xf32>
    %28 = vector.extract_strided_slice %19 {offsets = [0, 0, 0], sizes = [2, 8, 32], strides = [1, 1, 1]} : vector<2x8x128xf32> to vector<2x8x32xf32>
    %29 = vector.extract_strided_slice %23 {offsets = [0, 0, 0], sizes = [2, 8, 32], strides = [1, 1, 1]} : vector<2x8x128xf32> to vector<2x8x32xf32>
    %30 = vector.extract_strided_slice %27 {offsets = [0, 0, 0], sizes = [2, 8, 32], strides = [1, 1, 1]} : vector<2x8x128xf32> to vector<2x8x32xf32>
    "tpu.trace_start"() <{level = 10 : i32, message = "bqd,bkd->bqk"}> : () -> ()
    %cst_29 = arith.constant dense<0.000000e+00> : vector<2x8x8xf32>
    %31 = tpu.matmul %28, %29, %cst_29 {dimension_numbers = #tpu.dot_dimension_numbers<[2], [2], [1], [1], [0, 0, 0, 1, 1, 1], [0], [0]>} : vector<2x8x32xf32>, vector<2x8x32xf32>, vector<2x8x8xf32> -> vector<2x8x8xf32>
    "tpu.trace_stop"() : () -> ()
    %32 = vector.broadcast %13 : f32 to vector<2x8x8xf32>
    %33 = arith.mulf %31, %32 : vector<2x8x8xf32>
    %34 = vector.shape_cast %2 : vector<8x8xf32> to vector<1x8x8xf32>
    %35 = vector.broadcast %34 : vector<1x8x8xf32> to vector<2x8x8xf32>
    %36 = arith.addf %33, %35 : vector<2x8x8xf32>
    %cst_30 = arith.constant dense<0xFF800000> : vector<2x8xf32>
    %37 = vector.multi_reduction <maximumf>, %36, %cst_30 [2] : vector<2x8x8xf32> to vector<2x8xf32>
    %38 = vector.shape_cast %37 : vector<2x8xf32> to vector<2x8x1xf32>
    %39 = vector.broadcast %38 : vector<2x8x1xf32> to vector<2x8x8xf32>
    %40 = arith.subf %36, %39 : vector<2x8x8xf32>
    %41 = math.exp %40 : vector<2x8x8xf32>
    %cst_31 = arith.constant dense<0.000000e+00> : vector<2x8xf32>
    %42 = vector.multi_reduction <add>, %41, %cst_31 [2] : vector<2x8x8xf32> to vector<2x8xf32>
    %43 = vector.shape_cast %42 : vector<2x8xf32> to vector<2x8x1xf32>
    %44 = tpu.reciprocal %43 {approx = true} : vector<2x8x1xf32> -> vector<2x8x1xf32>
    %45 = vector.broadcast %44 : vector<2x8x1xf32> to vector<2x8x8xf32>
    %46 = arith.mulf %41, %45 : vector<2x8x8xf32>
    "tpu.trace_start"() <{level = 10 : i32, message = "bqk,bkd->bqd"}> : () -> ()
    %cst_32 = arith.constant dense<0.000000e+00> : vector<2x8x32xf32>
    %47 = tpu.matmul %46, %30, %cst_32 {dimension_numbers = #tpu.dot_dimension_numbers<[2], [1], [1], [2], [0, 0, 0, 1, 1, 2], [0], [0]>} : vector<2x8x8xf32>, vector<2x8x32xf32>, vector<2x8x32xf32> -> vector<2x8x32xf32>
    "tpu.trace_stop"() : () -> ()
    %48 = vector.shape_cast %47 : vector<2x8x32xf32> to vector<16x32xf32>
    %49 = vector.extract_strided_slice %10 {offsets = [0, 0], sizes = [32, 128], strides = [1, 1]} : vector<128x128xf32> to vector<32x128xf32>
    %cst_33 = arith.constant dense<0.000000e+00> : vector<16x128xf32>
    %50 = tpu.matmul %48, %49, %cst_33 {dimension_numbers = #tpu.dot_dimension_numbers<[1], [0], [0], [1], [0, 0, 1, 1], [], []>} : vector<16x32xf32>, vector<32x128xf32>, vector<16x128xf32> -> vector<16x128xf32>
    %51 = vector.extract_strided_slice %19 {offsets = [0, 0, 32], sizes = [2, 8, 32], strides = [1, 1, 1]} : vector<2x8x128xf32> to vector<2x8x32xf32>
    %52 = vector.extract_strided_slice %23 {offsets = [0, 0, 32], sizes = [2, 8, 32], strides = [1, 1, 1]} : vector<2x8x128xf32> to vector<2x8x32xf32>
    %53 = vector.extract_strided_slice %27 {offsets = [0, 0, 32], sizes = [2, 8, 32], strides = [1, 1, 1]} : vector<2x8x128xf32> to vector<2x8x32xf32>
    "tpu.trace_start"() <{level = 10 : i32, message = "bqd,bkd->bqk"}> : () -> ()
    %cst_34 = arith.constant dense<0.000000e+00> : vector<2x8x8xf32>
    %54 = tpu.matmul %51, %52, %cst_34 {dimension_numbers = #tpu.dot_dimension_numbers<[2], [2], [1], [1], [0, 0, 0, 1, 1, 1], [0], [0]>} : vector<2x8x32xf32>, vector<2x8x32xf32>, vector<2x8x8xf32> -> vector<2x8x8xf32>
    "tpu.trace_stop"() : () -> ()
    %55 = vector.broadcast %13 : f32 to vector<2x8x8xf32>
    %56 = arith.mulf %54, %55 : vector<2x8x8xf32>
    %57 = vector.shape_cast %2 : vector<8x8xf32> to vector<1x8x8xf32>
    %58 = vector.broadcast %57 : vector<1x8x8xf32> to vector<2x8x8xf32>
    %59 = arith.addf %56, %58 : vector<2x8x8xf32>
    %cst_35 = arith.constant dense<0xFF800000> : vector<2x8xf32>
    %60 = vector.multi_reduction <maximumf>, %59, %cst_35 [2] : vector<2x8x8xf32> to vector<2x8xf32>
    %61 = vector.shape_cast %60 : vector<2x8xf32> to vector<2x8x1xf32>
    %62 = vector.broadcast %61 : vector<2x8x1xf32> to vector<2x8x8xf32>
    %63 = arith.subf %59, %62 : vector<2x8x8xf32>
    %64 = math.exp %63 : vector<2x8x8xf32>
    %cst_36 = arith.constant dense<0.000000e+00> : vector<2x8xf32>
    %65 = vector.multi_reduction <add>, %64, %cst_36 [2] : vector<2x8x8xf32> to vector<2x8xf32>
    %66 = vector.shape_cast %65 : vector<2x8xf32> to vector<2x8x1xf32>
    %67 = tpu.reciprocal %66 {approx = true} : vector<2x8x1xf32> -> vector<2x8x1xf32>
    %68 = vector.broadcast %67 : vector<2x8x1xf32> to vector<2x8x8xf32>
    %69 = arith.mulf %64, %68 : vector<2x8x8xf32>
    "tpu.trace_start"() <{level = 10 : i32, message = "bqk,bkd->bqd"}> : () -> ()
    %cst_37 = arith.constant dense<0.000000e+00> : vector<2x8x32xf32>
    %70 = tpu.matmul %69, %53, %cst_37 {dimension_numbers = #tpu.dot_dimension_numbers<[2], [1], [1], [2], [0, 0, 0, 1, 1, 2], [0], [0]>} : vector<2x8x8xf32>, vector<2x8x32xf32>, vector<2x8x32xf32> -> vector<2x8x32xf32>
    "tpu.trace_stop"() : () -> ()
    %71 = vector.shape_cast %70 : vector<2x8x32xf32> to vector<16x32xf32>
    %72 = vector.extract_strided_slice %10 {offsets = [32, 0], sizes = [32, 128], strides = [1, 1]} : vector<128x128xf32> to vector<32x128xf32>
    %cst_38 = arith.constant dense<0.000000e+00> : vector<16x128xf32>
    %73 = tpu.matmul %71, %72, %cst_38 {dimension_numbers = #tpu.dot_dimension_numbers<[1], [0], [0], [1], [0, 0, 1, 1], [], []>} : vector<16x32xf32>, vector<32x128xf32>, vector<16x128xf32> -> vector<16x128xf32>
    %74 = arith.addf %50, %73 : vector<16x128xf32>
    %75 = vector.extract_strided_slice %19 {offsets = [0, 0, 64], sizes = [2, 8, 32], strides = [1, 1, 1]} : vector<2x8x128xf32> to vector<2x8x32xf32>
    %76 = vector.extract_strided_slice %23 {offsets = [0, 0, 64], sizes = [2, 8, 32], strides = [1, 1, 1]} : vector<2x8x128xf32> to vector<2x8x32xf32>
    %77 = vector.extract_strided_slice %27 {offsets = [0, 0, 64], sizes = [2, 8, 32], strides = [1, 1, 1]} : vector<2x8x128xf32> to vector<2x8x32xf32>
    "tpu.trace_start"() <{level = 10 : i32, message = "bqd,bkd->bqk"}> : () -> ()
    %cst_39 = arith.constant dense<0.000000e+00> : vector<2x8x8xf32>
    %78 = tpu.matmul %75, %76, %cst_39 {dimension_numbers = #tpu.dot_dimension_numbers<[2], [2], [1], [1], [0, 0, 0, 1, 1, 1], [0], [0]>} : vector<2x8x32xf32>, vector<2x8x32xf32>, vector<2x8x8xf32> -> vector<2x8x8xf32>
    "tpu.trace_stop"() : () -> ()
    %79 = vector.broadcast %13 : f32 to vector<2x8x8xf32>
    %80 = arith.mulf %78, %79 : vector<2x8x8xf32>
    %81 = vector.shape_cast %2 : vector<8x8xf32> to vector<1x8x8xf32>
    %82 = vector.broadcast %81 : vector<1x8x8xf32> to vector<2x8x8xf32>
    %83 = arith.addf %80, %82 : vector<2x8x8xf32>
    %cst_40 = arith.constant dense<0xFF800000> : vector<2x8xf32>
    %84 = vector.multi_reduction <maximumf>, %83, %cst_40 [2] : vector<2x8x8xf32> to vector<2x8xf32>
    %85 = vector.shape_cast %84 : vector<2x8xf32> to vector<2x8x1xf32>
    %86 = vector.broadcast %85 : vector<2x8x1xf32> to vector<2x8x8xf32>
    %87 = arith.subf %83, %86 : vector<2x8x8xf32>
    %88 = math.exp %87 : vector<2x8x8xf32>
    %cst_41 = arith.constant dense<0.000000e+00> : vector<2x8xf32>
    %89 = vector.multi_reduction <add>, %88, %cst_41 [2] : vector<2x8x8xf32> to vector<2x8xf32>
    %90 = vector.shape_cast %89 : vector<2x8xf32> to vector<2x8x1xf32>
    %91 = tpu.reciprocal %90 {approx = true} : vector<2x8x1xf32> -> vector<2x8x1xf32>
    %92 = vector.broadcast %91 : vector<2x8x1xf32> to vector<2x8x8xf32>
    %93 = arith.mulf %88, %92 : vector<2x8x8xf32>
    "tpu.trace_start"() <{level = 10 : i32, message = "bqk,bkd->bqd"}> : () -> ()
    %cst_42 = arith.constant dense<0.000000e+00> : vector<2x8x32xf32>
    %94 = tpu.matmul %93, %77, %cst_42 {dimension_numbers = #tpu.dot_dimension_numbers<[2], [1], [1], [2], [0, 0, 0, 1, 1, 2], [0], [0]>} : vector<2x8x8xf32>, vector<2x8x32xf32>, vector<2x8x32xf32> -> vector<2x8x32xf32>
    "tpu.trace_stop"() : () -> ()
    %95 = vector.shape_cast %94 : vector<2x8x32xf32> to vector<16x32xf32>
    %96 = vector.extract_strided_slice %10 {offsets = [64, 0], sizes = [32, 128], strides = [1, 1]} : vector<128x128xf32> to vector<32x128xf32>
    %cst_43 = arith.constant dense<0.000000e+00> : vector<16x128xf32>
    %97 = tpu.matmul %95, %96, %cst_43 {dimension_numbers = #tpu.dot_dimension_numbers<[1], [0], [0], [1], [0, 0, 1, 1], [], []>} : vector<16x32xf32>, vector<32x128xf32>, vector<16x128xf32> -> vector<16x128xf32>
    %98 = arith.addf %74, %97 : vector<16x128xf32>
    %99 = vector.extract_strided_slice %19 {offsets = [0, 0, 96], sizes = [2, 8, 32], strides = [1, 1, 1]} : vector<2x8x128xf32> to vector<2x8x32xf32>
    %100 = vector.extract_strided_slice %23 {offsets = [0, 0, 96], sizes = [2, 8, 32], strides = [1, 1, 1]} : vector<2x8x128xf32> to vector<2x8x32xf32>
    %101 = vector.extract_strided_slice %27 {offsets = [0, 0, 96], sizes = [2, 8, 32], strides = [1, 1, 1]} : vector<2x8x128xf32> to vector<2x8x32xf32>
    "tpu.trace_start"() <{level = 10 : i32, message = "bqd,bkd->bqk"}> : () -> ()
    %cst_44 = arith.constant dense<0.000000e+00> : vector<2x8x8xf32>
    %102 = tpu.matmul %99, %100, %cst_44 {dimension_numbers = #tpu.dot_dimension_numbers<[2], [2], [1], [1], [0, 0, 0, 1, 1, 1], [0], [0]>} : vector<2x8x32xf32>, vector<2x8x32xf32>, vector<2x8x8xf32> -> vector<2x8x8xf32>
    "tpu.trace_stop"() : () -> ()
    %103 = vector.broadcast %13 : f32 to vector<2x8x8xf32>
    %104 = arith.mulf %102, %103 : vector<2x8x8xf32>
    %105 = vector.shape_cast %2 : vector<8x8xf32> to vector<1x8x8xf32>
    %106 = vector.broadcast %105 : vector<1x8x8xf32> to vector<2x8x8xf32>
    %107 = arith.addf %104, %106 : vector<2x8x8xf32>
    %cst_45 = arith.constant dense<0xFF800000> : vector<2x8xf32>
    %108 = vector.multi_reduction <maximumf>, %107, %cst_45 [2] : vector<2x8x8xf32> to vector<2x8xf32>
    %109 = vector.shape_cast %108 : vector<2x8xf32> to vector<2x8x1xf32>
    %110 = vector.broadcast %109 : vector<2x8x1xf32> to vector<2x8x8xf32>
    %111 = arith.subf %107, %110 : vector<2x8x8xf32>
    %112 = math.exp %111 : vector<2x8x8xf32>
    %cst_46 = arith.constant dense<0.000000e+00> : vector<2x8xf32>
    %113 = vector.multi_reduction <add>, %112, %cst_46 [2] : vector<2x8x8xf32> to vector<2x8xf32>
    %114 = vector.shape_cast %113 : vector<2x8xf32> to vector<2x8x1xf32>
    %115 = tpu.reciprocal %114 {approx = true} : vector<2x8x1xf32> -> vector<2x8x1xf32>
    %116 = vector.broadcast %115 : vector<2x8x1xf32> to vector<2x8x8xf32>
    %117 = arith.mulf %112, %116 : vector<2x8x8xf32>
    "tpu.trace_start"() <{level = 10 : i32, message = "bqk,bkd->bqd"}> : () -> ()
    %cst_47 = arith.constant dense<0.000000e+00> : vector<2x8x32xf32>
    %118 = tpu.matmul %117, %101, %cst_47 {dimension_numbers = #tpu.dot_dimension_numbers<[2], [1], [1], [2], [0, 0, 0, 1, 1, 2], [0], [0]>} : vector<2x8x8xf32>, vector<2x8x32xf32>, vector<2x8x32xf32> -> vector<2x8x32xf32>
    "tpu.trace_stop"() : () -> ()
    %119 = vector.shape_cast %118 : vector<2x8x32xf32> to vector<16x32xf32>
    %120 = vector.extract_strided_slice %10 {offsets = [96, 0], sizes = [32, 128], strides = [1, 1]} : vector<128x128xf32> to vector<32x128xf32>
    %cst_48 = arith.constant dense<0.000000e+00> : vector<16x128xf32>
    %121 = tpu.matmul %119, %120, %cst_48 {dimension_numbers = #tpu.dot_dimension_numbers<[1], [0], [0], [1], [0, 0, 1, 1], [], []>} : vector<16x32xf32>, vector<32x128xf32>, vector<16x128xf32> -> vector<16x128xf32>
    %122 = arith.addf %98, %121 : vector<16x128xf32>
    %123 = vector.broadcast %11 : vector<1x128xf32> to vector<16x128xf32>
    %124 = arith.addf %122, %123 : vector<16x128xf32>
    %125 = vector.shape_cast %124 : vector<16x128xf32> to vector<2x8x128xf32>
    %126 = arith.addf %0, %125 : vector<2x8x128xf32>
    %c0_49 = arith.constant 0 : index
    %c0_50 = arith.constant 0 : index
    %127 = vector.load %arg21[%c0_49, %c0_50] : memref<8x128xf32, #tpu.memory_space<vmem>>, vector<8x128xf32>
    %c0_51 = arith.constant 0 : index
    %c0_52 = arith.constant 0 : index
    %128 = vector.load %arg22[%c0_51, %c0_52] : memref<8x128xf32, #tpu.memory_space<vmem>>, vector<8x128xf32>
    %cst_53 = arith.constant dense<0.000000e+00> : vector<2x8xf32>
    %129 = vector.multi_reduction <add>, %126, %cst_53 [2] : vector<2x8x128xf32> to vector<2x8xf32>
    %130 = vector.shape_cast %129 : vector<2x8xf32> to vector<2x8x1xf32>
    %cst_54 = arith.constant dense<0.000000e+00> : vector<2x1xf32>
    %131 = vector.multi_reduction <add>, %130, %cst_54 [1] : vector<2x8x1xf32> to vector<2x1xf32>
    %132 = vector.shape_cast %131 : vector<2x1xf32> to vector<2x1x1xf32>
    %cst_55 = arith.constant 9.765625E-4 : f32
    %133 = vector.broadcast %cst_55 : f32 to vector<2x1x1xf32>
    %134 = arith.mulf %132, %133 : vector<2x1x1xf32>
    %135 = arith.mulf %126, %126 : vector<2x8x128xf32>
    %cst_56 = arith.constant dense<0.000000e+00> : vector<2x8xf32>
    %136 = vector.multi_reduction <add>, %135, %cst_56 [2] : vector<2x8x128xf32> to vector<2x8xf32>
    %137 = vector.shape_cast %136 : vector<2x8xf32> to vector<2x8x1xf32>
    %cst_57 = arith.constant dense<0.000000e+00> : vector<2x1xf32>
    %138 = vector.multi_reduction <add>, %137, %cst_57 [1] : vector<2x8x1xf32> to vector<2x1xf32>
    %139 = vector.shape_cast %138 : vector<2x1xf32> to vector<2x1x1xf32>
    %cst_58 = arith.constant 9.765625E-4 : f32
    %140 = vector.broadcast %cst_58 : f32 to vector<2x1x1xf32>
    %141 = arith.mulf %139, %140 : vector<2x1x1xf32>
    %142 = arith.mulf %134, %134 : vector<2x1x1xf32>
    %143 = arith.subf %141, %142 : vector<2x1x1xf32>
    %144 = vector.broadcast %134 : vector<2x1x1xf32> to vector<2x8x128xf32>
    %145 = arith.subf %126, %144 : vector<2x8x128xf32>
    %cst_59 = arith.constant 9.99999974E-6 : f32
    %146 = vector.broadcast %cst_59 : f32 to vector<2x1x1xf32>
    %147 = arith.addf %143, %146 : vector<2x1x1xf32>
    %148 = math.rsqrt %147 : vector<2x1x1xf32>
    %149 = vector.broadcast %148 : vector<2x1x1xf32> to vector<2x8x128xf32>
    %150 = arith.mulf %145, %149 : vector<2x8x128xf32>
    %151 = vector.shape_cast %127 : vector<8x128xf32> to vector<1x8x128xf32>
    %152 = vector.broadcast %151 : vector<1x8x128xf32> to vector<2x8x128xf32>
    %153 = arith.mulf %150, %152 : vector<2x8x128xf32>
    %154 = vector.shape_cast %128 : vector<8x128xf32> to vector<1x8x128xf32>
    %155 = vector.broadcast %154 : vector<1x8x128xf32> to vector<2x8x128xf32>
    %156 = arith.addf %153, %155 : vector<2x8x128xf32>
    %c0_60 = arith.constant 0 : index
    %c0_61 = arith.constant 0 : index
    %157 = vector.load %arg13[%c0_60, %c0_61] : memref<128x128xf32, #tpu.memory_space<vmem>>, vector<128x128xf32>
    %c0_62 = arith.constant 0 : index
    %c0_63 = arith.constant 0 : index
    %158 = vector.load %arg14[%c0_62, %c0_63] : memref<1x128xf32, #tpu.memory_space<vmem>>, vector<1x128xf32>
    %c0_64 = arith.constant 0 : index
    %c0_65 = arith.constant 0 : index
    %159 = vector.load %arg15[%c0_64, %c0_65] : memref<128x128xf32, #tpu.memory_space<vmem>>, vector<128x128xf32>
    %c0_66 = arith.constant 0 : index
    %c0_67 = arith.constant 0 : index
    %160 = vector.load %arg16[%c0_66, %c0_67] : memref<1x128xf32, #tpu.memory_space<vmem>>, vector<1x128xf32>
    %c0_68 = arith.constant 0 : index
    %c0_69 = arith.constant 0 : index
    %161 = vector.load %arg17[%c0_68, %c0_69] : memref<128x128xf32, #tpu.memory_space<vmem>>, vector<128x128xf32>
    %c0_70 = arith.constant 0 : index
    %c0_71 = arith.constant 0 : index
    %162 = vector.load %arg18[%c0_70, %c0_71] : memref<1x128xf32, #tpu.memory_space<vmem>>, vector<1x128xf32>
    %c0_72 = arith.constant 0 : index
    %c0_73 = arith.constant 0 : index
    %163 = vector.load %arg19[%c0_72, %c0_73] : memref<128x128xf32, #tpu.memory_space<vmem>>, vector<128x128xf32>
    %c0_74 = arith.constant 0 : index
    %c0_75 = arith.constant 0 : index
    %164 = vector.load %arg20[%c0_74, %c0_75] : memref<1x128xf32, #tpu.memory_space<vmem>>, vector<1x128xf32>
    %cst_76 = arith.constant 3.200000e+01 : f32
    %165 = math.sqrt %cst_76 : f32
    %cst_77 = arith.constant 1.000000e+00 : f32
    %166 = arith.divf %cst_77, %165 : f32
    %167 = vector.shape_cast %156 : vector<2x8x128xf32> to vector<16x128xf32>
    %168 = vector.shape_cast %1 : vector<2x8x128xf32> to vector<16x128xf32>
    %cst_78 = arith.constant dense<0.000000e+00> : vector<16x128xf32>
    %169 = tpu.matmul %167, %157, %cst_78 {dimension_numbers = #tpu.dot_dimension_numbers<[1], [0], [0], [1], [0, 0, 1, 1], [], []>} : vector<16x128xf32>, vector<128x128xf32>, vector<16x128xf32> -> vector<16x128xf32>
    %170 = vector.broadcast %158 : vector<1x128xf32> to vector<16x128xf32>
    %171 = arith.addf %169, %170 : vector<16x128xf32>
    %172 = vector.shape_cast %171 : vector<16x128xf32> to vector<2x8x128xf32>
    %cst_79 = arith.constant dense<0.000000e+00> : vector<16x128xf32>
    %173 = tpu.matmul %168, %159, %cst_79 {dimension_numbers = #tpu.dot_dimension_numbers<[1], [0], [0], [1], [0, 0, 1, 1], [], []>} : vector<16x128xf32>, vector<128x128xf32>, vector<16x128xf32> -> vector<16x128xf32>
    %174 = vector.broadcast %160 : vector<1x128xf32> to vector<16x128xf32>
    %175 = arith.addf %173, %174 : vector<16x128xf32>
    %176 = vector.shape_cast %175 : vector<16x128xf32> to vector<2x8x128xf32>
    %cst_80 = arith.constant dense<0.000000e+00> : vector<16x128xf32>
    %177 = tpu.matmul %168, %161, %cst_80 {dimension_numbers = #tpu.dot_dimension_numbers<[1], [0], [0], [1], [0, 0, 1, 1], [], []>} : vector<16x128xf32>, vector<128x128xf32>, vector<16x128xf32> -> vector<16x128xf32>
    %178 = vector.broadcast %162 : vector<1x128xf32> to vector<16x128xf32>
    %179 = arith.addf %177, %178 : vector<16x128xf32>
    %180 = vector.shape_cast %179 : vector<16x128xf32> to vector<2x8x128xf32>
    %181 = vector.extract_strided_slice %172 {offsets = [0, 0, 0], sizes = [2, 8, 32], strides = [1, 1, 1]} : vector<2x8x128xf32> to vector<2x8x32xf32>
    %182 = vector.extract_strided_slice %176 {offsets = [0, 0, 0], sizes = [2, 8, 32], strides = [1, 1, 1]} : vector<2x8x128xf32> to vector<2x8x32xf32>
    %183 = vector.extract_strided_slice %180 {offsets = [0, 0, 0], sizes = [2, 8, 32], strides = [1, 1, 1]} : vector<2x8x128xf32> to vector<2x8x32xf32>
    "tpu.trace_start"() <{level = 10 : i32, message = "bqd,bkd->bqk"}> : () -> ()
    %cst_81 = arith.constant dense<0.000000e+00> : vector<2x8x8xf32>
    %184 = tpu.matmul %181, %182, %cst_81 {dimension_numbers = #tpu.dot_dimension_numbers<[2], [2], [1], [1], [0, 0, 0, 1, 1, 1], [0], [0]>} : vector<2x8x32xf32>, vector<2x8x32xf32>, vector<2x8x8xf32> -> vector<2x8x8xf32>
    "tpu.trace_stop"() : () -> ()
    %185 = vector.broadcast %166 : f32 to vector<2x8x8xf32>
    %186 = arith.mulf %184, %185 : vector<2x8x8xf32>
    %187 = vector.shape_cast %3 : vector<8x8xf32> to vector<1x8x8xf32>
    %188 = vector.broadcast %187 : vector<1x8x8xf32> to vector<2x8x8xf32>
    %189 = arith.addf %186, %188 : vector<2x8x8xf32>
    %cst_82 = arith.constant dense<0xFF800000> : vector<2x8xf32>
    %190 = vector.multi_reduction <maximumf>, %189, %cst_82 [2] : vector<2x8x8xf32> to vector<2x8xf32>
    %191 = vector.shape_cast %190 : vector<2x8xf32> to vector<2x8x1xf32>
    %192 = vector.broadcast %191 : vector<2x8x1xf32> to vector<2x8x8xf32>
    %193 = arith.subf %189, %192 : vector<2x8x8xf32>
    %194 = math.exp %193 : vector<2x8x8xf32>
    %cst_83 = arith.constant dense<0.000000e+00> : vector<2x8xf32>
    %195 = vector.multi_reduction <add>, %194, %cst_83 [2] : vector<2x8x8xf32> to vector<2x8xf32>
    %196 = vector.shape_cast %195 : vector<2x8xf32> to vector<2x8x1xf32>
    %197 = tpu.reciprocal %196 {approx = true} : vector<2x8x1xf32> -> vector<2x8x1xf32>
    %198 = vector.broadcast %197 : vector<2x8x1xf32> to vector<2x8x8xf32>
    %199 = arith.mulf %194, %198 : vector<2x8x8xf32>
    "tpu.trace_start"() <{level = 10 : i32, message = "bqk,bkd->bqd"}> : () -> ()
    %cst_84 = arith.constant dense<0.000000e+00> : vector<2x8x32xf32>
    %200 = tpu.matmul %199, %183, %cst_84 {dimension_numbers = #tpu.dot_dimension_numbers<[2], [1], [1], [2], [0, 0, 0, 1, 1, 2], [0], [0]>} : vector<2x8x8xf32>, vector<2x8x32xf32>, vector<2x8x32xf32> -> vector<2x8x32xf32>
    "tpu.trace_stop"() : () -> ()
    %201 = vector.shape_cast %200 : vector<2x8x32xf32> to vector<16x32xf32>
    %202 = vector.extract_strided_slice %163 {offsets = [0, 0], sizes = [32, 128], strides = [1, 1]} : vector<128x128xf32> to vector<32x128xf32>
    %cst_85 = arith.constant dense<0.000000e+00> : vector<16x128xf32>
    %203 = tpu.matmul %201, %202, %cst_85 {dimension_numbers = #tpu.dot_dimension_numbers<[1], [0], [0], [1], [0, 0, 1, 1], [], []>} : vector<16x32xf32>, vector<32x128xf32>, vector<16x128xf32> -> vector<16x128xf32>
    %204 = vector.extract_strided_slice %172 {offsets = [0, 0, 32], sizes = [2, 8, 32], strides = [1, 1, 1]} : vector<2x8x128xf32> to vector<2x8x32xf32>
    %205 = vector.extract_strided_slice %176 {offsets = [0, 0, 32], sizes = [2, 8, 32], strides = [1, 1, 1]} : vector<2x8x128xf32> to vector<2x8x32xf32>
    %206 = vector.extract_strided_slice %180 {offsets = [0, 0, 32], sizes = [2, 8, 32], strides = [1, 1, 1]} : vector<2x8x128xf32> to vector<2x8x32xf32>
    "tpu.trace_start"() <{level = 10 : i32, message = "bqd,bkd->bqk"}> : () -> ()
    %cst_86 = arith.constant dense<0.000000e+00> : vector<2x8x8xf32>
    %207 = tpu.matmul %204, %205, %cst_86 {dimension_numbers = #tpu.dot_dimension_numbers<[2], [2], [1], [1], [0, 0, 0, 1, 1, 1], [0], [0]>} : vector<2x8x32xf32>, vector<2x8x32xf32>, vector<2x8x8xf32> -> vector<2x8x8xf32>
    "tpu.trace_stop"() : () -> ()
    %208 = vector.broadcast %166 : f32 to vector<2x8x8xf32>
    %209 = arith.mulf %207, %208 : vector<2x8x8xf32>
    %210 = vector.shape_cast %3 : vector<8x8xf32> to vector<1x8x8xf32>
    %211 = vector.broadcast %210 : vector<1x8x8xf32> to vector<2x8x8xf32>
    %212 = arith.addf %209, %211 : vector<2x8x8xf32>
    %cst_87 = arith.constant dense<0xFF800000> : vector<2x8xf32>
    %213 = vector.multi_reduction <maximumf>, %212, %cst_87 [2] : vector<2x8x8xf32> to vector<2x8xf32>
    %214 = vector.shape_cast %213 : vector<2x8xf32> to vector<2x8x1xf32>
    %215 = vector.broadcast %214 : vector<2x8x1xf32> to vector<2x8x8xf32>
    %216 = arith.subf %212, %215 : vector<2x8x8xf32>
    %217 = math.exp %216 : vector<2x8x8xf32>
    %cst_88 = arith.constant dense<0.000000e+00> : vector<2x8xf32>
    %218 = vector.multi_reduction <add>, %217, %cst_88 [2] : vector<2x8x8xf32> to vector<2x8xf32>
    %219 = vector.shape_cast %218 : vector<2x8xf32> to vector<2x8x1xf32>
    %220 = tpu.reciprocal %219 {approx = true} : vector<2x8x1xf32> -> vector<2x8x1xf32>
    %221 = vector.broadcast %220 : vector<2x8x1xf32> to vector<2x8x8xf32>
    %222 = arith.mulf %217, %221 : vector<2x8x8xf32>
    "tpu.trace_start"() <{level = 10 : i32, message = "bqk,bkd->bqd"}> : () -> ()
    %cst_89 = arith.constant dense<0.000000e+00> : vector<2x8x32xf32>
    %223 = tpu.matmul %222, %206, %cst_89 {dimension_numbers = #tpu.dot_dimension_numbers<[2], [1], [1], [2], [0, 0, 0, 1, 1, 2], [0], [0]>} : vector<2x8x8xf32>, vector<2x8x32xf32>, vector<2x8x32xf32> -> vector<2x8x32xf32>
    "tpu.trace_stop"() : () -> ()
    %224 = vector.shape_cast %223 : vector<2x8x32xf32> to vector<16x32xf32>
    %225 = vector.extract_strided_slice %163 {offsets = [32, 0], sizes = [32, 128], strides = [1, 1]} : vector<128x128xf32> to vector<32x128xf32>
    %cst_90 = arith.constant dense<0.000000e+00> : vector<16x128xf32>
    %226 = tpu.matmul %224, %225, %cst_90 {dimension_numbers = #tpu.dot_dimension_numbers<[1], [0], [0], [1], [0, 0, 1, 1], [], []>} : vector<16x32xf32>, vector<32x128xf32>, vector<16x128xf32> -> vector<16x128xf32>
    %227 = arith.addf %203, %226 : vector<16x128xf32>
    %228 = vector.extract_strided_slice %172 {offsets = [0, 0, 64], sizes = [2, 8, 32], strides = [1, 1, 1]} : vector<2x8x128xf32> to vector<2x8x32xf32>
    %229 = vector.extract_strided_slice %176 {offsets = [0, 0, 64], sizes = [2, 8, 32], strides = [1, 1, 1]} : vector<2x8x128xf32> to vector<2x8x32xf32>
    %230 = vector.extract_strided_slice %180 {offsets = [0, 0, 64], sizes = [2, 8, 32], strides = [1, 1, 1]} : vector<2x8x128xf32> to vector<2x8x32xf32>
    "tpu.trace_start"() <{level = 10 : i32, message = "bqd,bkd->bqk"}> : () -> ()
    %cst_91 = arith.constant dense<0.000000e+00> : vector<2x8x8xf32>
    %231 = tpu.matmul %228, %229, %cst_91 {dimension_numbers = #tpu.dot_dimension_numbers<[2], [2], [1], [1], [0, 0, 0, 1, 1, 1], [0], [0]>} : vector<2x8x32xf32>, vector<2x8x32xf32>, vector<2x8x8xf32> -> vector<2x8x8xf32>
    "tpu.trace_stop"() : () -> ()
    %232 = vector.broadcast %166 : f32 to vector<2x8x8xf32>
    %233 = arith.mulf %231, %232 : vector<2x8x8xf32>
    %234 = vector.shape_cast %3 : vector<8x8xf32> to vector<1x8x8xf32>
    %235 = vector.broadcast %234 : vector<1x8x8xf32> to vector<2x8x8xf32>
    %236 = arith.addf %233, %235 : vector<2x8x8xf32>
    %cst_92 = arith.constant dense<0xFF800000> : vector<2x8xf32>
    %237 = vector.multi_reduction <maximumf>, %236, %cst_92 [2] : vector<2x8x8xf32> to vector<2x8xf32>
    %238 = vector.shape_cast %237 : vector<2x8xf32> to vector<2x8x1xf32>
    %239 = vector.broadcast %238 : vector<2x8x1xf32> to vector<2x8x8xf32>
    %240 = arith.subf %236, %239 : vector<2x8x8xf32>
    %241 = math.exp %240 : vector<2x8x8xf32>
    %cst_93 = arith.constant dense<0.000000e+00> : vector<2x8xf32>
    %242 = vector.multi_reduction <add>, %241, %cst_93 [2] : vector<2x8x8xf32> to vector<2x8xf32>
    %243 = vector.shape_cast %242 : vector<2x8xf32> to vector<2x8x1xf32>
    %244 = tpu.reciprocal %243 {approx = true} : vector<2x8x1xf32> -> vector<2x8x1xf32>
    %245 = vector.broadcast %244 : vector<2x8x1xf32> to vector<2x8x8xf32>
    %246 = arith.mulf %241, %245 : vector<2x8x8xf32>
    "tpu.trace_start"() <{level = 10 : i32, message = "bqk,bkd->bqd"}> : () -> ()
    %cst_94 = arith.constant dense<0.000000e+00> : vector<2x8x32xf32>
    %247 = tpu.matmul %246, %230, %cst_94 {dimension_numbers = #tpu.dot_dimension_numbers<[2], [1], [1], [2], [0, 0, 0, 1, 1, 2], [0], [0]>} : vector<2x8x8xf32>, vector<2x8x32xf32>, vector<2x8x32xf32> -> vector<2x8x32xf32>
    "tpu.trace_stop"() : () -> ()
    %248 = vector.shape_cast %247 : vector<2x8x32xf32> to vector<16x32xf32>
    %249 = vector.extract_strided_slice %163 {offsets = [64, 0], sizes = [32, 128], strides = [1, 1]} : vector<128x128xf32> to vector<32x128xf32>
    %cst_95 = arith.constant dense<0.000000e+00> : vector<16x128xf32>
    %250 = tpu.matmul %248, %249, %cst_95 {dimension_numbers = #tpu.dot_dimension_numbers<[1], [0], [0], [1], [0, 0, 1, 1], [], []>} : vector<16x32xf32>, vector<32x128xf32>, vector<16x128xf32> -> vector<16x128xf32>
    %251 = arith.addf %227, %250 : vector<16x128xf32>
    %252 = vector.extract_strided_slice %172 {offsets = [0, 0, 96], sizes = [2, 8, 32], strides = [1, 1, 1]} : vector<2x8x128xf32> to vector<2x8x32xf32>
    %253 = vector.extract_strided_slice %176 {offsets = [0, 0, 96], sizes = [2, 8, 32], strides = [1, 1, 1]} : vector<2x8x128xf32> to vector<2x8x32xf32>
    %254 = vector.extract_strided_slice %180 {offsets = [0, 0, 96], sizes = [2, 8, 32], strides = [1, 1, 1]} : vector<2x8x128xf32> to vector<2x8x32xf32>
    "tpu.trace_start"() <{level = 10 : i32, message = "bqd,bkd->bqk"}> : () -> ()
    %cst_96 = arith.constant dense<0.000000e+00> : vector<2x8x8xf32>
    %255 = tpu.matmul %252, %253, %cst_96 {dimension_numbers = #tpu.dot_dimension_numbers<[2], [2], [1], [1], [0, 0, 0, 1, 1, 1], [0], [0]>} : vector<2x8x32xf32>, vector<2x8x32xf32>, vector<2x8x8xf32> -> vector<2x8x8xf32>
    "tpu.trace_stop"() : () -> ()
    %256 = vector.broadcast %166 : f32 to vector<2x8x8xf32>
    %257 = arith.mulf %255, %256 : vector<2x8x8xf32>
    %258 = vector.shape_cast %3 : vector<8x8xf32> to vector<1x8x8xf32>
    %259 = vector.broadcast %258 : vector<1x8x8xf32> to vector<2x8x8xf32>
    %260 = arith.addf %257, %259 : vector<2x8x8xf32>
    %cst_97 = arith.constant dense<0xFF800000> : vector<2x8xf32>
    %261 = vector.multi_reduction <maximumf>, %260, %cst_97 [2] : vector<2x8x8xf32> to vector<2x8xf32>
    %262 = vector.shape_cast %261 : vector<2x8xf32> to vector<2x8x1xf32>
    %263 = vector.broadcast %262 : vector<2x8x1xf32> to vector<2x8x8xf32>
    %264 = arith.subf %260, %263 : vector<2x8x8xf32>
    %265 = math.exp %264 : vector<2x8x8xf32>
    %cst_98 = arith.constant dense<0.000000e+00> : vector<2x8xf32>
    %266 = vector.multi_reduction <add>, %265, %cst_98 [2] : vector<2x8x8xf32> to vector<2x8xf32>
    %267 = vector.shape_cast %266 : vector<2x8xf32> to vector<2x8x1xf32>
    %268 = tpu.reciprocal %267 {approx = true} : vector<2x8x1xf32> -> vector<2x8x1xf32>
    %269 = vector.broadcast %268 : vector<2x8x1xf32> to vector<2x8x8xf32>
    %270 = arith.mulf %265, %269 : vector<2x8x8xf32>
    "tpu.trace_start"() <{level = 10 : i32, message = "bqk,bkd->bqd"}> : () -> ()
    %cst_99 = arith.constant dense<0.000000e+00> : vector<2x8x32xf32>
    %271 = tpu.matmul %270, %254, %cst_99 {dimension_numbers = #tpu.dot_dimension_numbers<[2], [1], [1], [2], [0, 0, 0, 1, 1, 2], [0], [0]>} : vector<2x8x8xf32>, vector<2x8x32xf32>, vector<2x8x32xf32> -> vector<2x8x32xf32>
    "tpu.trace_stop"() : () -> ()
    %272 = vector.shape_cast %271 : vector<2x8x32xf32> to vector<16x32xf32>
    %273 = vector.extract_strided_slice %163 {offsets = [96, 0], sizes = [32, 128], strides = [1, 1]} : vector<128x128xf32> to vector<32x128xf32>
    %cst_100 = arith.constant dense<0.000000e+00> : vector<16x128xf32>
    %274 = tpu.matmul %272, %273, %cst_100 {dimension_numbers = #tpu.dot_dimension_numbers<[1], [0], [0], [1], [0, 0, 1, 1], [], []>} : vector<16x32xf32>, vector<32x128xf32>, vector<16x128xf32> -> vector<16x128xf32>
    %275 = arith.addf %251, %274 : vector<16x128xf32>
    %276 = vector.broadcast %164 : vector<1x128xf32> to vector<16x128xf32>
    %277 = arith.addf %275, %276 : vector<16x128xf32>
    %278 = vector.shape_cast %277 : vector<16x128xf32> to vector<2x8x128xf32>
    %279 = arith.addf %156, %278 : vector<2x8x128xf32>
    %c0_101 = arith.constant 0 : index
    %c0_102 = arith.constant 0 : index
    %280 = vector.load %arg23[%c0_101, %c0_102] : memref<8x128xf32, #tpu.memory_space<vmem>>, vector<8x128xf32>
    %c0_103 = arith.constant 0 : index
    %c0_104 = arith.constant 0 : index
    %281 = vector.load %arg24[%c0_103, %c0_104] : memref<8x128xf32, #tpu.memory_space<vmem>>, vector<8x128xf32>
    %cst_105 = arith.constant dense<0.000000e+00> : vector<2x8xf32>
    %282 = vector.multi_reduction <add>, %279, %cst_105 [2] : vector<2x8x128xf32> to vector<2x8xf32>
    %283 = vector.shape_cast %282 : vector<2x8xf32> to vector<2x8x1xf32>
    %cst_106 = arith.constant dense<0.000000e+00> : vector<2x1xf32>
    %284 = vector.multi_reduction <add>, %283, %cst_106 [1] : vector<2x8x1xf32> to vector<2x1xf32>
    %285 = vector.shape_cast %284 : vector<2x1xf32> to vector<2x1x1xf32>
    %cst_107 = arith.constant 9.765625E-4 : f32
    %286 = vector.broadcast %cst_107 : f32 to vector<2x1x1xf32>
    %287 = arith.mulf %285, %286 : vector<2x1x1xf32>
    %288 = arith.mulf %279, %279 : vector<2x8x128xf32>
    %cst_108 = arith.constant dense<0.000000e+00> : vector<2x8xf32>
    %289 = vector.multi_reduction <add>, %288, %cst_108 [2] : vector<2x8x128xf32> to vector<2x8xf32>
    %290 = vector.shape_cast %289 : vector<2x8xf32> to vector<2x8x1xf32>
    %cst_109 = arith.constant dense<0.000000e+00> : vector<2x1xf32>
    %291 = vector.multi_reduction <add>, %290, %cst_109 [1] : vector<2x8x1xf32> to vector<2x1xf32>
    %292 = vector.shape_cast %291 : vector<2x1xf32> to vector<2x1x1xf32>
    %cst_110 = arith.constant 9.765625E-4 : f32
    %293 = vector.broadcast %cst_110 : f32 to vector<2x1x1xf32>
    %294 = arith.mulf %292, %293 : vector<2x1x1xf32>
    %295 = arith.mulf %287, %287 : vector<2x1x1xf32>
    %296 = arith.subf %294, %295 : vector<2x1x1xf32>
    %297 = vector.broadcast %287 : vector<2x1x1xf32> to vector<2x8x128xf32>
    %298 = arith.subf %279, %297 : vector<2x8x128xf32>
    %cst_111 = arith.constant 9.99999974E-6 : f32
    %299 = vector.broadcast %cst_111 : f32 to vector<2x1x1xf32>
    %300 = arith.addf %296, %299 : vector<2x1x1xf32>
    %301 = math.rsqrt %300 : vector<2x1x1xf32>
    %302 = vector.broadcast %301 : vector<2x1x1xf32> to vector<2x8x128xf32>
    %303 = arith.mulf %298, %302 : vector<2x8x128xf32>
    %304 = vector.shape_cast %280 : vector<8x128xf32> to vector<1x8x128xf32>
    %305 = vector.broadcast %304 : vector<1x8x128xf32> to vector<2x8x128xf32>
    %306 = arith.mulf %303, %305 : vector<2x8x128xf32>
    %307 = vector.shape_cast %281 : vector<8x128xf32> to vector<1x8x128xf32>
    %308 = vector.broadcast %307 : vector<1x8x128xf32> to vector<2x8x128xf32>
    %309 = arith.addf %306, %308 : vector<2x8x128xf32>
    %310 = vector.shape_cast %309 : vector<2x8x128xf32> to vector<16x128xf32>
    %c0_112 = arith.constant 0 : index
    %c0_113 = arith.constant 0 : index
    %311 = vector.load %arg27[%c0_112, %c0_113] : memref<128x256xf32, #tpu.memory_space<vmem>>, vector<128x256xf32>
    %cst_114 = arith.constant dense<0.000000e+00> : vector<16x256xf32>
    %312 = tpu.matmul %310, %311, %cst_114 {dimension_numbers = #tpu.dot_dimension_numbers<[1], [0], [0], [1], [0, 0, 1, 1], [], []>} : vector<16x128xf32>, vector<128x256xf32>, vector<16x256xf32> -> vector<16x256xf32>
    %c0_115 = arith.constant 0 : index
    %c0_116 = arith.constant 0 : index
    %313 = vector.load %arg28[%c0_115, %c0_116] : memref<1x256xf32, #tpu.memory_space<vmem>>, vector<1x256xf32>
    %314 = vector.broadcast %313 : vector<1x256xf32> to vector<16x256xf32>
    %315 = arith.addf %312, %314 : vector<16x256xf32>
    %cst_117 = arith.constant 0.000000e+00 : f32
    %316 = vector.broadcast %cst_117 : f32 to vector<16x256xf32>
    %317 = arith.maximumf %315, %316 : vector<16x256xf32>
    %c0_118 = arith.constant 0 : index
    %c0_119 = arith.constant 0 : index
    %318 = vector.load %arg29[%c0_118, %c0_119] : memref<256x128xf32, #tpu.memory_space<vmem>>, vector<256x128xf32>
    %cst_120 = arith.constant dense<0.000000e+00> : vector<16x128xf32>
    %319 = tpu.matmul %317, %318, %cst_120 {dimension_numbers = #tpu.dot_dimension_numbers<[1], [0], [0], [1], [0, 0, 1, 1], [], []>} : vector<16x256xf32>, vector<256x128xf32>, vector<16x128xf32> -> vector<16x128xf32>
    %c0_121 = arith.constant 0 : index
    %c0_122 = arith.constant 0 : index
    %320 = vector.load %arg30[%c0_121, %c0_122] : memref<1x128xf32, #tpu.memory_space<vmem>>, vector<1x128xf32>
    %321 = vector.broadcast %320 : vector<1x128xf32> to vector<16x128xf32>
    %322 = arith.addf %319, %321 : vector<16x128xf32>
    %323 = vector.shape_cast %322 : vector<16x128xf32> to vector<2x8x128xf32>
    %324 = arith.addf %309, %323 : vector<2x8x128xf32>
    %c0_123 = arith.constant 0 : index
    %c0_124 = arith.constant 0 : index
    %325 = vector.load %arg25[%c0_123, %c0_124] : memref<8x128xf32, #tpu.memory_space<vmem>>, vector<8x128xf32>
    %c0_125 = arith.constant 0 : index
    %c0_126 = arith.constant 0 : index
    %326 = vector.load %arg26[%c0_125, %c0_126] : memref<8x128xf32, #tpu.memory_space<vmem>>, vector<8x128xf32>
    %cst_127 = arith.constant dense<0.000000e+00> : vector<2x8xf32>
    %327 = vector.multi_reduction <add>, %324, %cst_127 [2] : vector<2x8x128xf32> to vector<2x8xf32>
    %328 = vector.shape_cast %327 : vector<2x8xf32> to vector<2x8x1xf32>
    %cst_128 = arith.constant dense<0.000000e+00> : vector<2x1xf32>
    %329 = vector.multi_reduction <add>, %328, %cst_128 [1] : vector<2x8x1xf32> to vector<2x1xf32>
    %330 = vector.shape_cast %329 : vector<2x1xf32> to vector<2x1x1xf32>
    %cst_129 = arith.constant 9.765625E-4 : f32
    %331 = vector.broadcast %cst_129 : f32 to vector<2x1x1xf32>
    %332 = arith.mulf %330, %331 : vector<2x1x1xf32>
    %333 = arith.mulf %324, %324 : vector<2x8x128xf32>
    %cst_130 = arith.constant dense<0.000000e+00> : vector<2x8xf32>
    %334 = vector.multi_reduction <add>, %333, %cst_130 [2] : vector<2x8x128xf32> to vector<2x8xf32>
    %335 = vector.shape_cast %334 : vector<2x8xf32> to vector<2x8x1xf32>
    %cst_131 = arith.constant dense<0.000000e+00> : vector<2x1xf32>
    %336 = vector.multi_reduction <add>, %335, %cst_131 [1] : vector<2x8x1xf32> to vector<2x1xf32>
    %337 = vector.shape_cast %336 : vector<2x1xf32> to vector<2x1x1xf32>
    %cst_132 = arith.constant 9.765625E-4 : f32
    %338 = vector.broadcast %cst_132 : f32 to vector<2x1x1xf32>
    %339 = arith.mulf %337, %338 : vector<2x1x1xf32>
    %340 = arith.mulf %332, %332 : vector<2x1x1xf32>
    %341 = arith.subf %339, %340 : vector<2x1x1xf32>
    %342 = vector.broadcast %332 : vector<2x1x1xf32> to vector<2x8x128xf32>
    %343 = arith.subf %324, %342 : vector<2x8x128xf32>
    %cst_133 = arith.constant 9.99999974E-6 : f32
    %344 = vector.broadcast %cst_133 : f32 to vector<2x1x1xf32>
    %345 = arith.addf %341, %344 : vector<2x1x1xf32>
    %346 = math.rsqrt %345 : vector<2x1x1xf32>
    %347 = vector.broadcast %346 : vector<2x1x1xf32> to vector<2x8x128xf32>
    %348 = arith.mulf %343, %347 : vector<2x8x128xf32>
    %349 = vector.shape_cast %325 : vector<8x128xf32> to vector<1x8x128xf32>
    %350 = vector.broadcast %349 : vector<1x8x128xf32> to vector<2x8x128xf32>
    %351 = arith.mulf %348, %350 : vector<2x8x128xf32>
    %352 = vector.shape_cast %326 : vector<8x128xf32> to vector<1x8x128xf32>
    %353 = vector.broadcast %352 : vector<1x8x128xf32> to vector<2x8x128xf32>
    %354 = arith.addf %351, %353 : vector<2x8x128xf32>
    %c0_134 = arith.constant 0 : index
    %c0_135 = arith.constant 0 : index
    %c0_136 = arith.constant 0 : index
    %355 = vector.load %arg31[%c0_134, %c0_135, %c0_136] : memref<2x8x128xf32, #tpu.memory_space<vmem>>, vector<2x8x128xf32>
    tpu.vector_store %arg31[%c0_134, %c0_135, %c0_136], %354 {strides = array<i32>} : memref<2x8x128xf32, #tpu.memory_space<vmem>>, vector<2x8x128xf32>,
    return
  }
  func.func @transform_0(%arg0: i32) -> (i32, i32, i32) {
    %c0_i32 = arith.constant 0 : i32
    %c0_i32_0 = arith.constant 0 : i32
    %c0_i32_1 = arith.constant 0 : i32
    return %arg0, %c0_i32, %c0_i32_0 : i32, i32, i32
  }
  func.func @transform_1(%arg0: i32) -> (i32, i32, i32) {
    %c0_i32 = arith.constant 0 : i32
    %c0_i32_0 = arith.constant 0 : i32
    %c0_i32_1 = arith.constant 0 : i32
    return %arg0, %c0_i32, %c0_i32_0 : i32, i32, i32
  }
  func.func @transform_2(%arg0: i32) -> (i32, i32) {
    %c0_i32 = arith.constant 0 : i32
    %c0_i32_0 = arith.constant 0 : i32
    %c0_i32_1 = arith.constant 0 : i32
    return %c0_i32, %c0_i32_0 : i32, i32
  }
  func.func @transform_3(%arg0: i32) -> (i32, i32) {
    %c0_i32 = arith.constant 0 : i32
    %c0_i32_0 = arith.constant 0 : i32
    %c0_i32_1 = arith.constant 0 : i32
    return %c0_i32, %c0_i32_0 : i32, i32
  }
  func.func @transform_4(%arg0: i32) -> (i32, i32) {
    %c0_i32 = arith.constant 0 : i32
    %c0_i32_0 = arith.constant 0 : i32
    %c0_i32_1 = arith.constant 0 : i32
    return %c0_i32, %c0_i32_0 : i32, i32
  }
  func.func @transform_5(%arg0: i32) -> (i32, i32) {
    %c0_i32 = arith.constant 0 : i32
    %c0_i32_0 = arith.constant 0 : i32
    %c0_i32_1 = arith.constant 0 : i32
    return %c0_i32, %c0_i32_0 : i32, i32
  }
  func.func @transform_6(%arg0: i32) -> (i32, i32) {
    %c0_i32 = arith.constant 0 : i32
    %c0_i32_0 = arith.constant 0 : i32
    %c0_i32_1 = arith.constant 0 : i32
    return %c0_i32, %c0_i32_0 : i32, i32
  }
  func.func @transform_7(%arg0: i32) -> (i32, i32) {
    %c0_i32 = arith.constant 0 : i32
    %c0_i32_0 = arith.constant 0 : i32
    %c0_i32_1 = arith.constant 0 : i32
    return %c0_i32, %c0_i32_0 : i32, i32
  }
  func.func @transform_8(%arg0: i32) -> (i32, i32) {
    %c0_i32 = arith.constant 0 : i32
    %c0_i32_0 = arith.constant 0 : i32
    %c0_i32_1 = arith.constant 0 : i32
    return %c0_i32, %c0_i32_0 : i32, i32
  }
  func.func @transform_9(%arg0: i32) -> (i32, i32) {
    %c0_i32 = arith.constant 0 : i32
    %c0_i32_0 = arith.constant 0 : i32
    %c0_i32_1 = arith.constant 0 : i32
    return %c0_i32, %c0_i32_0 : i32, i32
  }
  func.func @transform_10(%arg0: i32) -> (i32, i32) {
    %c0_i32 = arith.constant 0 : i32
    %c0_i32_0 = arith.constant 0 : i32
    %c0_i32_1 = arith.constant 0 : i32
    return %c0_i32, %c0_i32_0 : i32, i32
  }
  func.func @transform_11(%arg0: i32) -> (i32, i32) {
    %c0_i32 = arith.constant 0 : i32
    %c0_i32_0 = arith.constant 0 : i32
    %c0_i32_1 = arith.constant 0 : i32
    return %c0_i32, %c0_i32_0 : i32, i32
  }
  func.func @transform_12(%arg0: i32) -> (i32, i32) {
    %c0_i32 = arith.constant 0 : i32
    %c0_i32_0 = arith.constant 0 : i32
    %c0_i32_1 = arith.constant 0 : i32
    return %c0_i32, %c0_i32_0 : i32, i32
  }
  func.func @transform_13(%arg0: i32) -> (i32, i32) {
    %c0_i32 = arith.constant 0 : i32
    %c0_i32_0 = arith.constant 0 : i32
    %c0_i32_1 = arith.constant 0 : i32
    return %c0_i32, %c0_i32_0 : i32, i32
  }
  func.func @transform_14(%arg0: i32) -> (i32, i32) {
    %c0_i32 = arith.constant 0 : i32
    %c0_i32_0 = arith.constant 0 : i32
    %c0_i32_1 = arith.constant 0 : i32
    return %c0_i32, %c0_i32_0 : i32, i32
  }
  func.func @transform_15(%arg0: i32) -> (i32, i32) {
    %c0_i32 = arith.constant 0 : i32
    %c0_i32_0 = arith.constant 0 : i32
    %c0_i32_1 = arith.constant 0 : i32
    return %c0_i32, %c0_i32_0 : i32, i32
  }
  func.func @transform_16(%arg0: i32) -> (i32, i32) {
    %c0_i32 = arith.constant 0 : i32
    %c0_i32_0 = arith.constant 0 : i32
    %c0_i32_1 = arith.constant 0 : i32
    return %c0_i32, %c0_i32_0 : i32, i32
  }
  func.func @transform_17(%arg0: i32) -> (i32, i32) {
    %c0_i32 = arith.constant 0 : i32
    %c0_i32_0 = arith.constant 0 : i32
    %c0_i32_1 = arith.constant 0 : i32
    return %c0_i32, %c0_i32_0 : i32, i32
  }
  func.func @transform_18(%arg0: i32) -> (i32, i32) {
    %c0_i32 = arith.constant 0 : i32
    %c0_i32_0 = arith.constant 0 : i32
    %c0_i32_1 = arith.constant 0 : i32
    return %c0_i32, %c0_i32_0 : i32, i32
  }
  func.func @transform_19(%arg0: i32) -> (i32, i32) {
    %c0_i32 = arith.constant 0 : i32
    %c0_i32_0 = arith.constant 0 : i32
    %c0_i32_1 = arith.constant 0 : i32
    return %c0_i32, %c0_i32_0 : i32, i32
  }
  func.func @transform_20(%arg0: i32) -> (i32, i32) {
    %c0_i32 = arith.constant 0 : i32
    %c0_i32_0 = arith.constant 0 : i32
    %c0_i32_1 = arith.constant 0 : i32
    return %c0_i32, %c0_i32_0 : i32, i32
  }
  func.func @transform_21(%arg0: i32) -> (i32, i32) {
    %c0_i32 = arith.constant 0 : i32
    %c0_i32_0 = arith.constant 0 : i32
    %c0_i32_1 = arith.constant 0 : i32
    return %c0_i32, %c0_i32_0 : i32, i32
  }
  func.func @transform_22(%arg0: i32) -> (i32, i32) {
    %c0_i32 = arith.constant 0 : i32
    %c0_i32_0 = arith.constant 0 : i32
    %c0_i32_1 = arith.constant 0 : i32
    return %c0_i32, %c0_i32_0 : i32, i32
  }
  func.func @transform_23(%arg0: i32) -> (i32, i32) {
    %c0_i32 = arith.constant 0 : i32
    %c0_i32_0 = arith.constant 0 : i32
    %c0_i32_1 = arith.constant 0 : i32
    return %c0_i32, %c0_i32_0 : i32, i32
  }
  func.func @transform_24(%arg0: i32) -> (i32, i32) {
    %c0_i32 = arith.constant 0 : i32
    %c0_i32_0 = arith.constant 0 : i32
    %c0_i32_1 = arith.constant 0 : i32
    return %c0_i32, %c0_i32_0 : i32, i32
  }
  func.func @transform_25(%arg0: i32) -> (i32, i32) {
    %c0_i32 = arith.constant 0 : i32
    %c0_i32_0 = arith.constant 0 : i32
    %c0_i32_1 = arith.constant 0 : i32
    return %c0_i32, %c0_i32_0 : i32, i32
  }
  func.func @transform_26(%arg0: i32) -> (i32, i32) {
    %c0_i32 = arith.constant 0 : i32
    %c0_i32_0 = arith.constant 0 : i32
    %c0_i32_1 = arith.constant 0 : i32
    return %c0_i32, %c0_i32_0 : i32, i32
  }
  func.func @transform_27(%arg0: i32) -> (i32, i32) {
    %c0_i32 = arith.constant 0 : i32
    %c0_i32_0 = arith.constant 0 : i32
    %c0_i32_1 = arith.constant 0 : i32
    return %c0_i32, %c0_i32_0 : i32, i32
  }
  func.func @transform_28(%arg0: i32) -> (i32, i32) {
    %c0_i32 = arith.constant 0 : i32
    %c0_i32_0 = arith.constant 0 : i32
    %c0_i32_1 = arith.constant 0 : i32
    return %c0_i32, %c0_i32_0 : i32, i32
  }
  func.func @transform_29(%arg0: i32) -> (i32, i32) {
    %c0_i32 = arith.constant 0 : i32
    %c0_i32_0 = arith.constant 0 : i32
    %c0_i32_1 = arith.constant 0 : i32
    return %c0_i32, %c0_i32_0 : i32, i32
  }
  func.func @transform_30(%arg0: i32) -> (i32, i32, i32) {
    %c0_i32 = arith.constant 0 : i32
    %c0_i32_0 = arith.constant 0 : i32
    %c0_i32_1 = arith.constant 0 : i32
    return %arg0, %c0_i32, %c0_i32_0 : i32, i32, i32
  }
}

</mosaic_0001>

<bundles_post_ra>
// kernel: tpu_custom_call.1
= control target key start
LH: loop header
LB: loop body
LE: loop exit
PB: predicated region body
PF: predicated region fallthrough
CT: control target
= control target key end

     0   :  { %s6281_s6 = smov 1   ;;  %s6282_s10 = smov 2   ;;  %s6972_s0 = inlined_call_operand.smem [shape: u32[31], index: -1, kind: input, shape index: {}] }
   0x1   :  { %s6352_s5 = sld [smem:[%s6972_s0]]   ;;  %s6283_s14 = smov 3  }
   0x2   :  { %s6357_s9 = sld [smem:[%s6972_s0 + %s6281_s6]]   ;;  %s6284_s18 = smov 4  }
   0x3   :  { %s6362_s13 = sld [smem:[%s6972_s0 + %s6282_s10]]   ;;  %s6285_s22 = smov 5  }
   0x4   :  { %s6367_s17 = sld [smem:[%s6972_s0 + %s6283_s14]]   ;;  %s6286_s26 = smov 6  }
   0x5   :  { %s6372_s21 = sld [smem:[%s6972_s0 + %s6284_s18]]   ;;  %s6287_s30 = smov 7  }
   0x6   :  { %s6377_s25 = sld [smem:[%s6972_s0 + %s6285_s22]]   ;;  %s6288_s4 = smov 8  }
   0x7   :  { %s6382_s29 = sld [smem:[%s6972_s0 + %s6286_s26]]   ;;  %s6289_s10 = smov 9  }
   0x8   :  { %s6387_s3 = sld [smem:[%s6972_s0 + %s6287_s30]]   ;;  %s6290_s15 = smov 10  }
   0x9   :  { %s6392_s8 = sld [smem:[%s6972_s0 + %s6288_s4]]   ;;  %s6291_s20 = smov 11  }
   0xa   :  { %s6397_s14 = sld [smem:[%s6972_s0 + %s6289_s10]]   ;;  %s6292_s26 = smov 12  }
   0xb   :  { %s6402_s19 = sld [smem:[%s6972_s0 + %s6290_s15]]   ;;  %s6293_s1 = smov 13  }
   0xc   :  { %s6407_s24 = sld [smem:[%s6972_s0 + %s6291_s20]]   ;;  %s6294_s7 = smov 14  }
   0xd   :  { %6973 = sst [smem:[#allocation52_spill]] %s6382_s29  ;;  %s6295_s15 = smov 15  }
   0xe   :  { %s6412_s30 = sld [smem:[%s6972_s0 + %s6292_s26]]   ;;  %s6296_s22 = smov 16  }
   0xf   :  { %6974 = sst [smem:[#allocation53_spill]] %s6392_s8  ;;  %s6297_s28 = smov 17  }
  0x10   :  { %s6417_s6 = sld [smem:[%s6972_s0 + %s6293_s1]]  }
  0x11   :  { %6975 = sst [smem:[#allocation54_spill]] %s6402_s19 }
  0x12   :  { %s6422_s12 = sld [smem:[%s6972_s0 + %s6294_s7]]   ;;  %s6298_s7 = smov 18  }
  0x13   :  { %s6427_s20 = sld [smem:[%s6972_s0 + %s6295_s15]]   ;;  %s6299_s15 = smov 19  }
  0x14   :  { %6976 = sst [smem:[#allocation55_spill]] %s6412_s30 }
  0x15   :  { %s6432_s27 = sld [smem:[%s6972_s0 + %s6296_s22]]   ;;  %s6300_s22 = smov 20  }
  0x16   :  { %s6437_s4 = sld [smem:[%s6972_s0 + %s6297_s28]]   ;;  %s6301_s28 = smov 21  }
  0x17   :  { %s6447_s30 = sld [smem:[%s6972_s0 + %s6299_s15]]   ;;  %s6303_s15 = smov 23  }
  0x18   :  { %6977 = sst [smem:[#allocation56_spill]] %s6422_s12 }
  0x19   :  { %s6442_s12 = sld [smem:[%s6972_s0 + %s6298_s7]]   ;;  %s6302_s7 = smov 22  }
  0x1a   :  { %s6457_s19 = sld [smem:[%s6972_s0 + %s6301_s28]]   ;;  %s6305_s28 = smov 25  }
  0x1b   :  { %6978 = sst [smem:[#allocation57_spill]] %s6432_s27 }
  0x1c   :  { %s6452_s27 = sld [smem:[%s6972_s0 + %s6300_s22]]   ;;  %s6304_s22 = smov 24  }
  0x1d   :  { %s6467_s8 = sld [smem:[%s6972_s0 + %s6303_s15]]   ;;  %s6307_s15 = smov 27  }
  0x1f   :  { %6979 = sst [smem:[#allocation58_spill]] %s6442_s12 }
  0x20   :  { %6981 = sst [smem:[#allocation60_spill]] %s6457_s19 }
  0x21   :  { %s6462_s12 = sld [smem:[%s6972_s0 + %s6302_s7]]   ;;  %s6306_s7 = smov 26  }
  0x22   :  { %6980 = sst [smem:[#allocation59_spill]] %s6452_s27 }
  0x23   :  { %6983 = sst [smem:[#allocation62_spill]] %s6467_s8 }
  0x24   :  { %s6472_s27 = sld [smem:[%s6972_s0 + %s6304_s22]]   ;;  %s6308_s22 = smov 28  }
  0x25   :  { %s6477_s19 = sld [smem:[%s6972_s0 + %s6305_s28]]   ;;  %s6309_s28 = smov 29  }
  0x26   :  { %s6487_s8 = sld [smem:[%s6972_s0 + %s6307_s15]]  }
  0x27   :  { %6982 = sst [smem:[#allocation61_spill]] %s6462_s12 }
  0x28   :  { %s6482_s12 = sld [smem:[%s6972_s0 + %s6306_s7]]   ;;  %s6310_s7 = smov 30  }
  0x29   :  { %s6502_s29 = sld [smem:[%s6972_s0 + %s6310_s7]]  }
  0x2a   :  { %6984 = sst [smem:[#allocation63_spill]] %s6472_s27 }
  0x2b   :  { %6985 = sst [smem:[#allocation64_spill]] %s6477_s19 }
  0x2c   :  { %s6492_s27 = sld [smem:[%s6972_s0 + %s6308_s22]]  }
  0x2d   :  { %s6497_s19 = sld [smem:[%s6972_s0 + %s6309_s28]]  }
  0x2e   :  { %66 = vsyncpa [#allocation3], 0 }
  0x2f   :  { %67 = vsyncpa [#allocation6], 0 }
  0x30   :  { %68 = vsyncpa [#allocation9], 0 }
  0x31   :  { %69 = vsyncpa [#allocation12], 0 }
  0x32   :  { %70 = vsyncpa [#allocation15], 0 }
  0x33   :  { %71 = vsyncpa [#allocation18], 0 }
  0x34   :  { %72 = vsyncpa [#allocation21], 0 }
  0x35   :  { %73 = vsyncpa [#allocation24], 0 }
  0x36   :  { %74 = vsyncpa [#allocation27], 0 }
  0x37   :  { %75 = vsyncpa [#allocation30], 0 }
  0x38   :  { %76 = vsyncpa [#allocation33], 0 }
  0x39   :  { %77 = vsyncpa [#allocation36], 0 }
  0x3a   :  { %78 = vsyncpa [#allocation4], 0  ;;  %s6311_s15 = smov [#allocation5]   ;;  %s6312_s18 = smov [#allocation8]  }
  0x3b   :  { %s96_s16 = sshll.u32 %s6311_s15, 4  ;;  %s119_s22 = sshll.u32 %s6312_s18, 4  ;;  %s97_s16 = int_to_ptr.vmem [resolvable:$true] %s96_s16  ;;  %s120_s22 = int_to_ptr.vmem [resolvable:$true] %s119_s22 }
  0x3c   :  { %s5783_s0 = scalar_lea.vmem %s97_s16, 256  ;;  %p5788_p1 = scmp.lt.s32.totalorder %s97_s16, %s97_s16 }
  0x3d   :  { %p5784_p0 = scmp.ne.s32.totalorder %s97_s16, %s5783_s0  ;;  %p5789_p2 = scmp.lt.s32.totalorder %s5783_s0, %s5783_s0 }
  0x3f   :  { %p5790_p3 = por %p5789_p2, %p5788_p1 }
  0x41   :  { %p5791_p4 = pnand %p5790_p3, %p5784_p0 }
  0x43   :  { %5794 = shalt.err (!%p5791_p4)
}
  0x44   :  { %s6313_s23 = smov 128   ;;  %s6314_s26 = smov 8  }
  0x45   :  { %102 = dma.hbm_to_vmem [thread:$0]  %s6357_s9, 256, %s97_s16, [#allocation6], %s6313_s23, %s6313_s23, %s6314_s26  }
  0x46   :  { %s5803_s28 = scalar_lea.vmem %s120_s22, 128  ;;  %p5808_p6 = scmp.lt.s32.totalorder %s120_s22, %s120_s22 }
  0x47   :  { %p5804_p5 = scmp.ne.s32.totalorder %s120_s22, %s5803_s28  ;;  %p5809_p7 = scmp.lt.s32.totalorder %s5803_s28, %s5803_s28 }
  0x49   :  { %p5810_p8 = por %p5809_p7, %p5808_p6 }
  0x4b   :  { %p5811_p9 = pnand %p5810_p8, %p5804_p5 }
  0x4d   :  { %5814 = shalt.err (!%p5811_p9)
}
  0x4e   :  { %122 = dma.hbm_to_vmem [thread:$0]  %s6367_s17, 128, %s120_s22, [#allocation9]  }
  0x4f   :  { %s6315_s1 = smov [#allocation11]   ;;  %s6316_s7 = smov [#allocation14]  }
  0x50   :  { %s141_s2 = sshll.u32 %s6315_s1, 4  ;;  %s163_s10 = sshll.u32 %s6316_s7, 4  ;;  %s142_s2 = int_to_ptr.vmem [resolvable:$true] %s141_s2  ;;  %s164_s10 = int_to_ptr.vmem [resolvable:$true] %s163_s10 }
  0x51   :  { %s5823_s11 = scalar_lea.vmem %s142_s2, 16  ;;  %s5827_s15 = scalar_lea.vmem %s142_s2, 32 }
  0x52   :  { %p5824_p10 = scmp.ne.s32.totalorder %s142_s2, %s5823_s11  ;;  %p5828_p11 = scmp.lt.s32.totalorder %s142_s2, %s142_s2 }
  0x53   :  { %p5829_p12 = scmp.lt.s32.totalorder %s5827_s15, %s5823_s11 }
  0x55   :  { %p5830_p13 = por %p5829_p12, %p5828_p11 }
  0x57   :  { %p5831_p0 = pnand %p5830_p13, %p5824_p10 }
  0x59   :  { %5834 = shalt.err (!%p5831_p0)
}
  0x5a   :  { %144 = dma.hbm_to_vmem [thread:$0]  %s6377_s25, 16, %s142_s2, [#allocation12]  }
  0x5b   :  { %s5843_s9 = scalar_lea.vmem %s164_s10, 16  ;;  %s5847_s16 = scalar_lea.vmem %s164_s10, 32 }
  0x5c   :  { %p5844_p1 = scmp.ne.s32.totalorder %s164_s10, %s5843_s9  ;;  %p5848_p2 = scmp.lt.s32.totalorder %s164_s10, %s164_s10 }
  0x5d   :  { %p5849_p3 = scmp.lt.s32.totalorder %s5847_s16, %s5843_s9 }
  0x5f   :  { %p5850_p4 = por %p5849_p3, %p5848_p2 }
  0x61   :  { %p5851_p5 = pnand %p5850_p4, %p5844_p1 }
  0x63   :  { %5854 = shalt.err (!%p5851_p5)
}
  0x64   :  { %166 = dma.hbm_to_vmem [thread:$0]  %s6387_s3, 16, %s164_s10, [#allocation15]  }
  0x65   :  { %s6317_s17 = smov [#allocation17]   ;;  %s6318_s22 = smov [#allocation20]  }
  0x66   :  { %s185_s18 = sshll.u32 %s6317_s17, 4  ;;  %s207_s0 = sshll.u32 %s6318_s22, 4  ;;  %s186_s18 = int_to_ptr.vmem [resolvable:$true] %s185_s18  ;;  %s208_s0 = int_to_ptr.vmem [resolvable:$true] %s207_s0 }
  0x67   :  { %s5863_s28 = scalar_lea.vmem %s186_s18, 16  ;;  %s5867_s1 = scalar_lea.vmem %s186_s18, 32 }
  0x68   :  { %p5864_p6 = scmp.ne.s32.totalorder %s186_s18, %s5863_s28  ;;  %p5868_p7 = scmp.lt.s32.totalorder %s186_s18, %s186_s18 }
  0x69   :  { %p5869_p8 = scmp.lt.s32.totalorder %s5867_s1, %s5863_s28 }
  0x6b   :  { %p5870_p9 = por %p5869_p8, %p5868_p7 }
  0x6d   :  { %p5871_p10 = pnand %p5870_p9, %p5864_p6 }
  0x6f   :  { %5874 = shalt.err (!%p5871_p10)
}
  0x70   :  { %188 = dma.hbm_to_vmem [thread:$0]  %s6397_s14, 16, %s186_s18, [#allocation18]  }
  0x71   :  { %s5883_s25 = scalar_lea.vmem %s208_s0, 16  ;;  %s5887_s2 = scalar_lea.vmem %s208_s0, 32 }
  0x72   :  { %p5884_p11 = scmp.ne.s32.totalorder %s208_s0, %s5883_s25  ;;  %p5888_p12 = scmp.lt.s32.totalorder %s208_s0, %s208_s0 }
  0x73   :  { %p5889_p13 = scmp.lt.s32.totalorder %s5887_s2, %s5883_s25 }
  0x75   :  { %p5890_p0 = por %p5889_p13, %p5888_p12 }
  0x77   :  { %p5891_p1 = pnand %p5890_p0, %p5884_p11 }
  0x79   :  { %5894 = shalt.err (!%p5891_p1)
}
  0x7a   :  { %210 = dma.hbm_to_vmem [thread:$0]  %s6407_s24, 16, %s208_s0, [#allocation21]  }
  0x7b   :  { %s6319_s3 = smov [#allocation23]   ;;  %s6320_s10 = smov [#allocation26]  }
  0x7c   :  { %s229_s7 = sshll.u32 %s6319_s3, 4  ;;  %s251_s11 = sshll.u32 %s6320_s10, 4  ;;  %s230_s7 = int_to_ptr.vmem [resolvable:$true] %s229_s7  ;;  %s252_s11 = int_to_ptr.vmem [resolvable:$true] %s251_s11 }
  0x7d   :  { %s5903_s15 = scalar_lea.vmem %s230_s7, 16  ;;  %s5907_s9 = scalar_lea.vmem %s230_s7, 32 }
  0x7e   :  { %p5904_p2 = scmp.ne.s32.totalorder %s230_s7, %s5903_s15  ;;  %p5908_p3 = scmp.lt.s32.totalorder %s230_s7, %s230_s7 }
  0x7f   :  { %p5909_p4 = scmp.lt.s32.totalorder %s5907_s9, %s5903_s15 }
  0x81   :  { %p5910_p5 = por %p5909_p4, %p5908_p3 }
  0x83   :  { %p5911_p6 = pnand %p5910_p5, %p5904_p2 }
  0x85   :  { %5914 = shalt.err (!%p5911_p6)
}
  0x86   :  { %232 = dma.hbm_to_vmem [thread:$0]  %s6417_s6, 16, %s230_s7, [#allocation24]  }
  0x87   :  { %s5923_s14 = scalar_lea.vmem %s252_s11, 16  ;;  %s5927_s16 = scalar_lea.vmem %s252_s11, 32 }
  0x88   :  { %p5924_p7 = scmp.ne.s32.totalorder %s252_s11, %s5923_s14  ;;  %p5928_p8 = scmp.lt.s32.totalorder %s252_s11, %s252_s11 }
  0x89   :  { %p5929_p9 = scmp.lt.s32.totalorder %s5927_s16, %s5923_s14 }
  0x8b   :  { %p5930_p10 = por %p5929_p9, %p5928_p8 }
  0x8d   :  { %p5931_p11 = pnand %p5930_p10, %p5924_p7 }
  0x8f   :  { %5934 = shalt.err (!%p5931_p11)
}
  0x90   :  { %254 = dma.hbm_to_vmem [thread:$0]  %s6427_s20, 16, %s252_s11, [#allocation27]  }
  0x91   :  { %s6321_s24 = smov [#allocation29]   ;;  %s6322_s18 = smov [#allocation32]  }
  0x92   :  { %s273_s17 = sshll.u32 %s6321_s24, 4  ;;  %s295_s22 = sshll.u32 %s6322_s18, 4  ;;  %s274_s17 = int_to_ptr.vmem [resolvable:$true] %s273_s17  ;;  %s296_s22 = int_to_ptr.vmem [resolvable:$true] %s295_s22 }
  0x93   :  { %s5943_s0 = scalar_lea.vmem %s274_s17, 16  ;;  %s5947_s28 = scalar_lea.vmem %s274_s17, 32 }
  0x94   :  { %p5944_p12 = scmp.ne.s32.totalorder %s274_s17, %s5943_s0  ;;  %p5948_p13 = scmp.lt.s32.totalorder %s274_s17, %s274_s17 }
  0x95   :  { %p5949_p0 = scmp.lt.s32.totalorder %s5947_s28, %s5943_s0 }
  0x97   :  { %p5950_p1 = por %p5949_p0, %p5948_p13 }
  0x99   :  { %p5951_p2 = pnand %p5950_p1, %p5944_p12 }
  0x9b   :  { %5954 = shalt.err (!%p5951_p2)
}
  0x9c   :  { %276 = dma.hbm_to_vmem [thread:$0]  %s6437_s4, 16, %s274_s17, [#allocation30]  }
  0x9d   :  { %s5963_s6 = scalar_lea.vmem %s296_s22, 16  ;;  %s5967_s1 = scalar_lea.vmem %s296_s22, 32 }
  0x9e   :  { %p5964_p3 = scmp.ne.s32.totalorder %s296_s22, %s5963_s6  ;;  %p5968_p4 = scmp.lt.s32.totalorder %s296_s22, %s296_s22 }
  0x9f   :  { %p5969_p5 = scmp.lt.s32.totalorder %s5967_s1, %s5963_s6 }
  0xa1   :  { %p5970_p6 = por %p5969_p5, %p5968_p4 }
  0xa3   :  { %p5971_p7 = pnand %p5970_p6, %p5964_p3 }
  0xa5   :  { %5974 = shalt.err (!%p5971_p7)
}
  0xa6   :  { %298 = dma.hbm_to_vmem [thread:$0]  %s6447_s30, 16, %s296_s22, [#allocation33]  }
  0xa7   :  { %s6323_s20 = smov [#allocation35]  }
  0xa8   :  { %s324_s25 = sshll.u32 %s6323_s20, 4  ;;  %s325_s25 = int_to_ptr.vmem [resolvable:$true] %s324_s25 }
  0xa9   :  { %s5983_s2 = scalar_lea.vmem %s325_s25, 4096  ;;  %p5988_p9 = scmp.lt.s32.totalorder %s325_s25, %s325_s25 }
  0xaa   :  { %p5984_p8 = scmp.ne.s32.totalorder %s325_s25, %s5983_s2  ;;  %p5989_p10 = scmp.lt.s32.totalorder %s5983_s2, %s5983_s2 }
  0xac   :  { %p5990_p11 = por %p5989_p10, %p5988_p9 }
  0xae   :  { %p5991_p12 = pnand %p5990_p11, %p5984_p8 }
  0xb0   :  { %5994 = shalt.err (!%p5991_p12)
}
  0xb1   :  { %s6324_s4 = smov 256   ;;  %s6325_s3 = smov 16  }
  0xb2   :  { %330 = dma.hbm_to_vmem [thread:$0]  %s6482_s12, 4096, %s325_s25, [#allocation36], %s6324_s4, %s6324_s4, %s6325_s3  }
  0xb3   :  { %s6326_s7 = smov [#allocation2]   ;;  %s6327_s11 = smov [#allocation7]  }
  0xb4   :  { %s84_s10 = sshll.u32 %s6326_s7, 4  ;;  %s109_s15 = sshll.u32 %s6327_s11, 4  ;;  %s85_s10 = int_to_ptr.vmem [resolvable:$true] %s84_s10  ;;  %s110_s15 = int_to_ptr.vmem [resolvable:$true] %s109_s15 }
  0xb5   :  { %s6003_s30 = scalar_lea.vmem %s85_s10, 256  ;;  %p6008_p0 = scmp.lt.s32.totalorder %s85_s10, %s85_s10 }
  0xb6   :  { %p6004_p13 = scmp.ne.s32.totalorder %s85_s10, %s6003_s30  ;;  %p6009_p1 = scmp.lt.s32.totalorder %s6003_s30, %s6003_s30 }
  0xb8   :  { %p6010_p2 = por %p6009_p1, %p6008_p0 }
  0xba   :  { %p6011_p3 = pnand %p6010_p2, %p6004_p13 }
  0xbc   :  { %6014 = shalt.err (!%p6011_p3)
}
  0xbd   :  { %90 = dma.hbm_to_vmem [thread:$0]  %s6352_s5, 256, %s85_s10, [#allocation3], %s6313_s23, %s6313_s23, %s6314_s26  }
  0xbe   :  { %s6023_s9 = scalar_lea.vmem %s110_s15, 128  ;;  %p6028_p5 = scmp.lt.s32.totalorder %s110_s15, %s110_s15 }
  0xbf   :  { %p6024_p4 = scmp.ne.s32.totalorder %s110_s15, %s6023_s9  ;;  %p6029_p6 = scmp.lt.s32.totalorder %s6023_s9, %s6023_s9 }
  0xc1   :  { %p6030_p7 = por %p6029_p6, %p6028_p5 }
  0xc3   :  { %p6031_p8 = pnand %p6030_p7, %p6024_p4 }
  0xc5   :  { %6034 = shalt.err (!%p6031_p8)
}
  0xc6   :  { %112 = dma.hbm_to_vmem [thread:$0]  %s6362_s13, 128, %s110_s15, [#allocation6]  }
  0xc7   :  { %s6328_s12 = smov [#allocation10]   ;;  %s6329_s16 = smov [#allocation13]  }
  0xc8   :  { %s128_s14 = sshll.u32 %s6328_s12, 4  ;;  %s150_s24 = sshll.u32 %s6329_s16, 4  ;;  %s129_s14 = int_to_ptr.vmem [resolvable:$true] %s128_s14  ;;  %s151_s24 = int_to_ptr.vmem [resolvable:$true] %s150_s24 }
  0xc9   :  { %s6043_s17 = scalar_lea.vmem %s129_s14, 2048  ;;  %p6048_p10 = scmp.lt.s32.totalorder %s129_s14, %s129_s14 }
  0xca   :  { %p6044_p9 = scmp.ne.s32.totalorder %s129_s14, %s6043_s17  ;;  %p6049_p11 = scmp.lt.s32.totalorder %s6043_s17, %s6043_s17 }
  0xcc   :  { %p6050_p12 = por %p6049_p11, %p6048_p10 }
  0xce   :  { %p6051_p13 = pnand %p6050_p12, %p6044_p9 }
  0xd0   :  { %6054 = shalt.err (!%p6051_p13)
}
  0xd1   :  { %134 = dma.hbm_to_vmem [thread:$0]  %s6372_s21, 2048, %s129_s14, [#allocation9], %s6313_s23, %s6313_s23, %s6314_s26  }
  0xd2   :  { %s6063_s5 = scalar_lea.vmem %s151_s24, 2048  ;;  %p6068_p1 = scmp.lt.s32.totalorder %s151_s24, %s151_s24 }
  0xd3   :  { %p6064_p0 = scmp.ne.s32.totalorder %s151_s24, %s6063_s5  ;;  %p6069_p2 = scmp.lt.s32.totalorder %s6063_s5, %s6063_s5 }
  0xd5   :  { %p6070_p3 = por %p6069_p2, %p6068_p1 }
  0xd7   :  { %p6071_p4 = pnand %p6070_p3, %p6064_p0 }
  0xd9   :  { %6074 = shalt.err (!%p6071_p4)
}
  0xda   :  { %s6986_s13 = sld [smem:[#allocation52_spill]]  ;;  %s6330_s18 = smov [#allocation16]  }
  0xdb   :  { %s172_s22 = sshll.u32 %s6330_s18, 4  ;;  %s6331_s0 = smov [#allocation19]   ;;  %s173_s22 = int_to_ptr.vmem [resolvable:$true] %s172_s22 }
  0xdc   :  { %s194_s28 = sshll.u32 %s6331_s0, 4  ;;  %s6083_s6 = scalar_lea.vmem %s173_s22, 2048  ;;  %s195_s28 = int_to_ptr.vmem [resolvable:$true] %s194_s28 }
  0xdd   :  { %p6084_p5 = scmp.ne.s32.totalorder %s173_s22, %s6083_s6  ;;  %p6088_p6 = scmp.lt.s32.totalorder %s173_s22, %s173_s22 }
  0xde   :  { %p6089_p7 = scmp.lt.s32.totalorder %s6083_s6, %s6083_s6 }
  0xe0   :  { %156 = dma.hbm_to_vmem [thread:$0]  %s6986_s13, 2048, %s151_s24, [#allocation12], %s6313_s23, %s6313_s23, %s6314_s26  }
  0xe1   :  { %p6090_p8 = por %p6089_p7, %p6088_p6 }
  0xe3   :  { %p6091_p9 = pnand %p6090_p8, %p6084_p5 }
  0xe5   :  { %6094 = shalt.err (!%p6091_p9)
}
  0xe6   :  { %s6987_s21 = sld [smem:[#allocation53_spill]]  ;;  %s6103_s1 = scalar_lea.vmem %s195_s28, 2048 }
  0xe7   :  { %p6104_p10 = scmp.ne.s32.totalorder %s195_s28, %s6103_s1  ;;  %p6108_p11 = scmp.lt.s32.totalorder %s195_s28, %s195_s28 }
  0xe8   :  { %p6109_p12 = scmp.lt.s32.totalorder %s6103_s1, %s6103_s1 }
  0xea   :  { %p6110_p13 = por %p6109_p12, %p6108_p11 }
  0xec   :  { %178 = dma.hbm_to_vmem [thread:$0]  %s6987_s21, 2048, %s173_s22, [#allocation15], %s6313_s23, %s6313_s23, %s6314_s26  }
  0xed   :  { %p6111_p0 = pnand %p6110_p13, %p6104_p10 }
  0xef   :  { %6114 = shalt.err (!%p6111_p0)
}
  0xf0   :  { %s6988_s20 = sld [smem:[#allocation54_spill]]  ;;  %s6332_s25 = smov [#allocation22]  }
  0xf1   :  { %s216_s2 = sshll.u32 %s6332_s25, 4  ;;  %s6333_s4 = smov [#allocation25]   ;;  %s217_s2 = int_to_ptr.vmem [resolvable:$true] %s216_s2 }
  0xf2   :  { %s238_s3 = sshll.u32 %s6333_s4, 4  ;;  %s6123_s7 = scalar_lea.vmem %s217_s2, 2048  ;;  %s239_s3 = int_to_ptr.vmem [resolvable:$true] %s238_s3 }
  0xf3   :  { %p6124_p1 = scmp.ne.s32.totalorder %s217_s2, %s6123_s7  ;;  %p6128_p2 = scmp.lt.s32.totalorder %s217_s2, %s217_s2 }
  0xf4   :  { %p6129_p3 = scmp.lt.s32.totalorder %s6123_s7, %s6123_s7 }
  0xf6   :  { %200 = dma.hbm_to_vmem [thread:$0]  %s6988_s20, 2048, %s195_s28, [#allocation18], %s6313_s23, %s6313_s23, %s6314_s26  }
  0xf7   :  { %p6130_p4 = por %p6129_p3, %p6128_p2 }
  0xf9   :  { %p6131_p5 = pnand %p6130_p4, %p6124_p1 }
  0xfb   :  { %6134 = shalt.err (!%p6131_p5)
}
  0xfc   :  { %s6989_s10 = sld [smem:[#allocation55_spill]]  ;;  %s6143_s11 = scalar_lea.vmem %s239_s3, 2048 }
  0xfd   :  { %p6144_p6 = scmp.ne.s32.totalorder %s239_s3, %s6143_s11  ;;  %p6148_p7 = scmp.lt.s32.totalorder %s239_s3, %s239_s3 }
  0xfe   :  { %p6149_p8 = scmp.lt.s32.totalorder %s6143_s11, %s6143_s11 }
 0x100   :  { %p6150_p9 = por %p6149_p8, %p6148_p7 }
 0x102   :  { %222 = dma.hbm_to_vmem [thread:$0]  %s6989_s10, 2048, %s217_s2, [#allocation21], %s6313_s23, %s6313_s23, %s6314_s26  }
 0x103   :  { %p6151_p10 = pnand %p6150_p9, %p6144_p6 }
 0x105   :  { %6154 = shalt.err (!%p6151_p10)
}
 0x106   :  { %s6990_s15 = sld [smem:[#allocation56_spill]]  ;;  %s6334_s30 = smov [#allocation28]  }
 0x107   :  { %s260_s9 = sshll.u32 %s6334_s30, 4  ;;  %s6335_s12 = smov [#allocation31]   ;;  %s261_s9 = int_to_ptr.vmem [resolvable:$true] %s260_s9 }
 0x108   :  { %s282_s14 = sshll.u32 %s6335_s12, 4  ;;  %s6163_s16 = scalar_lea.vmem %s261_s9, 2048  ;;  %s283_s14 = int_to_ptr.vmem [resolvable:$true] %s282_s14 }
 0x109   :  { %p6164_p11 = scmp.ne.s32.totalorder %s261_s9, %s6163_s16  ;;  %p6168_p12 = scmp.lt.s32.totalorder %s261_s9, %s261_s9 }
 0x10a   :  { %p6169_p13 = scmp.lt.s32.totalorder %s6163_s16, %s6163_s16 }
 0x10c   :  { %244 = dma.hbm_to_vmem [thread:$0]  %s6990_s15, 2048, %s239_s3, [#allocation24], %s6313_s23, %s6313_s23, %s6314_s26  }
 0x10d   :  { %p6170_p0 = por %p6169_p13, %p6168_p12 }
 0x10f   :  { %p6171_p1 = pnand %p6170_p0, %p6164_p11 }
 0x111   :  { %6174 = shalt.err (!%p6171_p1)
}
 0x112   :  { %s6991_s24 = sld [smem:[#allocation57_spill]]  ;;  %s6183_s17 = scalar_lea.vmem %s283_s14, 2048 }
 0x113   :  { %p6184_p2 = scmp.ne.s32.totalorder %s283_s14, %s6183_s17  ;;  %p6188_p3 = scmp.lt.s32.totalorder %s283_s14, %s283_s14 }
 0x114   :  { %p6189_p4 = scmp.lt.s32.totalorder %s6183_s17, %s6183_s17 }
 0x116   :  { %p6190_p5 = por %p6189_p4, %p6188_p3 }
 0x118   :  { %266 = dma.hbm_to_vmem [thread:$0]  %s6991_s24, 2048, %s261_s9, [#allocation27], %s6313_s23, %s6313_s23, %s6314_s26  }
 0x119   :  { %p6191_p6 = pnand %p6190_p5, %p6184_p2 }
 0x11b   :  { %6194 = shalt.err (!%p6191_p6)
}
 0x11c   :  { %s6992_s5 = sld [smem:[#allocation58_spill]]  ;;  %s6336_s13 = smov [#allocation34]  }
 0x11d   :  { %s315_s18 = sshll.u32 %s6336_s13, 4  ;;  %s6337_s22 = smov [#allocation37]   ;;  %s316_s18 = int_to_ptr.vmem [resolvable:$true] %s315_s18 }
 0x11e   :  { %s338_s0 = sshll.u32 %s6337_s22, 4  ;;  %s6203_s28 = scalar_lea.vmem %s316_s18, 128  ;;  %s339_s0 = int_to_ptr.vmem [resolvable:$true] %s338_s0 }
 0x11f   :  { %p6204_p7 = scmp.ne.s32.totalorder %s316_s18, %s6203_s28  ;;  %p6208_p8 = scmp.lt.s32.totalorder %s316_s18, %s316_s18 }
 0x120   :  { %p6209_p9 = scmp.lt.s32.totalorder %s6203_s28, %s6203_s28 }
 0x122   :  { %288 = dma.hbm_to_vmem [thread:$0]  %s6992_s5, 2048, %s283_s14, [#allocation30], %s6313_s23, %s6313_s23, %s6314_s26  }
 0x123   :  { %p6210_p10 = por %p6209_p9, %p6208_p8 }
 0x125   :  { %p6211_p11 = pnand %p6210_p10, %p6204_p7 }
 0x127   :  { %6214 = shalt.err (!%p6211_p11)
}
 0x128   :  { %s6993_s6 = sld [smem:[#allocation64_spill]]  ;;  %s6223_s21 = scalar_lea.vmem %s339_s0, 4096 }
 0x129   :  { %p6224_p12 = scmp.ne.s32.totalorder %s339_s0, %s6223_s21  ;;  %p6228_p13 = scmp.lt.s32.totalorder %s339_s0, %s339_s0 }
 0x12a   :  { %p6229_p0 = scmp.lt.s32.totalorder %s6223_s21, %s6223_s21 }
 0x12c   :  { %p6230_p1 = por %p6229_p0, %p6228_p13 }
 0x12e   :  { %318 = dma.hbm_to_vmem [thread:$0]  %s6993_s6, 128, %s316_s18, [#allocation33]  }
 0x12f   :  { %p6231_p2 = pnand %p6230_p1, %p6224_p12 }
 0x131   :  { %6234 = shalt.err (!%p6231_p2)
}
 0x132   :  { %344 = dma.hbm_to_vmem [thread:$0]  %s6492_s27, 4096, %s339_s0, [#allocation36], %s6313_s23, %s6313_s23, %s6314_s26  }
 0x133   :  { %6255 = dma.done.wait [#allocation3], 256  }
 0x134   :  { %6256 = vsyncadd [#allocation3], 4294967040 }
 0x135   :  { %6257 = dma.done.wait [#allocation6], 384  }
 0x136   :  { %6258 = vsyncadd [#allocation6], 4294966912 }
 0x137   :  { %6259 = dma.done.wait [#allocation9], 2176  }
 0x138   :  { %6260 = vsyncadd [#allocation9], 4294965120 }
 0x139   :  { %6261 = dma.done.wait [#allocation12], 2064  }
 0x13a   :  { %6262 = vsyncadd [#allocation12], 4294965232 }
 0x13b   :  { %6263 = dma.done.wait [#allocation15], 2064  }
 0x13c   :  { %6264 = vsyncadd [#allocation15], 4294965232 }
 0x13d   :  { %6265 = dma.done.wait [#allocation18], 2064  }
 0x13e   :  { %6266 = vsyncadd [#allocation18], 4294965232 }
 0x13f   :  { %6267 = dma.done.wait [#allocation21], 2064  }
 0x140   :  { %6268 = vsyncadd [#allocation21], 4294965232 }
 0x141   :  { %6269 = dma.done.wait [#allocation24], 2064  }
 0x142   :  { %6270 = vsyncadd [#allocation24], 4294965232 }
 0x143   :  { %6271 = dma.done.wait [#allocation27], 2064  }
 0x144   :  { %6272 = vsyncadd [#allocation27], 4294965232 }
 0x145   :  { %6273 = dma.done.wait [#allocation30], 2064  }
 0x146   :  { %6274 = vsyncadd [#allocation30], 4294965232 }
 0x147   :  { %6275 = dma.done.wait [#allocation33], 144  }
 0x148   :  { %6276 = vsyncadd [#allocation33], 4294967152 }
 0x149   :  { %6277 = dma.done.wait [#allocation36], 8192  }
 0x14a   :  { %6278 = vsyncadd [#allocation36], 4294959104  ;;  %v437_v0 = vld [vmem:[#allocation10 + $0x78] sm:$0xff]  ;;  %v436_v2 = vld [vmem:[#allocation10 + $0x70] sm:$0xff]  ;;  %v6338_v34 = vmov 0.0   ;;  %vm6339_vm0 = vmmov 0  }
 0x14b   :  { %v454_v1 = vld [vmem:[#allocation13 + $0x78] sm:$0xff]  ;;  %5178 = vmatprep.subr.mxu0 %v437_v0  ;;  %v453_v3 = vld [vmem:[#allocation13 + $0x70] sm:$0xff]  ;;  %v435_v4 = vld [vmem:[#allocation10 + $0x68] sm:$0xff]  ;;  %vm733_vm1 = vcmask 261120   ;;  %s6340_s27 = smov 96   ;;  %vm890_vm2 = vcmask 64512  }
 0x14c   :  { %5213 = vmatprep.subr.mxu1 %v454_v1  ;;  %5179 = vmatpush3.msra.mxu0 %v437_v0  ;;  %v452_v5 = vld [vmem:[#allocation13 + $0x68] sm:$0xff]  ;;  %v434_v6 = vld [vmem:[#allocation10 + $0x60] sm:$0xff]  ;;  %v433_v8 = vld [vmem:[#allocation10 + $0x58] sm:$0xff]  ;;  %s6341_s1 = smov 64   ;;  %s6342_s20 = smov 32  }
 0x14d   :  { %5214 = vmatpush3.msra.mxu1 %v454_v1  ;;  %5180 = vmatprep.subr.mxu0 %v436_v2  ;;  %v451_v7 = vld [vmem:[#allocation13 + $0x60] sm:$0xff]  ;;  %v450_v9 = vld [vmem:[#allocation13 + $0x58] sm:$0xff]  ;;  %v432_v10 = vld [vmem:[#allocation10 + $0x50] sm:$0xff]  ;;  %s6994_s25 = sld [smem:[#allocation59_spill]] }
 0x14e   :  { %5215 = vmatprep.subr.mxu1 %v453_v3  ;;  %5181 = vmatpush3.msra.mxu0 %v436_v2  ;;  %v449_v11 = vld [vmem:[#allocation13 + $0x50] sm:$0xff]  ;;  %v431_v12 = vld [vmem:[#allocation10 + $0x48] sm:$0xff]  ;;  %v430_v14 = vld [vmem:[#allocation10 + $0x40] sm:$0xff]  ;;  %s6995_s2 = sld [smem:[#allocation60_spill]] }
 0x14f   :  { %5216 = vmatpush3.msra.mxu1 %v453_v3  ;;  %5182 = vmatprep.subr.mxu0 %v435_v4  ;;  %v448_v13 = vld [vmem:[#allocation13 + $0x48] sm:$0xff]  ;;  %v447_v15 = vld [vmem:[#allocation13 + $0x40] sm:$0xff]  ;;  %v429_v16 = vld [vmem:[#allocation10 + $0x38] sm:$0xff]  ;;  %s6996_s4 = sld [smem:[#allocation61_spill]] }
 0x150   :  { %5217 = vmatprep.subr.mxu1 %v452_v5  ;;  %5183 = vmatpush3.msra.mxu0 %v435_v4  ;;  %v446_v17 = vld [vmem:[#allocation13 + $0x38] sm:$0xff]  ;;  %v428_v18 = vld [vmem:[#allocation10 + $0x30] sm:$0xff]  ;;  %v427_v20 = vld [vmem:[#allocation10 + $0x28] sm:$0xff]  ;;  %s6997_s3 = sld [smem:[#allocation62_spill]] }
 0x151   :  { %5218 = vmatpush3.msra.mxu1 %v452_v5  ;;  %5184 = vmatprep.subr.mxu0 %v434_v6  ;;  %v445_v19 = vld [vmem:[#allocation13 + $0x30] sm:$0xff]  ;;  %v444_v21 = vld [vmem:[#allocation13 + $0x28] sm:$0xff]  ;;  %v426_v22 = vld [vmem:[#allocation10 + $0x20] sm:$0xff] }
 0x152   :  { %5219 = vmatprep.subr.mxu1 %v451_v7  ;;  %5185 = vmatpush3.msra.mxu0 %v434_v6  ;;  %v443_v23 = vld [vmem:[#allocation13 + $0x20] sm:$0xff]  ;;  %v425_v24 = vld [vmem:[#allocation10 + $0x18] sm:$0xff]  ;;  %v424_v26 = vld [vmem:[#allocation10 + $0x10] sm:$0xff] }
 0x153   :  { %5220 = vmatpush3.msra.mxu1 %v451_v7  ;;  %5186 = vmatprep.subr.mxu0 %v433_v8  ;;  %v442_v25 = vld [vmem:[#allocation13 + $0x18] sm:$0xff]  ;;  %v441_v27 = vld [vmem:[#allocation13 + $0x10] sm:$0xff]  ;;  %v423_v28 = vld [vmem:[#allocation10 + $0x8] sm:$0xff] }
 0x154   :  { %5221 = vmatprep.subr.mxu1 %v450_v9  ;;  %5187 = vmatpush3.msra.mxu0 %v433_v8  ;;  %v440_v29 = vld [vmem:[#allocation13 + $0x8] sm:$0xff]  ;;  %v422_v30 = vld [vmem:[#allocation10] sm:$0xff]  ;;  %v6562_v33 = vld [vmem:[#allocation2 + $0x8] sm:$0xff] }
 0x155   :  { %5222 = vmatpush3.msra.mxu1 %v450_v9  ;;  %5188 = vmatprep.subr.mxu0 %v432_v10  ;;  %v439_v31 = vld [vmem:[#allocation13] sm:$0xff]  ;;  %v6560_v32 = vld [vmem:[#allocation2] sm:$0xff]  ;;  %v4847_v36 = vld [vmem:[#allocation11] ss:$0 sm:$0xff] }
 0x156   :  { %5223 = vmatprep.subr.mxu1 %v449_v11  ;;  %5189 = vmatpush3.msra.mxu0 %v432_v10  ;;  %v4848_v38 = vld [vmem:[#allocation14] ss:$0 sm:$0xff]  ;;  %v470_v46 = vld [vmem:[#allocation16 + $0x70] sm:$0xff]  ;;  %v469_v47 = vld [vmem:[#allocation16 + $0x68] sm:$0xff] }
 0x157   :  { %5224 = vmatpush3.msra.mxu1 %v449_v11  ;;  %5190 = vmatprep.subr.mxu0 %v431_v12  ;;  %v471_v45 = vld [vmem:[#allocation16 + $0x78] sm:$0xff]  ;;  %v468_v48 = vld [vmem:[#allocation16 + $0x60] sm:$0xff]  ;;  %v466_v50 = vld [vmem:[#allocation16 + $0x50] sm:$0xff] }
 0x158   :  { %5225 = vmatprep.subr.mxu1 %v448_v13  ;;  %5191 = vmatpush3.msra.mxu0 %v431_v12  ;;  %v467_v49 = vld [vmem:[#allocation16 + $0x58] sm:$0xff]  ;;  %v465_v51 = vld [vmem:[#allocation16 + $0x48] sm:$0xff]  ;;  %v464_v52 = vld [vmem:[#allocation16 + $0x40] sm:$0xff] }
 0x159   :  { %5226 = vmatpush3.msra.mxu1 %v448_v13  ;;  %5192 = vmatprep.subr.mxu0 %v430_v14  ;;  %v463_v53 = vld [vmem:[#allocation16 + $0x38] sm:$0xff]  ;;  %v462_v54 = vld [vmem:[#allocation16 + $0x30] sm:$0xff]  ;;  %v461_v55 = vld [vmem:[#allocation16 + $0x28] sm:$0xff] }
 0x15a   :  { %5227 = vmatprep.subr.mxu1 %v447_v15  ;;  %5193 = vmatpush3.msra.mxu0 %v430_v14  ;;  %v460_v56 = vld [vmem:[#allocation16 + $0x20] sm:$0xff]  ;;  %v459_v57 = vld [vmem:[#allocation16 + $0x18] sm:$0xff]  ;;  %v458_v58 = vld [vmem:[#allocation16 + $0x10] sm:$0xff] }
 0x15b   :  { %5228 = vmatpush3.msra.mxu1 %v447_v15  ;;  %5194 = vmatprep.subr.mxu0 %v429_v16  ;;  %v457_v59 = vld [vmem:[#allocation16 + $0x8] sm:$0xff]  ;;  %v456_v60 = vld [vmem:[#allocation16] sm:$0xff] }
 0x15c   :  { %5229 = vmatprep.subr.mxu1 %v446_v17  ;;  %5195 = vmatpush3.msra.mxu0 %v429_v16  ;;  %v6599_v62 = vld [vmem:[#allocation7] sm:$0xff] }
 0x15d   :  { %5230 = vmatpush3.msra.mxu1 %v446_v17  ;;  %5196 = vmatprep.subr.mxu0 %v428_v18 }
 0x15e   :  { %5231 = vmatprep.subr.mxu1 %v445_v19  ;;  %5197 = vmatpush3.msra.mxu0 %v428_v18 }
 0x15f   :  { %5232 = vmatpush3.msra.mxu1 %v445_v19  ;;  %5198 = vmatprep.subr.mxu0 %v427_v20  ;;  %v4849_v19 = vld [vmem:[#allocation17] ss:$0 sm:$0xff] }
 0x160   :  { %5233 = vmatprep.subr.mxu1 %v444_v21  ;;  %5199 = vmatpush3.msra.mxu0 %v427_v20 }
 0x161   :  { %5234 = vmatpush3.msra.mxu1 %v444_v21  ;;  %5200 = vmatprep.subr.mxu0 %v426_v22 }
 0x162   :  { %5235 = vmatprep.subr.mxu1 %v443_v23  ;;  %5201 = vmatpush3.msra.mxu0 %v426_v22 }
 0x163   :  { %5236 = vmatpush3.msra.mxu1 %v443_v23  ;;  %5202 = vmatprep.subr.mxu0 %v425_v24 }
 0x164   :  { %5237 = vmatprep.subr.mxu1 %v442_v25  ;;  %5203 = vmatpush3.msra.mxu0 %v425_v24 }
 0x165   :  { %5238 = vmatpush3.msra.mxu1 %v442_v25  ;;  %5204 = vmatprep.subr.mxu0 %v424_v26 }
 0x166   :  { %5239 = vmatprep.subr.mxu1 %v441_v27  ;;  %5205 = vmatpush3.msra.mxu0 %v424_v26 }
 0x167   :  { %5240 = vmatpush3.msra.mxu1 %v441_v27  ;;  %5206 = vmatprep.subr.mxu0 %v423_v28 }
 0x168   :  { %5241 = vmatprep.subr.mxu1 %v440_v29  ;;  %5207 = vmatpush3.msra.mxu0 %v423_v28 }
 0x169   :  { %5242 = vmatpush3.msra.mxu1 %v440_v29  ;;  %5208 = vmatprep.subr.mxu0 %v422_v30 }
 0x16a   :  { %5243 = vmatprep.subr.mxu1 %v439_v31  ;;  %5209 = vmatpush3.msra.mxu0 %v422_v30 }
 0x16b   :  { %5210 = vmatprep.mubr.f32.mxu0 %v6560_v32  ;;  %5244 = vmatpush3.msra.mxu1 %v439_v31 }
 0x16c   :  { %5245 = vmatprep.mubr.f32.mxu1 %v6560_v32  ;;  %5211 = vmatmul.mubr.f32.vlgmr.msra.gmra.mxu0 %v6562_v33 }
 0x16d   :  { %5246 = vmatmul.mubr.f32.vlgmr.msra.gmra.mxu1 %v6562_v33  ;;  %5280 = vmatprep.mubr.f32.mxu0 %v6560_v32 }
 0x16e   :  { %5283 = vmatprep.subr.mxu1 %v6338_v34  ;;  %5285 = vmatprep.mubr.msk.f32.mxu1 %vm6339_vm0, %v6338_v34 }
 0x16f   :  { %5248 = vmatprep.subr.mxu0 %v471_v45 }
 0x170   :  { %5249 = vmatpush3.msra.mxu0 %v471_v45 }
 0x171   :  { %5250 = vmatprep.subr.mxu0 %v470_v46 }
 0x172   :  { %5251 = vmatpush3.msra.mxu0 %v470_v46 }
 0x173   :  { %5252 = vmatprep.subr.mxu0 %v469_v47 }
 0x174   :  { %5253 = vmatpush3.msra.mxu0 %v469_v47 }
 0x175   :  { %5254 = vmatprep.subr.mxu0 %v468_v48 }
 0x176   :  { %5255 = vmatpush3.msra.mxu0 %v468_v48 }
 0x177   :  { %5256 = vmatprep.subr.mxu0 %v467_v49 }
 0x178   :  { %5257 = vmatpush3.msra.mxu0 %v467_v49 }
 0x179   :  { %5258 = vmatprep.subr.mxu0 %v466_v50 }
 0x17a   :  { %5259 = vmatpush3.msra.mxu0 %v466_v50 }
 0x17b   :  { %5260 = vmatprep.subr.mxu0 %v465_v51 }
 0x17c   :  { %5261 = vmatpush3.msra.mxu0 %v465_v51 }
 0x17d   :  { %5262 = vmatprep.subr.mxu0 %v464_v52 }
 0x17e   :  { %5263 = vmatpush3.msra.mxu0 %v464_v52 }
 0x17f   :  { %5264 = vmatprep.subr.mxu0 %v463_v53 }
 0x180   :  { %5265 = vmatpush3.msra.mxu0 %v463_v53 }
 0x181   :  { %5266 = vmatprep.subr.mxu0 %v462_v54 }
 0x182   :  { %5267 = vmatpush3.msra.mxu0 %v462_v54 }
 0x183   :  { %5268 = vmatprep.subr.mxu0 %v461_v55 }
 0x184   :  { %5269 = vmatpush3.msra.mxu0 %v461_v55 }
 0x185   :  { %5270 = vmatprep.subr.mxu0 %v460_v56 }
 0x186   :  { %5271 = vmatpush3.msra.mxu0 %v460_v56 }
 0x187   :  { %5272 = vmatprep.subr.mxu0 %v459_v57 }
 0x188   :  { %5273 = vmatpush3.msra.mxu0 %v459_v57 }
 0x189   :  { %5274 = vmatprep.subr.mxu0 %v458_v58 }
 0x18a   :  { %5275 = vmatpush3.msra.mxu0 %v458_v58 }
 0x18b   :  { %5276 = vmatprep.subr.mxu0 %v457_v59 }
 0x18c   :  { %5277 = vmatpush3.msra.mxu0 %v457_v59 }
 0x18d   :  { %5278 = vmatprep.subr.mxu0 %v456_v60 }
 0x18e   :  { %5279 = vmatpush3.msra.mxu0 %v456_v60 }
 0x18f   :  { %5281 = vmatmul.mubr.f32.vlgmr.msra.gmra.mxu0 %v6562_v33 }
 0x22c   :  { %v5212_v35 = vpop.f32.mrf.mxu0 }
 0x22d   :  { %v5247_v37 = vpop.f32.mrf.mxu1  ;;  %v6589_v44 = vadd.f32 %v5212_v35, %v4847_v36 }
 0x22e   :  { %v562_v39 = vpop.f32.mrf.mxu0  ;;  %v6581_v43 = vadd.f32 %v5247_v37, %v4848_v38 }
 0x22f   :  { %v643_v40 = vpop.f32.mrf.mxu1  ;;  %v6572_v41 = vadd.f32 %v4847_v36, %v562_v39 }
 0x230   :  { %v6574_v42 = vadd.f32 %v4848_v38, %v643_v40 }
 0x231   :  { %1059 = vrot.lane.b32.xlu1 %v6572_v41, %s6340_s27 }
 0x232   :  { %5284 = vmatpush3.xpose.msk.msra.mxu1 %vm733_vm1, %v6574_v42 }
 0x233   :  { %5288 = vmatprep.subr.mxu1 %v6338_v34 }
 0x235   :  { %5286 = vmatmul.mubr.msk.f32.vlgmr.msra.gmra.mxu1 %vm733_vm1, %v6572_v41  ;;  %1139 = vrot.lane.b32.xlu1 %v6581_v43, %s6340_s27 }
 0x236   :  { %5289 = vmatpush3.xpose.msk.msra.mxu1 %vm733_vm1, %v6581_v43  ;;  %5290 = vmatprep.mubr.msk.f32.mxu1 %vm6339_vm0, %v6338_v34 }
 0x237   :  { %5293 = vmatprep.subr.mxu1 %v6338_v34 }
 0x239   :  { %5291 = vmatmul.mubr.msk.f32.vlgmr.msra.gmra.mxu1 %vm733_vm1, %v6589_v44 }
 0x23a   :  { %5295 = vmatprep.mubr.msk.f32.mxu1 %vm6339_vm0, %v6338_v34 }
 0x24f   :  { %v5282_v18 = vpop.f32.mrf.mxu0 }
 0x250   :  { %v6609_v20 = vadd.f32 %v5282_v18, %v4849_v19  ;;  %v478_v18 = vld [vmem:[#allocation19 + $0x28] sm:$0xff] }
 0x251   :  { %v724_v21 = vpop.f32.mrf.mxu0 }
 0x252   :  { %v6611_v22 = vadd.f32 %v4849_v19, %v724_v21  ;;  %v477_v19 = vld [vmem:[#allocation19 + $0x20] sm:$0xff] }
 0x254   :  { %5294 = vmatpush3.msra.mxu1 %v6611_v22 }
 0x255   :  { %5298 = vmatprep.subr.mxu1 %v6338_v34 }
 0x2a3   :  { %v1060_v23 = vpop.permute.xlu1 %1059 }
 0x2a7   :  { %v1140_v24 = vpop.permute.xlu1 %1139 }
 0x2f5   :  { %v806_v61 = vpop.f32.mrf.mxu1 }
 0x2f6   :  { %v886_v63 = vmul.f32 0.17677669, %v806_v61 }
 0x2f7   :  { %v5287_v0 = vpop.f32.mrf.mxu1 }
 0x2f8   :  { %v888_v1 = vadd.f32 %v886_v63, %v6599_v62 }
 0x2f9   :  { %v882_v2 = vpop.f32.mrf.mxu1 }
 0x2fa   :  { %v887_v3 = vmul.f32 0.17677669, %v882_v2  ;;  %v891_v4 = vsel %vm890_vm2, %v888_v1, -inf }
 0x2fb   :  { %892 = vmax.xlane.f32.xlu0 %v891_v4  ;;  %v5292_v5 = vpop.f32.mrf.mxu1 }
 0x2fc   :  { %v889_v6 = vadd.f32 %v887_v3, %v6599_v62 }
 0x2fe   :  { %v894_v7 = vsel %vm890_vm2, %v889_v6, -inf }
 0x2ff   :  { %895 = vmax.xlane.f32.xlu0 %v894_v7  ;;  %v476_v7 = vld [vmem:[#allocation19 + $0x18] sm:$0xff] }
 0x315   :  { %1061 = vrot.lane.b32.xlu0 %v6574_v42, %s6340_s27 }
 0x384   :  { %v893_v8 = vpop.xlane.xlu0 %892 }
 0x385   :  { %v897_v9 = vsub.f32 %v888_v1, %v893_v8  ;;  %v479_v1 = vld [vmem:[#allocation19 + $0x30] sm:$0xff] }
 0x387   :  { %v899_v10 = vmul.f32 1.442695, %v897_v9 }
 0x388   :  { %v896_v11 = vpop.xlane.xlu0 %895 }
 0x389   :  { %5699 = vpow2.f32 %v899_v10  ;;  %v898_v12 = vsub.f32 %v889_v6, %v896_v11  ;;  %v475_v11 = vld [vmem:[#allocation19 + $0x10] sm:$0xff] }
 0x38b   :  { %v901_v13 = vmul.f32 1.442695, %v898_v12  ;;  %v474_v12 = vld [vmem:[#allocation19 + $0x8] sm:$0xff] }
 0x38c   :  { %v1062_v31 = vpop.permute.xlu0 %1061 }
 0x38d   :  { %5701 = vpow2.f32 %v901_v13 }
 0x396   :  { %v5700_v14 = vpop.eup %5699 }
 0x397   :  { %v903_v15 = vsel %vm890_vm2, %v5700_v14, 0.0 }
 0x398   :  { %904 = vadd.xlane.f32.xlu1 %v903_v15 }
 0x39a   :  { %v5702_v16 = vpop.eup %5701 }
 0x39b   :  { %v906_v17 = vsel %vm890_vm2, %v5702_v16, 0.0 }
 0x39c   :  { %907 = vadd.xlane.f32.xlu1 %v906_v17 }
 0x3ad   :  { %1137 = vrot.lane.b32.xlu1 %v6589_v44, %s6340_s27 }
 0x421   :  { %v905_v25 = vpop.xlane.xlu1 %904 }
 0x422   :  { %5703 = vrcp.f32 %v905_v25 }
 0x425   :  { %v908_v26 = vpop.xlane.xlu1 %907 }
 0x426   :  { %5705 = vrcp.f32 %v908_v26 }
 0x429   :  { %v1138_v35 = vpop.permute.xlu1 %1137 }
 0x42f   :  { %v5704_v27 = vpop.eup %5703 }
 0x430   :  { %v911_v28 = vmul.f32 %v5704_v27, %v5700_v14  ;;  %v473_v14 = vld [vmem:[#allocation19] sm:$0xff] }
 0x432   :  { %5296 = vmatmul.mubr.msk.f32.vlgmr.msra.gmra.mxu1 %vm890_vm2, %v911_v28 }
 0x433   :  { %v5706_v29 = vpop.eup %5705  ;;  %5299 = vmatpush3.msra.mxu1 %v6609_v20  ;;  %5300 = vmatprep.mubr.msk.f32.mxu1 %vm6339_vm0, %v6338_v34 }
 0x434   :  { %5303 = vmatprep.subr.mxu1 %v6338_v34  ;;  %v912_v30 = vmul.f32 %v5706_v29, %v5702_v16 }
 0x436   :  { %5301 = vmatmul.mubr.msk.f32.vlgmr.msra.gmra.mxu1 %vm890_vm2, %v912_v30 }
 0x437   :  { %5304 = vmatpush3.xpose.msk.msra.mxu1 %vm733_vm1, %v1062_v31  ;;  %5305 = vmatprep.mubr.msk.f32.mxu1 %vm6339_vm0, %v6338_v34 }
 0x438   :  { %5308 = vmatprep.subr.mxu1 %v6338_v34 }
 0x43a   :  { %5306 = vmatmul.mubr.msk.f32.vlgmr.msra.gmra.mxu1 %vm733_vm1, %v1060_v23 }
 0x43b   :  { %5309 = vmatpush3.xpose.msk.msra.mxu1 %vm733_vm1, %v1140_v24  ;;  %5310 = vmatprep.mubr.msk.f32.mxu1 %vm6339_vm0, %v6338_v34 }
 0x43c   :  { %5313 = vmatprep.subr.mxu1 %v6338_v34 }
 0x43e   :  { %5311 = vmatmul.mubr.msk.f32.vlgmr.msra.gmra.mxu1 %vm733_vm1, %v1138_v35 }
 0x43f   :  { %5315 = vmatprep.mubr.msk.f32.mxu1 %vm6339_vm0, %v6338_v34 }
 0x4f2   :  { %v6635_v36 = vpop.f32.mrf.mxu1 }
 0x4f4   :  { %v5297_v37 = vpop.f32.mrf.mxu1 }
 0x4f6   :  { %v6637_v38 = vpop.f32.mrf.mxu1 }
 0x4f8   :  { %v5302_v39 = vpop.f32.mrf.mxu1 }
 0x4fa   :  { %v1133_v40 = vpop.f32.mrf.mxu1 }
 0x4fb   :  { %v1215_v45 = vmul.f32 0.17677669, %v1133_v40 }
 0x4fc   :  { %v5307_v46 = vpop.f32.mrf.mxu1 }
 0x4fd   :  { %v1217_v47 = vadd.f32 %v1215_v45, %v6599_v62 }
 0x4fe   :  { %v1211_v48 = vpop.f32.mrf.mxu1 }
 0x4ff   :  { %v1216_v49 = vmul.f32 0.17677669, %v1211_v48  ;;  %v1219_v50 = vsel %vm890_vm2, %v1217_v47, -inf }
 0x500   :  { %1220 = vmax.xlane.f32.xlu0 %v1219_v50  ;;  %v5312_v51 = vpop.f32.mrf.mxu1 }
 0x501   :  { %v1218_v52 = vadd.f32 %v1216_v49, %v6599_v62 }
 0x503   :  { %v1222_v53 = vsel %vm890_vm2, %v1218_v52, -inf }
 0x504   :  { %1223 = vmax.xlane.f32.xlu1 %v1222_v53 }
 0x515   :  { %1319 = vrot.lane.b32.xlu1 %v6609_v20, %s6340_s27 }
 0x519   :  { %1559 = vrot.lane.b32.xlu1 %v6574_v42, %s6341_s1 }
 0x51d   :  { %1557 = vrot.lane.b32.xlu1 %v6572_v41, %s6341_s1 }
 0x521   :  { %1635 = vrot.lane.b32.xlu1 %v6589_v44, %s6341_s1 }
 0x525   :  { %1976 = vrot.lane.b32.xlu1 %v6574_v42, %s6342_s20  ;;  %v480_v42 = vld [vmem:[#allocation19 + $0x38] sm:$0xff] }
 0x526   :  { %5323 = vmatprep.subr.mxu0 %v480_v42 }
 0x527   :  { %5324 = vmatpush3.msra.mxu0 %v480_v42 }
 0x528   :  { %5325 = vmatprep.subr.mxu0 %v479_v1 }
 0x529   :  { %5326 = vmatpush3.msra.mxu0 %v479_v1 }
 0x52a   :  { %5327 = vmatprep.subr.mxu0 %v478_v18 }
 0x52b   :  { %5328 = vmatpush3.msra.mxu0 %v478_v18 }
 0x52c   :  { %5329 = vmatprep.subr.mxu0 %v477_v19 }
 0x52d   :  { %5330 = vmatpush3.msra.mxu0 %v477_v19 }
 0x52e   :  { %5355 = vmatprep.subr.mxu0 %v6338_v34 }
 0x589   :  { %v1221_v54 = vpop.xlane.xlu0 %1220 }
 0x58a   :  { %v1225_v55 = vsub.f32 %v1217_v47, %v1221_v54 }
 0x58c   :  { %v1227_v56 = vmul.f32 1.442695, %v1225_v55 }
 0x58d   :  { %v1224_v57 = vpop.xlane.xlu1 %1223 }
 0x58e   :  { %5707 = vpow2.f32 %v1227_v56  ;;  %v1226_v58 = vsub.f32 %v1218_v52, %v1224_v57 }
 0x590   :  { %v1229_v59 = vmul.f32 1.442695, %v1226_v58 }
 0x591   :  { %v1320_v8 = vpop.permute.xlu1 %1319 }
 0x592   :  { %5709 = vpow2.f32 %v1229_v59 }
 0x595   :  { %v1560_v13 = vpop.permute.xlu1 %1559 }
 0x599   :  { %v1558_v15 = vpop.permute.xlu1 %1557 }
 0x59b   :  { %v5708_v60 = vpop.eup %5707 }
 0x59c   :  { %v1231_v61 = vsel %vm890_vm2, %v5708_v60, 0.0 }
 0x59d   :  { %1232 = vadd.xlane.f32.xlu0 %v1231_v61  ;;  %v1636_v17 = vpop.permute.xlu1 %1635 }
 0x59f   :  { %v5710_v63 = vpop.eup %5709 }
 0x5a0   :  { %v1234_v0 = vsel %vm890_vm2, %v5710_v63, 0.0 }
 0x5a1   :  { %1235 = vadd.xlane.f32.xlu0 %v1234_v0  ;;  %v1977_v49 = vpop.permute.xlu1 %1976 }
 0x5b7   :  { %1242 = vrot.lane.b32.xlu0 %v6611_v22, %s6340_s27 }
 0x5bb   :  { %1637 = vrot.lane.b32.xlu0 %v6581_v43, %s6341_s1 }
 0x626   :  { %v1233_v2 = vpop.xlane.xlu0 %1232 }
 0x627   :  { %5711 = vrcp.f32 %v1233_v2 }
 0x62a   :  { %v1236_v3 = vpop.xlane.xlu0 %1235 }
 0x62b   :  { %5713 = vrcp.f32 %v1236_v3 }
 0x62e   :  { %v1243_v4 = vpop.permute.xlu0 %1242 }
 0x62f   :  { %5314 = vmatpush3.msra.mxu1 %v1243_v4 }
 0x630   :  { %5318 = vmatprep.subr.mxu1 %v6338_v34 }
 0x632   :  { %v1638_v16 = vpop.permute.xlu0 %1637 }
 0x634   :  { %v5712_v5 = vpop.eup %5711 }
 0x635   :  { %v1239_v6 = vmul.f32 %v5712_v5, %v5708_v60 }
 0x637   :  { %5316 = vmatmul.mubr.msk.f32.vlgmr.msra.gmra.mxu1 %vm890_vm2, %v1239_v6 }
 0x638   :  { %v5714_v9 = vpop.eup %5713  ;;  %5319 = vmatpush3.msra.mxu1 %v1320_v8  ;;  %5320 = vmatprep.mubr.msk.f32.mxu1 %vm6339_vm0, %v6338_v34 }
 0x639   :  { %5334 = vmatprep.subr.mxu1 %v476_v7  ;;  %v1240_v10 = vmul.f32 %v5714_v9, %v5710_v63 }
 0x63b   :  { %5321 = vmatmul.mubr.msk.f32.vlgmr.msra.gmra.mxu1 %vm890_vm2, %v1240_v10 }
 0x63c   :  { %5335 = vmatpush3.msra.mxu1 %v476_v7  ;;  %5342 = vmatprep.mubr.msk.f32.mxu1 %vm733_vm1, %v6635_v36 }
 0x63d   :  { %5336 = vmatprep.subr.mxu1 %v475_v11 }
 0x63e   :  { %5337 = vmatpush3.msra.mxu1 %v475_v11 }
 0x63f   :  { %5338 = vmatprep.subr.mxu1 %v474_v12 }
 0x640   :  { %5339 = vmatpush3.msra.mxu1 %v474_v12  ;;  %v484_v12 = vld [vmem:[#allocation19 + $0x58] sm:$0xff] }
 0x641   :  { %5340 = vmatprep.subr.mxu1 %v473_v14 }
 0x642   :  { %5341 = vmatpush3.msra.mxu1 %v473_v14  ;;  %v482_v14 = vld [vmem:[#allocation19 + $0x48] sm:$0xff] }
 0x643   :  { %5343 = vmatmul.mubr.msk.f32.vlgmr.msra.gmra.mxu1 %vm733_vm1, %v6637_v38  ;;  %5345 = vmatprep.subr.mxu1 %v6338_v34 }
 0x644   :  { %5346 = vmatpush3.xpose.msk.msra.mxu1 %vm733_vm1, %v1560_v13  ;;  %5347 = vmatprep.mubr.msk.f32.mxu1 %vm6339_vm0, %v6338_v34  ;;  %v483_v13 = vld [vmem:[#allocation19 + $0x50] sm:$0xff] }
 0x645   :  { %5350 = vmatprep.subr.mxu1 %v6338_v34 }
 0x647   :  { %5348 = vmatmul.mubr.msk.f32.vlgmr.msra.gmra.mxu1 %vm733_vm1, %v1558_v15  ;;  %v481_v15 = vld [vmem:[#allocation19 + $0x40] sm:$0xff] }
 0x648   :  { %5351 = vmatpush3.xpose.msk.msra.mxu1 %vm733_vm1, %v1638_v16  ;;  %5352 = vmatprep.mubr.msk.f32.mxu1 %vm6339_vm0, %v6338_v34 }
 0x649   :  { %5360 = vmatprep.subr.mxu1 %v6338_v34 }
 0x64b   :  { %5353 = vmatmul.mubr.msk.f32.vlgmr.msra.gmra.mxu1 %vm733_vm1, %v1636_v17 }
 0x64c   :  { %5362 = vmatprep.mubr.msk.f32.mxu1 %vm6339_vm0, %v6338_v34 }
 0x6f7   :  { %v1314_v21 = vpop.f32.mrf.mxu1 }
 0x6f8   :  { %5331 = vmatprep.mubr.msk.f32.mxu0 %vm733_vm1, %v1314_v21 }
 0x6f9   :  { %v5317_v23 = vpop.f32.mrf.mxu1 }
 0x6fb   :  { %v1391_v24 = vpop.f32.mrf.mxu1 }
 0x6fc   :  { %5332 = vmatmul.mubr.msk.f32.vlgmr.msra.gmra.mxu0 %vm733_vm1, %v1391_v24 }
 0x6fd   :  { %v5322_v25 = vpop.f32.mrf.mxu1  ;;  %5357 = vmatprep.mubr.msk.f32.mxu0 %vm6339_vm0, %v6338_v34 }
 0x703   :  { %v6686_v26 = vpop.f32.mrf.mxu1 }
 0x705   :  { %v6688_v27 = vpop.f32.mrf.mxu1 }
 0x707   :  { %v1631_v28 = vpop.f32.mrf.mxu1 }
 0x708   :  { %v1713_v48 = vmul.f32 0.17677669, %v1631_v28 }
 0x709   :  { %v5349_v29 = vpop.f32.mrf.mxu1 }
 0x70b   :  { %v1709_v30 = vpop.f32.mrf.mxu1 }
 0x70c   :  { %v1714_v31 = vmul.f32 0.17677669, %v1709_v30 }
 0x70d   :  { %v5354_v35 = vpop.f32.mrf.mxu1 }
 0x70e   :  { %v1716_v36 = vadd.f32 %v1714_v31, %v6599_v62 }
 0x710   :  { %v1720_v37 = vsel %vm890_vm2, %v1716_v36, -inf }
 0x711   :  { %1721 = vmax.xlane.f32.xlu0 %v1720_v37 }
 0x727   :  { %1815 = vrot.lane.b32.xlu0 %v6609_v20, %s6341_s1 }
 0x72b   :  { %1974 = vrot.lane.b32.xlu0 %v6572_v41, %s6342_s20  ;;  %v1715_v41 = vadd.f32 %v1713_v48, %v6599_v62  ;;  %v486_v48 = vld [vmem:[#allocation19 + $0x68] sm:$0xff] }
 0x72f   :  { %2052 = vrot.lane.b32.xlu0 %v6589_v44, %s6342_s20  ;;  %v1717_v44 = vsel %vm890_vm2, %v1715_v41, -inf }
 0x79a   :  { %v1722_v38 = vpop.xlane.xlu0 %1721 }
 0x79b   :  { %v1724_v39 = vsub.f32 %v1716_v36, %v1722_v38  ;;  %v488_v38 = vld [vmem:[#allocation19 + $0x78] sm:$0xff] }
 0x79d   :  { %v1727_v40 = vmul.f32 1.442695, %v1724_v39 }
 0x79e   :  { %v1816_v45 = vpop.permute.xlu0 %1815 }
 0x79f   :  { %5715 = vpow2.f32 %v1727_v40  ;;  %5361 = vmatpush3.msra.mxu1 %v1816_v45  ;;  %v487_v45 = vld [vmem:[#allocation19 + $0x70] sm:$0xff] }
 0x7a0   :  { %5376 = vmatprep.subr.mxu1 %v6338_v34 }
 0x7a2   :  { %v1975_v53 = vpop.permute.xlu0 %1974 }
 0x7a6   :  { %v2053_v54 = vpop.permute.xlu0 %2052 }
 0x7ac   :  { %v5716_v46 = vpop.eup %5715 }
 0x7ad   :  { %v1732_v47 = vsel %vm890_vm2, %v5716_v46, 0.0 }
 0x7ae   :  { %1733 = vadd.xlane.f32.xlu1 %v1732_v47 }
 0x7bc   :  { %v5333_v29 = vpop.f32.mrf.mxu0 }
 0x7be   :  { %v1467_v30 = vpop.f32.mrf.mxu0 }
 0x7bf   :  { %2054 = vrot.lane.b32.xlu1 %v6581_v43, %s6342_s20 }
 0x7e3   :  { %1718 = vmax.xlane.f32.xlu1 %v1717_v44  ;;  %v1554_v44 = vadd.f32 %v6686_v26, %v5333_v29  ;;  %v2460_v29 = vld [vmem:[#allocation22 + $0x18] sm:$0xff] }
 0x837   :  { %v1734_v50 = vpop.xlane.xlu1 %1733 }
 0x838   :  { %5717 = vrcp.f32 %v1734_v50 }
 0x83b   :  { %v2055_v43 = vpop.permute.xlu1 %2054 }
 0x845   :  { %v5718_v51 = vpop.eup %5717 }
 0x846   :  { %v1738_v52 = vmul.f32 %v5718_v51, %v5716_v46 }
 0x848   :  { %5363 = vmatmul.mubr.msk.f32.vlgmr.msra.gmra.mxu1 %vm890_vm2, %v1738_v52 }
 0x849   :  { %5377 = vmatpush3.xpose.msk.msra.mxu1 %vm733_vm1, %v1977_v49  ;;  %5378 = vmatprep.mubr.msk.f32.mxu1 %vm6339_vm0, %v6338_v34 }
 0x84a   :  { %5381 = vmatprep.subr.mxu1 %v6338_v34 }
 0x84c   :  { %5379 = vmatmul.mubr.msk.f32.vlgmr.msra.gmra.mxu1 %vm733_vm1, %v1975_v53 }
 0x84d   :  { %5382 = vmatpush3.xpose.msk.msra.mxu1 %vm733_vm1, %v2055_v43  ;;  %5383 = vmatprep.mubr.msk.f32.mxu1 %vm6339_vm0, %v6338_v34 }
 0x84e   :  { %5391 = vmatprep.subr.mxu1 %v6338_v34 }
 0x850   :  { %5384 = vmatmul.mubr.msk.f32.vlgmr.msra.gmra.mxu1 %vm733_vm1, %v2053_v54 }
 0x851   :  { %5393 = vmatprep.mubr.msk.f32.mxu1 %vm6339_vm0, %v6338_v34 }
 0x86c   :  { %v1719_v55 = vpop.xlane.xlu1 %1718 }
 0x86d   :  { %v1723_v56 = vsub.f32 %v1715_v41, %v1719_v55  ;;  %v485_v41 = vld [vmem:[#allocation19 + $0x60] sm:$0xff]  ;;  %v1549_v55 = vadd.f32 %v6688_v27, %v1467_v30 }
 0x86e   :  { %v2474_v30 = vld [vmem:[#allocation25] sm:$0xff] }
 0x86f   :  { %v1725_v57 = vmul.f32 1.442695, %v1723_v56  ;;  %v4882_v56 = vld [vmem:[#allocation20] ss:$0 sm:$0xff] }
 0x871   :  { %5719 = vpow2.f32 %v1725_v57 }
 0x87e   :  { %v5720_v58 = vpop.eup %5719 }
 0x87f   :  { %v1729_v59 = vsel %vm890_vm2, %v5720_v58, 0.0 }
 0x880   :  { %1730 = vadd.xlane.f32.xlu0 %v1729_v59 }
 0x896   :  { %1739 = vrot.lane.b32.xlu0 %v6611_v22, %s6341_s1 }
 0x89a   :  { %2232 = vrot.lane.b32.xlu0 %v6609_v20, %s6342_s20 }
 0x908   :  { %v1887_v60 = vpop.f32.mrf.mxu1 }
 0x909   :  { %v1731_v61 = vpop.xlane.xlu0 %1730 }
 0x90a   :  { %5721 = vrcp.f32 %v1731_v61  ;;  %v5364_v63 = vpop.f32.mrf.mxu1 }
 0x90c   :  { %v2048_v0 = vpop.f32.mrf.mxu1 }
 0x90d   :  { %v2130_v42 = vmul.f32 0.17677669, %v2048_v0  ;;  %v1740_v1 = vpop.permute.xlu0 %1739 }
 0x90e   :  { %5356 = vmatpush3.msra.mxu0 %v1740_v1  ;;  %v5380_v2 = vpop.f32.mrf.mxu1 }
 0x90f   :  { %v2132_v3 = vadd.f32 %v2130_v42, %v6599_v62  ;;  %5365 = vmatprep.subr.mxu0 %v484_v12  ;;  %v2489_v2 = vld [vmem:[#allocation25 + $0x78] sm:$0xff] }
 0x910   :  { %v2126_v4 = vpop.f32.mrf.mxu1 }
 0x911   :  { %v2131_v5 = vmul.f32 0.17677669, %v2126_v4  ;;  %v2233_v6 = vpop.permute.xlu0 %2232  ;;  %v2134_v7 = vsel %vm890_vm2, %v2132_v3, -inf  ;;  %v2486_v4 = vld [vmem:[#allocation25 + $0x60] sm:$0xff] }
 0x912   :  { %5392 = vmatpush3.msra.mxu1 %v2233_v6  ;;  %2135 = vmax.xlane.f32.xlu1 %v2134_v7  ;;  %v5385_v8 = vpop.f32.mrf.mxu1  ;;  %v2485_v6 = vld [vmem:[#allocation25 + $0x58] sm:$0xff]  ;;  %v2470_v7 = vld [vmem:[#allocation22 + $0x68] sm:$0xff] }
 0x913   :  { %v2133_v20 = vadd.f32 %v2131_v5, %v6599_v62  ;;  %v2471_v5 = vld [vmem:[#allocation22 + $0x70] sm:$0xff] }
 0x914   :  { %v2484_v8 = vld [vmem:[#allocation25 + $0x50] sm:$0xff] }
 0x915   :  { %v2137_v9 = vsel %vm890_vm2, %v2133_v20, -inf }
 0x916   :  { %2138 = vmax.xlane.f32.xlu1 %v2137_v9  ;;  %v2483_v9 = vld [vmem:[#allocation25 + $0x48] sm:$0xff] }
 0x917   :  { %v5722_v10 = vpop.eup %5721 }
 0x918   :  { %v1737_v11 = vmul.f32 %v5722_v10, %v5720_v58  ;;  %v2468_v10 = vld [vmem:[#allocation22 + $0x58] sm:$0xff] }
 0x91a   :  { %5358 = vmatmul.mubr.msk.f32.vlgmr.msra.gmra.mxu0 %vm890_vm2, %v1737_v11  ;;  %v2482_v11 = vld [vmem:[#allocation25 + $0x40] sm:$0xff] }
 0x91b   :  { %5366 = vmatpush3.msra.mxu0 %v484_v12  ;;  %v2467_v12 = vld [vmem:[#allocation22 + $0x50] sm:$0xff] }
 0x91c   :  { %5367 = vmatprep.subr.mxu0 %v483_v13 }
 0x91d   :  { %5368 = vmatpush3.msra.mxu0 %v483_v13  ;;  %v2481_v13 = vld [vmem:[#allocation25 + $0x38] sm:$0xff] }
 0x91e   :  { %5369 = vmatprep.subr.mxu0 %v482_v14 }
 0x91f   :  { %5370 = vmatpush3.msra.mxu0 %v482_v14  ;;  %v2466_v14 = vld [vmem:[#allocation22 + $0x48] sm:$0xff] }
 0x920   :  { %5371 = vmatprep.subr.mxu0 %v481_v15 }
 0x921   :  { %5372 = vmatpush3.msra.mxu0 %v481_v15  ;;  %v2480_v15 = vld [vmem:[#allocation25 + $0x30] sm:$0xff] }
 0x922   :  { %5386 = vmatprep.subr.mxu0 %v6338_v34 }
 0x99b   :  { %v2136_v62 = vpop.xlane.xlu1 %2135 }
 0x99c   :  { %v2140_v16 = vsub.f32 %v2132_v3, %v2136_v62  ;;  %v2487_v3 = vld [vmem:[#allocation25 + $0x68] sm:$0xff]  ;;  %v2465_v62 = vld [vmem:[#allocation22 + $0x40] sm:$0xff] }
 0x99e   :  { %v2142_v17 = vmul.f32 1.442695, %v2140_v16  ;;  %v2479_v16 = vld [vmem:[#allocation25 + $0x28] sm:$0xff] }
 0x99f   :  { %v2139_v18 = vpop.xlane.xlu1 %2138 }
 0x9a0   :  { %5723 = vpow2.f32 %v2142_v17  ;;  %v2141_v19 = vsub.f32 %v2133_v20, %v2139_v18  ;;  %v2469_v20 = vld [vmem:[#allocation22 + $0x60] sm:$0xff]  ;;  %v2464_v17 = vld [vmem:[#allocation22 + $0x38] sm:$0xff] }
 0x9a1   :  { %v2478_v18 = vld [vmem:[#allocation25 + $0x20] sm:$0xff] }
 0x9a2   :  { %v2144_v21 = vmul.f32 1.442695, %v2141_v19  ;;  %v2463_v19 = vld [vmem:[#allocation22 + $0x30] sm:$0xff] }
 0x9a4   :  { %5725 = vpow2.f32 %v2144_v21  ;;  %v2477_v21 = vld [vmem:[#allocation25 + $0x18] sm:$0xff] }
 0x9ad   :  { %v5724_v23 = vpop.eup %5723 }
 0x9ae   :  { %v2146_v24 = vsel %vm890_vm2, %v5724_v23, 0.0 }
 0x9af   :  { %2147 = vadd.xlane.f32.xlu1 %v2146_v24  ;;  %v2476_v24 = vld [vmem:[#allocation25 + $0x10] sm:$0xff] }
 0x9b1   :  { %v5726_v25 = vpop.eup %5725 }
 0x9b2   :  { %v2149_v28 = vsel %vm890_vm2, %v5726_v25, 0.0 }
 0x9b3   :  { %2150 = vadd.xlane.f32.xlu1 %v2149_v28  ;;  %v2475_v28 = vld [vmem:[#allocation25 + $0x8] sm:$0xff] }
 0x9c4   :  { %2156 = vrot.lane.b32.xlu1 %v6611_v22, %s6342_s20 }
 0x9da   :  { %v1811_v31 = vpop.f32.mrf.mxu0 }
 0x9db   :  { %5373 = vmatprep.mubr.msk.f32.mxu0 %vm733_vm1, %v1811_v31  ;;  %v2459_v31 = vld [vmem:[#allocation22 + $0x10] sm:$0xff] }
 0x9dc   :  { %v5359_v35 = vpop.f32.mrf.mxu0  ;;  %5374 = vmatmul.mubr.msk.f32.vlgmr.msra.gmra.mxu0 %vm733_vm1, %v1887_v60 }
 0x9dd   :  { %5388 = vmatprep.mubr.msk.f32.mxu0 %vm6339_vm0, %v6338_v34  ;;  %v6754_v35 = vld [vmem:[#allocation5] sm:$0xff] }
 0xa38   :  { %v2148_v36 = vpop.xlane.xlu1 %2147 }
 0xa39   :  { %5727 = vrcp.f32 %v2148_v36  ;;  %v6756_v36 = vld [vmem:[#allocation5 + $0x8] sm:$0xff] }
 0xa3c   :  { %v2151_v37 = vpop.xlane.xlu1 %2150 }
 0xa3d   :  { %5729 = vrcp.f32 %v2151_v37  ;;  %v2458_v37 = vld [vmem:[#allocation22 + $0x8] sm:$0xff] }
 0xa40   :  { %v2157_v39 = vpop.permute.xlu1 %2156 }
 0xa41   :  { %5387 = vmatpush3.msra.mxu0 %v2157_v39 }
 0xa42   :  { %5396 = vmatprep.subr.mxu0 %v488_v38 }
 0xa46   :  { %v5728_v22 = vpop.eup %5727 }
 0xa47   :  { %v2154_v40 = vmul.f32 %v5728_v22, %v5724_v23  ;;  %v2462_v23 = vld [vmem:[#allocation22 + $0x28] sm:$0xff] }
 0xa49   :  { %5389 = vmatmul.mubr.msk.f32.vlgmr.msra.gmra.mxu0 %vm890_vm2, %v2154_v40 }
 0xa4a   :  { %v5730_v46 = vpop.eup %5729  ;;  %5397 = vmatpush3.msra.mxu0 %v488_v38  ;;  %v2457_v38 = vld [vmem:[#allocation22] sm:$0xff] }
 0xa4b   :  { %v2155_v47 = vmul.f32 %v5730_v46, %v5726_v25  ;;  %5398 = vmatprep.subr.mxu0 %v487_v45  ;;  %v2461_v25 = vld [vmem:[#allocation22 + $0x20] sm:$0xff] }
 0xa4c   :  { %5399 = vmatpush3.msra.mxu0 %v487_v45 }
 0xa4d   :  { %5394 = vmatmul.mubr.msk.f32.vlgmr.msra.gmra.mxu1 %vm890_vm2, %v2155_v47  ;;  %5400 = vmatprep.subr.mxu0 %v486_v48 }
 0xa4e   :  { %5401 = vmatpush3.msra.mxu0 %v486_v48 }
 0xa4f   :  { %5402 = vmatprep.subr.mxu0 %v485_v41 }
 0xa50   :  { %5403 = vmatpush3.msra.mxu0 %v485_v41 }
 0xa51   :  { %5442 = vmatprep.subr.mxu0 %v2489_v2 }
 0xa9c   :  { %v5375_v49 = vpop.f32.mrf.mxu0 }
 0xa9d   :  { %v1973_v50 = vadd.f32 %v5375_v49, %v1554_v44 }
 0xa9e   :  { %v1963_v51 = vpop.f32.mrf.mxu0 }
 0xa9f   :  { %v1972_v58 = vadd.f32 %v1963_v51, %v1549_v55 }
 0xb09   :  { %v2228_v52 = vpop.f32.mrf.mxu0 }
 0xb0a   :  { %5404 = vmatprep.mubr.msk.f32.mxu0 %vm733_vm1, %v2228_v52 }
 0xb0b   :  { %v5390_v53 = vpop.f32.mrf.mxu0 }
 0xb0d   :  { %v2304_v43 = vpop.f32.mrf.mxu1 }
 0xb0e   :  { %5405 = vmatmul.mubr.msk.f32.vlgmr.msra.gmra.mxu0 %vm733_vm1, %v2304_v43 }
 0xb0f   :  { %v5395_v54 = vpop.f32.mrf.mxu1  ;;  %5443 = vmatpush3.msra.mxu0 %v2489_v2  ;;  %5474 = vmatprep.mubr.f32.mxu0 %v6754_v35 }
 0xbce   :  { %v5406_v57 = vpop.f32.mrf.mxu0 }
 0xbcf   :  { %v2390_v59 = vadd.f32 %v5406_v57, %v1973_v50 }
 0xbd0   :  { %v2380_v60 = vpop.f32.mrf.mxu0 }
 0xbd1   :  { %v2398_v61 = vadd.f32 %v4882_v56, %v2390_v59  ;;  %v2389_v26 = vadd.f32 %v2380_v60, %v1972_v58 }
 0xbd3   :  { %v2397_v63 = vadd.f32 %v4882_v56, %v2389_v26  ;;  %v6743_v0 = vadd.f32 %v2398_v61, %v6562_v33  ;;  %v2488_v33 = vld [vmem:[#allocation25 + $0x70] sm:$0xff] }
 0xbd4   :  { %5444 = vmatprep.subr.mxu0 %v2488_v33 }
 0xbd5   :  { %2405 = vadd.xlane.f32.xlu1 %v6743_v0  ;;  %v6747_v42 = vadd.f32 %v2397_v63, %v6560_v32  ;;  %v2422_v1 = vmul.f32 %v6743_v0, %v6743_v0  ;;  %5445 = vmatpush3.msra.mxu0 %v2488_v33  ;;  %v2472_v32 = vld [vmem:[#allocation22 + $0x78] sm:$0xff] }
 0xbd6   :  { %5446 = vmatprep.subr.mxu0 %v2487_v3  ;;  %5407 = vmatprep.subr.mxu1 %v2472_v32 }
 0xbd7   :  { %2403 = vadd.xlane.f32.xlu0 %v6747_v42  ;;  %v2421_v27 = vmul.f32 %v6747_v42, %v6747_v42  ;;  %5447 = vmatpush3.msra.mxu0 %v2487_v3 }
 0xbd8   :  { %5408 = vmatpush3.msra.mxu1 %v2472_v32  ;;  %5448 = vmatprep.subr.mxu0 %v2486_v4 }
 0xbd9   :  { %5409 = vmatprep.subr.mxu1 %v2471_v5  ;;  %5449 = vmatpush3.msra.mxu0 %v2486_v4 }
 0xbda   :  { %5410 = vmatpush3.msra.mxu1 %v2471_v5  ;;  %5450 = vmatprep.subr.mxu0 %v2485_v6 }
 0xbdb   :  { %2423 = vadd.xlane.f32.xlu0 %v2421_v27  ;;  %5411 = vmatprep.subr.mxu1 %v2470_v7 }
 0xbdc   :  { %5451 = vmatpush3.msra.mxu0 %v2485_v6  ;;  %5412 = vmatpush3.msra.mxu1 %v2470_v7 }
 0xbdd   :  { %5452 = vmatprep.subr.mxu0 %v2484_v8  ;;  %5413 = vmatprep.subr.mxu1 %v2469_v20 }
 0xbde   :  { %5453 = vmatpush3.msra.mxu0 %v2484_v8  ;;  %5414 = vmatpush3.msra.mxu1 %v2469_v20 }
 0xbdf   :  { %2425 = vadd.xlane.f32.xlu0 %v2422_v1  ;;  %5454 = vmatprep.subr.mxu0 %v2483_v9 }
 0xbe0   :  { %5415 = vmatprep.subr.mxu1 %v2468_v10  ;;  %5455 = vmatpush3.msra.mxu0 %v2483_v9 }
 0xbe1   :  { %5416 = vmatpush3.msra.mxu1 %v2468_v10  ;;  %5456 = vmatprep.subr.mxu0 %v2482_v11 }
 0xbe2   :  { %5417 = vmatprep.subr.mxu1 %v2467_v12  ;;  %5457 = vmatpush3.msra.mxu0 %v2482_v11 }
 0xbe3   :  { %5418 = vmatpush3.msra.mxu1 %v2467_v12  ;;  %5458 = vmatprep.subr.mxu0 %v2481_v13  ;;  %v2401_v12 = vld [vmem:[%s6994_s25] sm:$0xff] }
 0xbe4   :  { %5419 = vmatprep.subr.mxu1 %v2466_v14  ;;  %5459 = vmatpush3.msra.mxu0 %v2481_v13 }
 0xbe5   :  { %5420 = vmatpush3.msra.mxu1 %v2466_v14  ;;  %5460 = vmatprep.subr.mxu0 %v2480_v15  ;;  %v2402_v14 = vld [vmem:[%s6995_s2] sm:$0xff] }
 0xbe6   :  { %5421 = vmatprep.subr.mxu1 %v2465_v62  ;;  %5461 = vmatpush3.msra.mxu0 %v2480_v15 }
 0xbe7   :  { %5422 = vmatpush3.msra.mxu1 %v2465_v62  ;;  %5462 = vmatprep.subr.mxu0 %v2479_v16 }
 0xbe8   :  { %5423 = vmatprep.subr.mxu1 %v2464_v17  ;;  %5463 = vmatpush3.msra.mxu0 %v2479_v16 }
 0xbe9   :  { %5424 = vmatpush3.msra.mxu1 %v2464_v17  ;;  %5464 = vmatprep.subr.mxu0 %v2478_v18 }
 0xbea   :  { %5425 = vmatprep.subr.mxu1 %v2463_v19  ;;  %5465 = vmatpush3.msra.mxu0 %v2478_v18 }
 0xbeb   :  { %5426 = vmatpush3.msra.mxu1 %v2463_v19  ;;  %5466 = vmatprep.subr.mxu0 %v2477_v21 }
 0xbec   :  { %5427 = vmatprep.subr.mxu1 %v2462_v23  ;;  %5467 = vmatpush3.msra.mxu0 %v2477_v21 }
 0xbed   :  { %5428 = vmatpush3.msra.mxu1 %v2462_v23  ;;  %5468 = vmatprep.subr.mxu0 %v2476_v24 }
 0xbee   :  { %5429 = vmatprep.subr.mxu1 %v2461_v25  ;;  %5469 = vmatpush3.msra.mxu0 %v2476_v24 }
 0xbef   :  { %5430 = vmatpush3.msra.mxu1 %v2461_v25  ;;  %5470 = vmatprep.subr.mxu0 %v2475_v28 }
 0xbf0   :  { %5431 = vmatprep.subr.mxu1 %v2460_v29  ;;  %5471 = vmatpush3.msra.mxu0 %v2475_v28 }
 0xbf1   :  { %5432 = vmatpush3.msra.mxu1 %v2460_v29  ;;  %5472 = vmatprep.subr.mxu0 %v2474_v30  ;;  %v4883_v29 = vld [vmem:[#allocation23] ss:$0 sm:$0xff] }
 0xbf2   :  { %5433 = vmatprep.subr.mxu1 %v2459_v31  ;;  %5473 = vmatpush3.msra.mxu0 %v2474_v30 }
 0xbf3   :  { %5434 = vmatpush3.msra.mxu1 %v2459_v31  ;;  %5475 = vmatmul.mubr.f32.vlgmr.msra.gmra.mxu0 %v6756_v36 }
 0xbf4   :  { %5435 = vmatprep.subr.mxu1 %v2458_v37  ;;  %5512 = vmatprep.subr.mxu0 %v6338_v34 }
 0xbf5   :  { %5436 = vmatpush3.msra.mxu1 %v2458_v37  ;;  %5514 = vmatprep.mubr.msk.f32.mxu0 %vm6339_vm0, %v6338_v34  ;;  %v2506_v37 = vld [vmem:[#allocation28 + $0x78] sm:$0xff] }
 0xbf6   :  { %5437 = vmatprep.subr.mxu1 %v2457_v38 }
 0xbf7   :  { %5438 = vmatpush3.msra.mxu1 %v2457_v38  ;;  %v2505_v38 = vld [vmem:[#allocation28 + $0x70] sm:$0xff] }
 0xbf8   :  { %5477 = vmatprep.subr.mxu1 %v2506_v37 }
 0xc5e   :  { %v2406_v39 = vpop.xlane.xlu1 %2405 }
 0xc5f   :  { %v2413_v22 = vrot.slane %v2406_v39, 4 }
 0xc60   :  { %v2404_v40 = vpop.xlane.xlu0 %2403 }
 0xc61   :  { %v2414_v45 = vadd.f32 %v2413_v22, %v2406_v39  ;;  %v2407_v46 = vrot.slane %v2404_v40, 4  ;;  %v2504_v39 = vld [vmem:[#allocation28 + $0x68] sm:$0xff]  ;;  %v2503_v22 = vld [vmem:[#allocation28 + $0x60] sm:$0xff] }
 0xc63   :  { %v2415_v47 = vrot.slane %v2414_v45, 2  ;;  %v2408_v48 = vadd.f32 %v2407_v46, %v2404_v40  ;;  %v2502_v40 = vld [vmem:[#allocation28 + $0x58] sm:$0xff]  ;;  %v2500_v46 = vld [vmem:[#allocation28 + $0x48] sm:$0xff] }
 0xc64   :  { %v2424_v41 = vpop.xlane.xlu0 %2423 }
 0xc65   :  { %v2409_v44 = vrot.slane %v2408_v48, 2  ;;  %v2427_v49 = vrot.slane %v2424_v41, 4  ;;  %v2416_v50 = vadd.f32 %v2415_v47, %v2414_v45  ;;  %v2501_v45 = vld [vmem:[#allocation28 + $0x50] sm:$0xff]  ;;  %v2499_v47 = vld [vmem:[#allocation28 + $0x40] sm:$0xff] }
 0xc67   :  { %v2410_v51 = vadd.f32 %v2409_v44, %v2408_v48  ;;  %v2428_v52 = vadd.f32 %v2427_v49, %v2424_v41  ;;  %v2417_v56 = vrot.slane %v2416_v50, 1  ;;  %v2498_v48 = vld [vmem:[#allocation28 + $0x38] sm:$0xff]  ;;  %v2497_v41 = vld [vmem:[#allocation28 + $0x30] sm:$0xff]  ;;  %v2496_v44 = vld [vmem:[#allocation28 + $0x28] sm:$0xff] }
 0xc68   :  { %v2426_v53 = vpop.xlane.xlu0 %2425  ;;  %v2495_v49 = vld [vmem:[#allocation28 + $0x20] sm:$0xff] }
 0xc69   :  { %v2411_v43 = vrot.slane %v2410_v51, 1  ;;  %v2429_v54 = vrot.slane %v2428_v52, 2  ;;  %v2433_v55 = vrot.slane %v2426_v53, 4  ;;  %v2418_v26 = vadd.f32 %v2417_v56, %v2416_v50  ;;  %v2494_v50 = vld [vmem:[#allocation28 + $0x18] sm:$0xff] }
 0xc6b   :  { %v2412_v57 = vadd.f32 %v2411_v43, %v2410_v51  ;;  %v2430_v58 = vadd.f32 %v2429_v54, %v2428_v52  ;;  %v2434_v59 = vadd.f32 %v2433_v55, %v2426_v53  ;;  %v2420_v3 = vmul.f32 0.0009765625, %v2418_v26  ;;  %v2493_v51 = vld [vmem:[#allocation28 + $0x10] sm:$0xff]  ;;  %v2492_v52 = vld [vmem:[#allocation28 + $0x8] sm:$0xff]  ;;  %v2491_v53 = vld [vmem:[#allocation28] sm:$0xff] }
 0xc6c   :  { %v6804_v54 = vld [vmem:[#allocation8] sm:$0xff] }
 0xc6d   :  { %v2419_v60 = vmul.f32 0.0009765625, %v2412_v57  ;;  %v2431_v61 = vrot.slane %v2430_v58, 1  ;;  %v2435_v63 = vrot.slane %v2434_v59, 2  ;;  %v2442_v7 = vmul.f32 %v2420_v3, %v2420_v3 }
 0xc6e   :  { %v2446_v62 = vsub.f32 %v6743_v0, %v2420_v3 }
 0xc6f   :  { %v2432_v27 = vadd.f32 %v2431_v61, %v2430_v58  ;;  %v2436_v1 = vadd.f32 %v2435_v63, %v2434_v59  ;;  %v2441_v2 = vmul.f32 %v2419_v60, %v2419_v60  ;;  %v2445_v10 = vsub.f32 %v6747_v42, %v2419_v60  ;;  %v4884_v42 = vld [vmem:[#allocation26] ss:$0 sm:$0xff] }
 0xc71   :  { %v2439_v33 = vmul.f32 0.0009765625, %v2432_v27  ;;  %v2437_v32 = vrot.slane %v2436_v1, 1 }
 0xc73   :  { %v2443_v4 = vsub.f32 %v2439_v33, %v2441_v2  ;;  %v2438_v5 = vadd.f32 %v2437_v32, %v2436_v1 }
 0xc75   :  { %v2447_v6 = vadd.f32 1e-05, %v2443_v4  ;;  %v2440_v8 = vmul.f32 0.0009765625, %v2438_v5 }
 0xc77   :  { %5731 = vrsqrt.f32 %v2447_v6  ;;  %v2444_v20 = vsub.f32 %v2440_v8, %v2442_v7  ;;  %v4885_v8 = vld [vmem:[#allocation29] ss:$0 sm:$0xff] }
 0xc79   :  { %v2448_v9 = vadd.f32 1e-05, %v2444_v20 }
 0xc7b   :  { %5733 = vrsqrt.f32 %v2448_v9 }
 0xc84   :  { %v5732_v11 = vpop.eup %5731 }
 0xc85   :  { %v2451_v13 = vmul.f32 %v5732_v11, %v2445_v10 }
 0xc87   :  { %v2453_v15 = vmul.f32 %v2451_v13, %v2401_v12 }
 0xc88   :  { %v5734_v16 = vpop.eup %5733 }
 0xc89   :  { %v6767_v17 = vadd.f32 %v2453_v15, %v2402_v14  ;;  %v2452_v18 = vmul.f32 %v5734_v16, %v2446_v62 }
 0xc8b   :  { %5439 = vmatprep.mubr.f32.mxu1 %v6767_v17  ;;  %v2454_v19 = vmul.f32 %v2452_v18, %v2401_v12 }
 0xc8d   :  { %v6770_v21 = vadd.f32 %v2454_v19, %v2402_v14 }
 0xc8f   :  { %5440 = vmatmul.mubr.f32.vlgmr.msra.gmra.mxu1 %v6770_v21 }
 0xc90   :  { %5509 = vmatprep.mubr.f32.mxu1 %v6754_v35  ;;  %5478 = vmatpush3.msra.mxu1 %v2506_v37 }
 0xc91   :  { %5479 = vmatprep.subr.mxu1 %v2505_v38 }
 0xc92   :  { %5480 = vmatpush3.msra.mxu1 %v2505_v38 }
 0xc93   :  { %5481 = vmatprep.subr.mxu1 %v2504_v39 }
 0xc94   :  { %5482 = vmatpush3.msra.mxu1 %v2504_v39 }
 0xc95   :  { %5483 = vmatprep.subr.mxu1 %v2503_v22 }
 0xc96   :  { %5484 = vmatpush3.msra.mxu1 %v2503_v22 }
 0xc97   :  { %5485 = vmatprep.subr.mxu1 %v2502_v40 }
 0xc98   :  { %5486 = vmatpush3.msra.mxu1 %v2502_v40 }
 0xc99   :  { %5487 = vmatprep.subr.mxu1 %v2501_v45 }
 0xc9a   :  { %5488 = vmatpush3.msra.mxu1 %v2501_v45 }
 0xc9b   :  { %5489 = vmatprep.subr.mxu1 %v2500_v46 }
 0xc9c   :  { %5490 = vmatpush3.msra.mxu1 %v2500_v46 }
 0xc9d   :  { %5491 = vmatprep.subr.mxu1 %v2499_v47 }
 0xc9e   :  { %5492 = vmatpush3.msra.mxu1 %v2499_v47 }
 0xc9f   :  { %5493 = vmatprep.subr.mxu1 %v2498_v48 }
 0xca0   :  { %5494 = vmatpush3.msra.mxu1 %v2498_v48 }
 0xca1   :  { %5495 = vmatprep.subr.mxu1 %v2497_v41 }
 0xca2   :  { %5496 = vmatpush3.msra.mxu1 %v2497_v41 }
 0xca3   :  { %5497 = vmatprep.subr.mxu1 %v2496_v44 }
 0xca4   :  { %5498 = vmatpush3.msra.mxu1 %v2496_v44 }
 0xca5   :  { %5499 = vmatprep.subr.mxu1 %v2495_v49 }
 0xca6   :  { %5500 = vmatpush3.msra.mxu1 %v2495_v49 }
 0xca7   :  { %5501 = vmatprep.subr.mxu1 %v2494_v50 }
 0xca8   :  { %5502 = vmatpush3.msra.mxu1 %v2494_v50 }
 0xca9   :  { %5503 = vmatprep.subr.mxu1 %v2493_v51 }
 0xcaa   :  { %5504 = vmatpush3.msra.mxu1 %v2493_v51 }
 0xcab   :  { %5505 = vmatprep.subr.mxu1 %v2492_v52 }
 0xcac   :  { %5506 = vmatpush3.msra.mxu1 %v2492_v52 }
 0xcad   :  { %5507 = vmatprep.subr.mxu1 %v2491_v53 }
 0xcae   :  { %5508 = vmatpush3.msra.mxu1 %v2491_v53 }
 0xcaf   :  { %5510 = vmatmul.mubr.f32.vlgmr.msra.gmra.mxu1 %v6756_v36  ;;  %5547 = vmatprep.subr.mxu1 %v6338_v34 }
 0xcb0   :  { %5549 = vmatprep.mubr.msk.f32.mxu1 %vm6339_vm0, %v6338_v34 }
 0xcb3   :  { %v5476_v23 = vpop.f32.mrf.mxu0 }
 0xcb4   :  { %v6774_v24 = vadd.f32 %v5476_v23, %v4884_v42 }
 0xcb5   :  { %v2678_v25 = vpop.f32.mrf.mxu0 }
 0xcb6   :  { %v6776_v28 = vadd.f32 %v4884_v42, %v2678_v25 }
 0xcb8   :  { %5513 = vmatpush3.xpose.msk.msra.mxu0 %vm733_vm1, %v6776_v28 }
 0xcb9   :  { %5517 = vmatprep.subr.mxu0 %v6338_v34 }
 0xd4f   :  { %v5441_v0 = vpop.f32.mrf.mxu1 }
 0xd50   :  { %v6791_v35 = vadd.f32 %v5441_v0, %v4883_v29 }
 0xd51   :  { %v2597_v30 = vpop.f32.mrf.mxu1 }
 0xd52   :  { %v6781_v31 = vadd.f32 %v4883_v29, %v2597_v30 }
 0xd54   :  { %3092 = vrot.lane.b32.xlu1 %v6781_v31, %s6340_s27  ;;  %5515 = vmatmul.mubr.msk.f32.vlgmr.msra.gmra.mxu0 %vm733_vm1, %v6781_v31 }
 0xd55   :  { %5518 = vmatpush3.xpose.msk.msra.mxu0 %vm733_vm1, %v6774_v24  ;;  %5519 = vmatprep.mubr.msk.f32.mxu0 %vm6339_vm0, %v6338_v34 }
 0xd56   :  { %5522 = vmatprep.subr.mxu0 %v6338_v34 }
 0xd58   :  { %3172 = vrot.lane.b32.xlu1 %v6774_v24, %s6340_s27  ;;  %5520 = vmatmul.mubr.msk.f32.vlgmr.msra.gmra.mxu0 %vm733_vm1, %v6791_v35 }
 0xd59   :  { %5524 = vmatprep.mubr.msk.f32.mxu0 %vm6339_vm0, %v6338_v34 }
 0xd6f   :  { %v5511_v7 = vpop.f32.mrf.mxu1 }
 0xd70   :  { %v6812_v20 = vadd.f32 %v5511_v7, %v4885_v8 }
 0xd71   :  { %v2759_v9 = vpop.f32.mrf.mxu1 }
 0xd72   :  { %v6814_v10 = vadd.f32 %v4885_v8, %v2759_v9 }
 0xd74   :  { %5523 = vmatpush3.msra.mxu0 %v6814_v10 }
 0xd75   :  { %5527 = vmatprep.subr.mxu0 %v6338_v34 }
 0xdc6   :  { %v3093_v11 = vpop.permute.xlu1 %3092 }
 0xdca   :  { %v3173_v12 = vpop.permute.xlu1 %3172 }
 0xe14   :  { %v2840_v43 = vpop.f32.mrf.mxu0 }
 0xe15   :  { %v2920_v55 = vmul.f32 0.17677669, %v2840_v43 }
 0xe16   :  { %v5516_v56 = vpop.f32.mrf.mxu0 }
 0xe17   :  { %v2922_v57 = vadd.f32 %v2920_v55, %v6804_v54 }
 0xe18   :  { %v2916_v58 = vpop.f32.mrf.mxu0 }
 0xe19   :  { %v2921_v59 = vmul.f32 0.17677669, %v2916_v58  ;;  %v2924_v60 = vsel %vm890_vm2, %v2922_v57, -inf  ;;  %v2511_v58 = vld [vmem:[#allocation31 + $0x18] sm:$0xff] }
 0xe1a   :  { %2925 = vmax.xlane.f32.xlu0 %v2924_v60  ;;  %v5521_v61 = vpop.f32.mrf.mxu0 }
 0xe1b   :  { %v2923_v36 = vadd.f32 %v2921_v59, %v6804_v54  ;;  %v2515_v61 = vld [vmem:[#allocation31 + $0x38] sm:$0xff] }
 0xe1d   :  { %v2927_v26 = vsel %vm890_vm2, %v2923_v36, -inf }
 0xe1e   :  { %2928 = vmax.xlane.f32.xlu0 %v2927_v26 }
 0xea3   :  { %v2926_v63 = vpop.xlane.xlu0 %2925 }
 0xea4   :  { %v2930_v27 = vsub.f32 %v2922_v57, %v2926_v63 }
 0xea6   :  { %v2932_v1 = vmul.f32 1.442695, %v2930_v27  ;;  %v2514_v27 = vld [vmem:[#allocation31 + $0x30] sm:$0xff] }
 0xea7   :  { %v2929_v2 = vpop.xlane.xlu0 %2928 }
 0xea8   :  { %5735 = vpow2.f32 %v2932_v1  ;;  %v2931_v33 = vsub.f32 %v2923_v36, %v2929_v2 }
 0xeaa   :  { %v2934_v3 = vmul.f32 1.442695, %v2931_v33  ;;  %v2510_v33 = vld [vmem:[#allocation31 + $0x10] sm:$0xff] }
 0xeac   :  { %5737 = vpow2.f32 %v2934_v3  ;;  %v2508_v3 = vld [vmem:[#allocation31] sm:$0xff] }
 0xeb5   :  { %v5736_v32 = vpop.eup %5735 }
 0xeb6   :  { %v2936_v4 = vsel %vm890_vm2, %v5736_v32, 0.0 }
 0xeb7   :  { %2937 = vadd.xlane.f32.xlu0 %v2936_v4 }
 0xeb9   :  { %v5738_v5 = vpop.eup %5737 }
 0xeba   :  { %v2939_v6 = vsel %vm890_vm2, %v5738_v5, 0.0 }
 0xebb   :  { %2940 = vadd.xlane.f32.xlu1 %v2939_v6  ;;  %v2512_v6 = vld [vmem:[#allocation31 + $0x20] sm:$0xff] }
 0xecc   :  { %3170 = vrot.lane.b32.xlu1 %v6791_v35, %s6340_s27 }
 0xecd   :  { %3094 = vrot.lane.b32.xlu0 %v6776_v28, %s6340_s27 }
 0xf40   :  { %v2938_v13 = vpop.xlane.xlu0 %2937 }
 0xf41   :  { %5739 = vrcp.f32 %v2938_v13 }
 0xf44   :  { %v2941_v14 = vpop.xlane.xlu1 %2940  ;;  %v3095_v19 = vpop.permute.xlu0 %3094 }
 0xf45   :  { %5741 = vrcp.f32 %v2941_v14 }
 0xf48   :  { %v3171_v42 = vpop.permute.xlu1 %3170 }
 0xf4e   :  { %v5740_v15 = vpop.eup %5739 }
 0xf4f   :  { %v2944_v62 = vmul.f32 %v5740_v15, %v5736_v32 }
 0xf51   :  { %5525 = vmatmul.mubr.msk.f32.vlgmr.msra.gmra.mxu0 %vm890_vm2, %v2944_v62 }
 0xf52   :  { %v5742_v16 = vpop.eup %5741  ;;  %5528 = vmatpush3.msra.mxu0 %v6812_v20  ;;  %5529 = vmatprep.mubr.msk.f32.mxu0 %vm6339_vm0, %v6338_v34 }
 0xf53   :  { %5532 = vmatprep.subr.mxu0 %v6338_v34  ;;  %v2945_v18 = vmul.f32 %v5742_v16, %v5738_v5  ;;  %v2513_v5 = vld [vmem:[#allocation31 + $0x28] sm:$0xff] }
 0xf55   :  { %5530 = vmatmul.mubr.msk.f32.vlgmr.msra.gmra.mxu0 %vm890_vm2, %v2945_v18 }
 0xf56   :  { %5533 = vmatpush3.xpose.msk.msra.mxu0 %vm733_vm1, %v3095_v19  ;;  %5534 = vmatprep.mubr.msk.f32.mxu0 %vm6339_vm0, %v6338_v34 }
 0xf57   :  { %5537 = vmatprep.subr.mxu0 %v6338_v34 }
 0xf59   :  { %5535 = vmatmul.mubr.msk.f32.vlgmr.msra.gmra.mxu0 %vm733_vm1, %v3093_v11 }
 0xf5a   :  { %5538 = vmatpush3.xpose.msk.msra.mxu0 %vm733_vm1, %v3173_v12  ;;  %5539 = vmatprep.mubr.msk.f32.mxu0 %vm6339_vm0, %v6338_v34 }
 0xf5b   :  { %5542 = vmatprep.subr.mxu0 %v6338_v34 }
 0xf5d   :  { %5540 = vmatmul.mubr.msk.f32.vlgmr.msra.gmra.mxu0 %vm733_vm1, %v3171_v42 }
 0xf5e   :  { %5544 = vmatprep.mubr.msk.f32.mxu0 %vm6339_vm0, %v6338_v34 }
0x1011   :  { %v3015_v23 = vpop.f32.mrf.mxu0 }
0x1013   :  { %v5526_v25 = vpop.f32.mrf.mxu0 }
0x1015   :  { %v6840_v0 = vpop.f32.mrf.mxu0 }
0x1017   :  { %v5531_v29 = vpop.f32.mrf.mxu0 }
0x1019   :  { %v3166_v30 = vpop.f32.mrf.mxu0 }
0x101a   :  { %v3248_v37 = vmul.f32 0.17677669, %v3166_v30 }
0x101b   :  { %v5536_v38 = vpop.f32.mrf.mxu0 }
0x101c   :  { %v3250_v39 = vadd.f32 %v3248_v37, %v6804_v54 }
0x101d   :  { %v3244_v22 = vpop.f32.mrf.mxu0 }
0x101e   :  { %v3249_v40 = vmul.f32 0.17677669, %v3244_v22  ;;  %v3252_v45 = vsel %vm890_vm2, %v3250_v39, -inf }
0x101f   :  { %3253 = vmax.xlane.f32.xlu0 %v3252_v45  ;;  %v5541_v46 = vpop.f32.mrf.mxu0 }
0x1020   :  { %v3251_v47 = vadd.f32 %v3249_v40, %v6804_v54 }
0x1022   :  { %v3255_v48 = vsel %vm890_vm2, %v3251_v47, -inf }
0x1023   :  { %3256 = vmax.xlane.f32.xlu1 %v3255_v48 }
0x1034   :  { %3352 = vrot.lane.b32.xlu1 %v6812_v20, %s6340_s27 }
0x1038   :  { %3670 = vrot.lane.b32.xlu1 %v6774_v24, %s6341_s1 }
0x103c   :  { %3668 = vrot.lane.b32.xlu1 %v6791_v35, %s6341_s1 }
0x1040   :  { %3590 = vrot.lane.b32.xlu1 %v6781_v31, %s6341_s1 }
0x1044   :  { %4009 = vrot.lane.b32.xlu1 %v6776_v28, %s6342_s20 }
0x10a8   :  { %v3254_v41 = vpop.xlane.xlu0 %3253 }
0x10a9   :  { %v3258_v44 = vsub.f32 %v3250_v39, %v3254_v41 }
0x10ab   :  { %v3260_v49 = vmul.f32 1.442695, %v3258_v44 }
0x10ac   :  { %v3257_v50 = vpop.xlane.xlu1 %3256 }
0x10ad   :  { %5743 = vpow2.f32 %v3260_v49  ;;  %v3259_v51 = vsub.f32 %v3251_v47, %v3257_v50 }
0x10af   :  { %v3262_v52 = vmul.f32 1.442695, %v3259_v51 }
0x10b0   :  { %v3353_v53 = vpop.permute.xlu1 %3352 }
0x10b1   :  { %5745 = vpow2.f32 %v3262_v52  ;;  %5548 = vmatpush3.msra.mxu1 %v3353_v53 }
0x10b2   :  { %5563 = vmatprep.subr.mxu1 %v2511_v58 }
0x10b4   :  { %v3671_v32 = vpop.permute.xlu1 %3670 }
0x10b8   :  { %v3669_v4 = vpop.permute.xlu1 %3668 }
0x10ba   :  { %v5744_v43 = vpop.eup %5743 }
0x10bb   :  { %v3264_v55 = vsel %vm890_vm2, %v5744_v43, 0.0 }
0x10bc   :  { %3265 = vadd.xlane.f32.xlu0 %v3264_v55  ;;  %v3591_v13 = vpop.permute.xlu1 %3590 }
0x10be   :  { %v5746_v56 = vpop.eup %5745 }
0x10bf   :  { %v3267_v57 = vsel %vm890_vm2, %v5746_v56, 0.0 }
0x10c0   :  { %3268 = vadd.xlane.f32.xlu0 %v3267_v57  ;;  %v4010_v46 = vpop.permute.xlu1 %4009 }
0x10d6   :  { %3275 = vrot.lane.b32.xlu0 %v6814_v10, %s6340_s27 }
0x10da   :  { %3592 = vrot.lane.b32.xlu0 %v6776_v28, %s6341_s1  ;;  %v2509_v28 = vld [vmem:[#allocation31 + $0x8] sm:$0xff] }
0x1145   :  { %v3266_v59 = vpop.xlane.xlu0 %3265 }
0x1146   :  { %5747 = vrcp.f32 %v3266_v59 }
0x1149   :  { %v3269_v60 = vpop.xlane.xlu0 %3268 }
0x114a   :  { %5749 = vrcp.f32 %v3269_v60 }
0x114d   :  { %v3276_v36 = vpop.permute.xlu0 %3275 }
0x114e   :  { %5543 = vmatpush3.msra.mxu0 %v3276_v36 }
0x114f   :  { %5552 = vmatprep.subr.mxu0 %v2515_v61 }
0x1151   :  { %v3593_v11 = vpop.permute.xlu0 %3592 }
0x1153   :  { %v5748_v26 = vpop.eup %5747 }
0x1154   :  { %v3272_v63 = vmul.f32 %v5748_v26, %v5744_v43 }
0x1156   :  { %5545 = vmatmul.mubr.msk.f32.vlgmr.msra.gmra.mxu0 %vm890_vm2, %v3272_v63 }
0x1157   :  { %v5750_v1 = vpop.eup %5749  ;;  %5553 = vmatpush3.msra.mxu0 %v2515_v61 }
0x1158   :  { %v3273_v2 = vmul.f32 %v5750_v1, %v5746_v56  ;;  %5554 = vmatprep.subr.mxu0 %v2514_v27 }
0x1159   :  { %5555 = vmatpush3.msra.mxu0 %v2514_v27 }
0x115a   :  { %5550 = vmatmul.mubr.msk.f32.vlgmr.msra.gmra.mxu1 %vm890_vm2, %v3273_v2  ;;  %5556 = vmatprep.subr.mxu0 %v2513_v5 }
0x115b   :  { %5564 = vmatpush3.msra.mxu1 %v2511_v58  ;;  %5571 = vmatprep.mubr.msk.f32.mxu1 %vm733_vm1, %v3015_v23 }
0x115c   :  { %5565 = vmatprep.subr.mxu1 %v2510_v33  ;;  %5557 = vmatpush3.msra.mxu0 %v2513_v5  ;;  %v2517_v5 = vld [vmem:[#allocation31 + $0x48] sm:$0xff] }
0x115d   :  { %5566 = vmatpush3.msra.mxu1 %v2510_v33  ;;  %5558 = vmatprep.subr.mxu0 %v2512_v6 }
0x115e   :  { %5567 = vmatprep.subr.mxu1 %v2509_v28  ;;  %5559 = vmatpush3.msra.mxu0 %v2512_v6  ;;  %v2516_v6 = vld [vmem:[#allocation31 + $0x40] sm:$0xff] }
0x115f   :  { %5568 = vmatpush3.msra.mxu1 %v2509_v28  ;;  %5574 = vmatprep.subr.mxu0 %v6338_v34 }
0x1160   :  { %5569 = vmatprep.subr.mxu1 %v2508_v3 }
0x1161   :  { %5570 = vmatpush3.msra.mxu1 %v2508_v3 }
0x1162   :  { %5572 = vmatmul.mubr.msk.f32.vlgmr.msra.gmra.mxu1 %vm733_vm1, %v6840_v0  ;;  %5579 = vmatprep.subr.mxu1 %v6338_v34 }
0x1163   :  { %5580 = vmatpush3.xpose.msk.msra.mxu1 %vm733_vm1, %v3671_v32  ;;  %5581 = vmatprep.mubr.msk.f32.mxu1 %vm6339_vm0, %v6338_v34  ;;  %v2519_v32 = vld [vmem:[#allocation31 + $0x58] sm:$0xff] }
0x1164   :  { %5589 = vmatprep.subr.mxu1 %v6338_v34 }
0x1166   :  { %5582 = vmatmul.mubr.msk.f32.vlgmr.msra.gmra.mxu1 %vm733_vm1, %v3669_v4  ;;  %v2518_v4 = vld [vmem:[#allocation31 + $0x50] sm:$0xff] }
0x1167   :  { %5591 = vmatprep.mubr.msk.f32.mxu1 %vm6339_vm0, %v6338_v34 }
0x1216   :  { %v3347_v7 = vpop.f32.mrf.mxu0 }
0x1217   :  { %5560 = vmatprep.mubr.msk.f32.mxu0 %vm733_vm1, %v3347_v7 }
0x1218   :  { %v5546_v8 = vpop.f32.mrf.mxu0 }
0x121a   :  { %v3424_v9 = vpop.f32.mrf.mxu1 }
0x121b   :  { %5561 = vmatmul.mubr.msk.f32.vlgmr.msra.gmra.mxu0 %vm733_vm1, %v3424_v9 }
0x121c   :  { %5575 = vmatpush3.xpose.msk.msra.mxu0 %vm733_vm1, %v3593_v11  ;;  %v5551_v12 = vpop.f32.mrf.mxu1  ;;  %5576 = vmatprep.mubr.msk.f32.mxu0 %vm6339_vm0, %v6338_v34 }
0x121d   :  { %5584 = vmatprep.subr.mxu0 %v6338_v34 }
0x121f   :  { %5577 = vmatmul.mubr.msk.f32.vlgmr.msra.gmra.mxu0 %vm733_vm1, %v3591_v13 }
0x1220   :  { %5586 = vmatprep.mubr.msk.f32.mxu0 %vm6339_vm0, %v6338_v34 }
0x1222   :  { %v6885_v14 = vpop.f32.mrf.mxu1 }
0x1224   :  { %v6887_v15 = vpop.f32.mrf.mxu1 }
0x1226   :  { %v3742_v62 = vpop.f32.mrf.mxu1 }
0x1227   :  { %v3747_v16 = vmul.f32 0.17677669, %v3742_v62 }
0x1228   :  { %v5583_v18 = vpop.f32.mrf.mxu1 }
0x1229   :  { %v3749_v19 = vadd.f32 %v3747_v16, %v6804_v54 }
0x122b   :  { %v3753_v42 = vsel %vm890_vm2, %v3749_v19, -inf }
0x122c   :  { %3754 = vmax.xlane.f32.xlu0 %v3753_v42 }
0x1242   :  { %3848 = vrot.lane.b32.xlu0 %v6812_v20, %s6341_s1 }
0x1246   :  { %4007 = vrot.lane.b32.xlu0 %v6781_v31, %s6342_s20 }
0x124a   :  { %4085 = vrot.lane.b32.xlu0 %v6791_v35, %s6342_s20 }
0x12b5   :  { %v3755_v23 = vpop.xlane.xlu0 %3754 }
0x12b6   :  { %v3757_v25 = vsub.f32 %v3749_v19, %v3755_v23 }
0x12b8   :  { %v3760_v0 = vmul.f32 1.442695, %v3757_v25 }
0x12b9   :  { %v3849_v29 = vpop.permute.xlu0 %3848 }
0x12ba   :  { %5751 = vpow2.f32 %v3760_v0  ;;  %5590 = vmatpush3.msra.mxu1 %v3849_v29  ;;  %v2523_v0 = vld [vmem:[#allocation31 + $0x78] sm:$0xff] }
0x12bb   :  { %5605 = vmatprep.subr.mxu1 %v6338_v34 }
0x12c7   :  { %v5752_v30 = vpop.eup %5751 }
0x12c8   :  { %v3765_v37 = vsel %vm890_vm2, %v5752_v30, 0.0 }
0x12c9   :  { %3766 = vadd.xlane.f32.xlu1 %v3765_v37 }
0x12da   :  { %4087 = vrot.lane.b32.xlu1 %v6774_v24, %s6342_s20  ;;  %v4008_v24 = vpop.permute.xlu0 %4007 }
0x12db   :  { %v6901_v38 = vpop.f32.mrf.mxu0 }
0x12dd   :  { %v6903_v31 = vpop.f32.mrf.mxu0 }
0x12de   :  { %v4086_v49 = vpop.permute.xlu0 %4085 }
0x12df   :  { %v3664_v35 = vpop.f32.mrf.mxu0 }
0x12e0   :  { %v3746_v22 = vmul.f32 0.17677669, %v3664_v35 }
0x12e1   :  { %v5578_v39 = vpop.f32.mrf.mxu0 }
0x12e2   :  { %v3748_v40 = vadd.f32 %v3746_v22, %v6804_v54  ;;  %v2521_v22 = vld [vmem:[#allocation31 + $0x68] sm:$0xff] }
0x12e4   :  { %v3750_v45 = vsel %vm890_vm2, %v3748_v40, -inf }
0x12fe   :  { %3751 = vmax.xlane.f32.xlu1 %v3750_v45  ;;  %v3587_v45 = vadd.f32 %v6885_v14, %v6901_v38  ;;  %v4918_v14 = vld [vmem:[#allocation32] ss:$0 sm:$0xff] }
0x1352   :  { %v3767_v47 = vpop.xlane.xlu1 %3766 }
0x1353   :  { %5753 = vrcp.f32 %v3767_v47 }
0x1356   :  { %v4088_v44 = vpop.permute.xlu1 %4087 }
0x1360   :  { %v5754_v48 = vpop.eup %5753 }
0x1361   :  { %v3771_v41 = vmul.f32 %v5754_v48, %v5752_v30 }
0x1363   :  { %5592 = vmatmul.mubr.msk.f32.vlgmr.msra.gmra.mxu1 %vm890_vm2, %v3771_v41 }
0x1364   :  { %5606 = vmatpush3.xpose.msk.msra.mxu1 %vm733_vm1, %v4010_v46  ;;  %5607 = vmatprep.mubr.msk.f32.mxu1 %vm6339_vm0, %v6338_v34 }
0x1365   :  { %5610 = vmatprep.subr.mxu1 %v6338_v34 }
0x1367   :  { %5608 = vmatmul.mubr.msk.f32.vlgmr.msra.gmra.mxu1 %vm733_vm1, %v4008_v24 }
0x1368   :  { %5611 = vmatpush3.xpose.msk.msra.mxu1 %vm733_vm1, %v4088_v44  ;;  %5612 = vmatprep.mubr.msk.f32.mxu1 %vm6339_vm0, %v6338_v34 }
0x1369   :  { %5620 = vmatprep.subr.mxu1 %v6338_v34 }
0x136b   :  { %5613 = vmatmul.mubr.msk.f32.vlgmr.msra.gmra.mxu1 %vm733_vm1, %v4086_v49 }
0x136c   :  { %5622 = vmatprep.mubr.msk.f32.mxu1 %vm6339_vm0, %v6338_v34 }
0x1387   :  { %v3752_v50 = vpop.xlane.xlu1 %3751 }
0x1388   :  { %v3756_v51 = vsub.f32 %v3748_v40, %v3752_v50  ;;  %v2520_v40 = vld [vmem:[#allocation31 + $0x60] sm:$0xff]  ;;  %v3582_v50 = vadd.f32 %v6887_v15, %v6903_v31 }
0x1389   :  { %v4521_v31 = vld [vmem:[#allocation35 + $0xf8] sm:$0xff] }
0x138a   :  { %v3758_v52 = vmul.f32 1.442695, %v3756_v51 }
0x138c   :  { %5755 = vpow2.f32 %v3758_v52 }
0x1399   :  { %v5756_v53 = vpop.eup %5755 }
0x139a   :  { %v3762_v43 = vsel %vm890_vm2, %v5756_v53, 0.0 }
0x139b   :  { %3763 = vadd.xlane.f32.xlu0 %v3762_v43 }
0x13b1   :  { %3772 = vrot.lane.b32.xlu0 %v6814_v10, %s6341_s1 }
0x13b5   :  { %4265 = vrot.lane.b32.xlu0 %v6812_v20, %s6342_s20 }
0x1423   :  { %v3920_v55 = vpop.f32.mrf.mxu1 }
0x1424   :  { %v3764_v56 = vpop.xlane.xlu0 %3763 }
0x1425   :  { %5757 = vrcp.f32 %v3764_v56  ;;  %v5593_v57 = vpop.f32.mrf.mxu1 }
0x1427   :  { %v4081_v58 = vpop.f32.mrf.mxu1 }
0x1428   :  { %v4163_v59 = vmul.f32 0.17677669, %v4081_v58  ;;  %v3773_v60 = vpop.permute.xlu0 %3772 }
0x1429   :  { %5585 = vmatpush3.msra.mxu0 %v3773_v60  ;;  %v5609_v61 = vpop.f32.mrf.mxu1  ;;  %v4520_v60 = vld [vmem:[#allocation35 + $0xf0] sm:$0xff] }
0x142a   :  { %v4165_v36 = vadd.f32 %v4163_v59, %v6804_v54  ;;  %5594 = vmatprep.subr.mxu0 %v2519_v32  ;;  %v4518_v61 = vld [vmem:[#allocation35 + $0xe0] sm:$0xff] }
0x142b   :  { %v4159_v26 = vpop.f32.mrf.mxu1 }
0x142c   :  { %v4164_v63 = vmul.f32 0.17677669, %v4159_v26  ;;  %v4266_v27 = vpop.permute.xlu0 %4265  ;;  %v4167_v1 = vsel %vm890_vm2, %v4165_v36, -inf  ;;  %v4516_v26 = vld [vmem:[#allocation35 + $0xd0] sm:$0xff] }
0x142d   :  { %v5614_v2 = vpop.f32.mrf.mxu1  ;;  %4168 = vmax.xlane.f32.xlu1 %v4167_v1  ;;  %5621 = vmatpush3.msra.mxu1 %v4266_v27  ;;  %v4513_v27 = vld [vmem:[#allocation35 + $0xb8] sm:$0xff]  ;;  %v4512_v1 = vld [vmem:[#allocation35 + $0xb0] sm:$0xff] }
0x142e   :  { %v4166_v20 = vadd.f32 %v4164_v63, %v6804_v54  ;;  %4534 = vmatprep.subr.mxu1 %v4521_v31  ;;  %v4514_v63 = vld [vmem:[#allocation35 + $0xc0] sm:$0xff]  ;;  %v4511_v2 = vld [vmem:[#allocation35 + $0xa8] sm:$0xff] }
0x1430   :  { %v4170_v33 = vsel %vm890_vm2, %v4166_v20, -inf }
0x1431   :  { %4171 = vmax.xlane.f32.xlu1 %v4170_v33  ;;  %v4509_v33 = vld [vmem:[#allocation35 + $0x98] sm:$0xff] }
0x1432   :  { %v5758_v28 = vpop.eup %5757 }
0x1433   :  { %v3770_v3 = vmul.f32 %v5758_v28, %v5756_v53  ;;  %v4508_v28 = vld [vmem:[#allocation35 + $0x90] sm:$0xff] }
0x1435   :  { %5587 = vmatmul.mubr.msk.f32.vlgmr.msra.gmra.mxu0 %vm890_vm2, %v3770_v3  ;;  %v4507_v3 = vld [vmem:[#allocation35 + $0x88] sm:$0xff] }
0x1436   :  { %5595 = vmatpush3.msra.mxu0 %v2519_v32  ;;  %v4506_v32 = vld [vmem:[#allocation35 + $0x80] sm:$0xff] }
0x1437   :  { %5596 = vmatprep.subr.mxu0 %v2518_v4 }
0x1438   :  { %5597 = vmatpush3.msra.mxu0 %v2518_v4  ;;  %v4505_v4 = vld [vmem:[#allocation35 + $0x78] sm:$0xff] }
0x1439   :  { %5598 = vmatprep.subr.mxu0 %v2517_v5 }
0x143a   :  { %5599 = vmatpush3.msra.mxu0 %v2517_v5  ;;  %v4504_v5 = vld [vmem:[#allocation35 + $0x70] sm:$0xff] }
0x143b   :  { %5600 = vmatprep.subr.mxu0 %v2516_v6 }
0x143c   :  { %5601 = vmatpush3.msra.mxu0 %v2516_v6  ;;  %v4503_v6 = vld [vmem:[#allocation35 + $0x68] sm:$0xff] }
0x143d   :  { %5615 = vmatprep.subr.mxu0 %v6338_v34 }
0x14b6   :  { %v4169_v54 = vpop.xlane.xlu1 %4168 }
0x14b7   :  { %v4173_v7 = vsub.f32 %v4165_v36, %v4169_v54  ;;  %v4517_v36 = vld [vmem:[#allocation35 + $0xd8] sm:$0xff]  ;;  %v4502_v54 = vld [vmem:[#allocation35 + $0x60] sm:$0xff] }
0x14b9   :  { %v4175_v8 = vmul.f32 1.442695, %v4173_v7  ;;  %v4501_v7 = vld [vmem:[#allocation35 + $0x58] sm:$0xff] }
0x14ba   :  { %v4172_v9 = vpop.xlane.xlu1 %4171 }
0x14bb   :  { %5759 = vpow2.f32 %v4175_v8  ;;  %v4174_v11 = vsub.f32 %v4166_v20, %v4172_v9  ;;  %v4510_v20 = vld [vmem:[#allocation35 + $0xa0] sm:$0xff]  ;;  %v4500_v8 = vld [vmem:[#allocation35 + $0x50] sm:$0xff]  ;;  %v4499_v9 = vld [vmem:[#allocation35 + $0x48] sm:$0xff] }
0x14bd   :  { %v4177_v12 = vmul.f32 1.442695, %v4174_v11  ;;  %v4498_v11 = vld [vmem:[#allocation35 + $0x40] sm:$0xff] }
0x14bf   :  { %5761 = vpow2.f32 %v4177_v12  ;;  %v4497_v12 = vld [vmem:[#allocation35 + $0x38] sm:$0xff] }
0x14c8   :  { %v5760_v13 = vpop.eup %5759 }
0x14c9   :  { %v4179_v62 = vsel %vm890_vm2, %v5760_v13, 0.0 }
0x14ca   :  { %4180 = vadd.xlane.f32.xlu1 %v4179_v62  ;;  %v4495_v62 = vld [vmem:[#allocation35 + $0x28] sm:$0xff] }
0x14cc   :  { %v5762_v16 = vpop.eup %5761 }
0x14cd   :  { %v4182_v18 = vsel %vm890_vm2, %v5762_v16, 0.0 }
0x14ce   :  { %4183 = vadd.xlane.f32.xlu1 %v4182_v18  ;;  %v4493_v18 = vld [vmem:[#allocation35 + $0x18] sm:$0xff] }
0x14df   :  { %4189 = vrot.lane.b32.xlu1 %v6814_v10, %s6342_s20  ;;  %v2522_v10 = vld [vmem:[#allocation31 + $0x70] sm:$0xff] }
0x14f5   :  { %v3844_v19 = vpop.f32.mrf.mxu0 }
0x14f6   :  { %5602 = vmatprep.mubr.msk.f32.mxu0 %vm733_vm1, %v3844_v19  ;;  %v4492_v19 = vld [vmem:[#allocation35 + $0x10] sm:$0xff] }
0x14f7   :  { %v5588_v42 = vpop.f32.mrf.mxu0  ;;  %5603 = vmatmul.mubr.msk.f32.vlgmr.msra.gmra.mxu0 %vm733_vm1, %v3920_v55 }
0x14f8   :  { %5617 = vmatprep.mubr.msk.f32.mxu0 %vm6339_vm0, %v6338_v34  ;;  %v4491_v42 = vld [vmem:[#allocation35 + $0x8] sm:$0xff] }
0x1553   :  { %v4181_v23 = vpop.xlane.xlu1 %4180 }
0x1554   :  { %5763 = vrcp.f32 %v4181_v23  ;;  %v4490_v23 = vld [vmem:[#allocation35] sm:$0xff] }
0x1557   :  { %v4184_v25 = vpop.xlane.xlu1 %4183 }
0x1558   :  { %5765 = vrcp.f32 %v4184_v25  ;;  %v4646_v25 = vld [vmem:[#allocation37 + $0xf8] sm:$0xff] }
0x155b   :  { %v4190_v29 = vpop.permute.xlu1 %4189 }
0x155c   :  { %5616 = vmatpush3.msra.mxu0 %v4190_v29  ;;  %v4645_v29 = vld [vmem:[#allocation37 + $0xf0] sm:$0xff] }
0x155d   :  { %5625 = vmatprep.subr.mxu0 %v2523_v0 }
0x1561   :  { %v5764_v30 = vpop.eup %5763 }
0x1562   :  { %v4187_v37 = vmul.f32 %v5764_v30, %v5760_v13  ;;  %v4496_v13 = vld [vmem:[#allocation35 + $0x30] sm:$0xff] }
0x1563   :  { %v4629_v30 = vld [vmem:[#allocation37 + $0x70] sm:$0xff] }
0x1564   :  { %5618 = vmatmul.mubr.msk.f32.vlgmr.msra.gmra.mxu0 %vm890_vm2, %v4187_v37  ;;  %v4644_v37 = vld [vmem:[#allocation37 + $0xe8] sm:$0xff] }
0x1565   :  { %v5766_v35 = vpop.eup %5765  ;;  %5626 = vmatpush3.msra.mxu0 %v2523_v0  ;;  %v4630_v0 = vld [vmem:[#allocation37 + $0x78] sm:$0xff] }
0x1566   :  { %v4188_v39 = vmul.f32 %v5766_v35, %v5762_v16  ;;  %5627 = vmatprep.subr.mxu0 %v2522_v10  ;;  %v4494_v16 = vld [vmem:[#allocation35 + $0x20] sm:$0xff] }
0x1567   :  { %5628 = vmatpush3.msra.mxu0 %v2522_v10  ;;  %v4628_v10 = vld [vmem:[#allocation37 + $0x68] sm:$0xff]  ;;  %v4643_v35 = vld [vmem:[#allocation37 + $0xe0] sm:$0xff] }
0x1568   :  { %5623 = vmatmul.mubr.msk.f32.vlgmr.msra.gmra.mxu1 %vm890_vm2, %v4188_v39  ;;  %5629 = vmatprep.subr.mxu0 %v2521_v22  ;;  %v4627_v39 = vld [vmem:[#allocation37 + $0x60] sm:$0xff] }
0x1569   :  { %4598 = vmatprep.mubr.f32.mxu1 %v6338_v34  ;;  %5630 = vmatpush3.msra.mxu0 %v2521_v22  ;;  %v4642_v22 = vld [vmem:[#allocation37 + $0xd8] sm:$0xff] }
0x156a   :  { %5631 = vmatprep.subr.mxu0 %v2520_v40  ;;  %4535 = vmatpush1.msra.mxu1 %v4520_v60 }
0x156b   :  { %5632 = vmatpush3.msra.mxu0 %v2520_v40  ;;  %v4626_v40 = vld [vmem:[#allocation37 + $0x58] sm:$0xff] }
0x156c   :  { %5140 = vmatprep.subr.mxu0 %v4646_v25 }
0x15b7   :  { %v5604_v46 = vpop.f32.mrf.mxu0 }
0x15b8   :  { %v4006_v47 = vadd.f32 %v5604_v46, %v3587_v45  ;;  %v4641_v45 = vld [vmem:[#allocation37 + $0xd0] sm:$0xff] }
0x15b9   :  { %v3996_v48 = vpop.f32.mrf.mxu0  ;;  %v4625_v46 = vld [vmem:[#allocation37 + $0x50] sm:$0xff] }
0x15ba   :  { %v4005_v52 = vadd.f32 %v3996_v48, %v3582_v50  ;;  %v4624_v48 = vld [vmem:[#allocation37 + $0x48] sm:$0xff]  ;;  %v4637_v50 = vld [vmem:[#allocation37 + $0xb0] sm:$0xff] }
0x1624   :  { %v4261_v41 = vpop.f32.mrf.mxu0 }
0x1625   :  { %5633 = vmatprep.mubr.msk.f32.mxu0 %vm733_vm1, %v4261_v41  ;;  %v4639_v41 = vld [vmem:[#allocation37 + $0xc0] sm:$0xff] }
0x1626   :  { %v5619_v24 = vpop.f32.mrf.mxu0 }
0x1627   :  { %v4623_v24 = vld [vmem:[#allocation37 + $0x40] sm:$0xff] }
0x1628   :  { %v4337_v44 = vpop.f32.mrf.mxu1 }
0x1629   :  { %5634 = vmatmul.mubr.msk.f32.vlgmr.msra.gmra.mxu0 %vm733_vm1, %v4337_v44  ;;  %v4638_v44 = vld [vmem:[#allocation37 + $0xb8] sm:$0xff] }
0x162a   :  { %v5624_v49 = vpop.f32.mrf.mxu1  ;;  %5141 = vmatpush3.msra.mxu0 %v4630_v0 }
0x162b   :  { %5142 = vmatprep.subr.mxu0 %v4645_v29  ;;  %v4622_v49 = vld [vmem:[#allocation37 + $0x38] sm:$0xff] }
0x162c   :  { %5143 = vmatpush3.msra.mxu0 %v4629_v30  ;;  %v4434_v30 = vld [vmem:[%s6996_s4] sm:$0xff] }
0x162d   :  { %5144 = vmatprep.subr.mxu0 %v4644_v37 }
0x162e   :  { %5145 = vmatpush3.msra.mxu0 %v4628_v10  ;;  %v4435_v10 = vld [vmem:[%s6997_s3] sm:$0xff] }
0x162f   :  { %5146 = vmatprep.subr.mxu0 %v4643_v35 }
0x1630   :  { %5147 = vmatpush3.msra.mxu0 %v4627_v39 }
0x1631   :  { %5148 = vmatprep.subr.mxu0 %v4642_v22 }
0x1632   :  { %5149 = vmatpush3.msra.mxu0 %v4626_v40 }
0x1633   :  { %5150 = vmatprep.subr.mxu0 %v4641_v45 }
0x1634   :  { %5151 = vmatpush3.msra.mxu0 %v4625_v46 }
0x16e9   :  { %v5635_v51 = vpop.f32.mrf.mxu0 }
0x16ea   :  { %v4423_v43 = vadd.f32 %v5635_v51, %v4006_v47  ;;  %v4640_v47 = vld [vmem:[#allocation37 + $0xc8] sm:$0xff]  ;;  %v4621_v51 = vld [vmem:[#allocation37 + $0x30] sm:$0xff] }
0x16eb   :  { %v4413_v53 = vpop.f32.mrf.mxu0  ;;  %5152 = vmatprep.subr.mxu0 %v4640_v47 }
0x16ec   :  { %v4422_v55 = vadd.f32 %v4413_v53, %v4005_v52  ;;  %v4431_v56 = vadd.f32 %v4918_v14, %v4423_v43  ;;  %5153 = vmatpush3.msra.mxu0 %v4624_v48  ;;  %v4636_v52 = vld [vmem:[#allocation37 + $0xa8] sm:$0xff]  ;;  %v4635_v43 = vld [vmem:[#allocation37 + $0xa0] sm:$0xff]  ;;  %v4634_v48 = vld [vmem:[#allocation37 + $0x98] sm:$0xff] }
0x16ed   :  { %5154 = vmatprep.subr.mxu0 %v4639_v41  ;;  %v4620_v53 = vld [vmem:[#allocation37 + $0x28] sm:$0xff]  ;;  %v4618_v41 = vld [vmem:[#allocation37 + $0x18] sm:$0xff] }
0x16ee   :  { %v4430_v38 = vadd.f32 %v4918_v14, %v4422_v55  ;;  %v6955_v59 = vadd.f32 %v4431_v56, %v6770_v21  ;;  %v4515_v21 = vld [vmem:[#allocation35 + $0xc8] sm:$0xff]  ;;  %5155 = vmatpush3.msra.mxu0 %v4623_v24  ;;  %v4619_v55 = vld [vmem:[#allocation37 + $0x20] sm:$0xff]  ;;  %v4617_v24 = vld [vmem:[#allocation37 + $0x10] sm:$0xff] }
0x16ef   :  { %5156 = vmatprep.subr.mxu0 %v4638_v44  ;;  %v4632_v44 = vld [vmem:[#allocation37 + $0x88] sm:$0xff] }
0x16f0   :  { %v6949_v57 = vadd.f32 %v4430_v38, %v6767_v17  ;;  %v4455_v15 = vmul.f32 %v6955_v59, %v6955_v59  ;;  %v4519_v17 = vld [vmem:[#allocation35 + $0xe8] sm:$0xff]  ;;  %5157 = vmatpush3.msra.mxu0 %v4622_v49  ;;  %v4631_v49 = vld [vmem:[#allocation37 + $0x80] sm:$0xff] }
0x16f1   :  { %4536 = vmatprep.subr.mxu1 %v4519_v17  ;;  %5158 = vmatprep.subr.mxu0 %v4637_v50  ;;  %v4524_v50 = vlaneseq }
0x16f2   :  { %4436 = vadd.xlane.f32.xlu0 %v6949_v57  ;;  %v4454_v58 = vmul.f32 %v6949_v57, %v6949_v57  ;;  %4537 = vmatpush1.msra.mxu1 %v4518_v61 }
0x16f3   :  { %4538 = vmatprep.subr.mxu1 %v4517_v36  ;;  %5159 = vmatpush3.msra.mxu0 %v4621_v51  ;;  %v4525_v51 = vshrl.u32 %v4524_v50, 7 }
0x16f4   :  { %4456 = vadd.xlane.f32.xlu1 %v4454_v58  ;;  %4539 = vmatpush1.msra.mxu1 %v4516_v26 }
0x16f5   :  { %4540 = vmatprep.subr.mxu1 %v4515_v21  ;;  %5160 = vmatprep.subr.mxu0 %v4636_v52  ;;  %v4526_v52 = vsub.s32 0, %v4525_v51 }
0x16f6   :  { %4438 = vadd.xlane.f32.xlu0 %v6955_v59  ;;  %4541 = vmatpush1.msra.mxu1 %v4514_v63 }
0x16f7   :  { %4542 = vmatprep.subr.mxu1 %v4513_v27  ;;  %5161 = vmatpush3.msra.mxu0 %v4620_v53  ;;  %v4522_v53 = vld [vmem:[%s6487_s8] sm:$0x3]  ;;  %s6998_s8 = sld [smem:[#allocation63_spill]] }
0x16f8   :  { %4543 = vmatpush1.msra.mxu1 %v4512_v1  ;;  %5162 = vmatprep.subr.mxu0 %v4635_v43  ;;  %v4530_v43 = vsub.s32 1, %v4525_v51 }
0x16f9   :  { %4544 = vmatprep.subr.mxu1 %v4511_v2  ;;  %5163 = vmatpush3.msra.mxu0 %v4619_v55  ;;  %v4527_v55 = vrot.slane %v4522_v53, %v4526_v52 }
0x16fa   :  { %4458 = vadd.xlane.f32.xlu0 %v4455_v15  ;;  %4545 = vmatpush1.msra.mxu1 %v4510_v20 }
0x16fb   :  { %4546 = vmatprep.subr.mxu1 %v4509_v33  ;;  %5164 = vmatprep.subr.mxu0 %v4634_v48 }
0x16fc   :  { %4547 = vmatpush1.msra.mxu1 %v4508_v28  ;;  %5165 = vmatpush3.msra.mxu0 %v4618_v41 }
0x16fd   :  { %4548 = vmatprep.subr.mxu1 %v4507_v3 }
0x16fe   :  { %4549 = vmatpush1.msra.mxu1 %v4506_v32 }
0x16ff   :  { %4550 = vmatprep.subr.mxu1 %v4505_v4 }
0x1700   :  { %4551 = vmatpush1.msra.mxu1 %v4504_v5 }
0x1701   :  { %4552 = vmatprep.subr.mxu1 %v4503_v6 }
0x1702   :  { %4553 = vmatpush1.msra.mxu1 %v4502_v54 }
0x1703   :  { %4554 = vmatprep.subr.mxu1 %v4501_v7 }
0x1704   :  { %4555 = vmatpush1.msra.mxu1 %v4500_v8 }
0x1705   :  { %4556 = vmatprep.subr.mxu1 %v4499_v9 }
0x1706   :  { %4557 = vmatpush1.msra.mxu1 %v4498_v11 }
0x1707   :  { %4558 = vmatprep.subr.mxu1 %v4497_v12 }
0x1708   :  { %4559 = vmatpush1.msra.mxu1 %v4496_v13 }
0x1709   :  { %4560 = vmatprep.subr.mxu1 %v4495_v62 }
0x170a   :  { %4561 = vmatpush1.msra.mxu1 %v4494_v16 }
0x170b   :  { %4562 = vmatprep.subr.mxu1 %v4493_v18 }
0x170c   :  { %4563 = vmatpush1.msra.mxu1 %v4492_v19 }
0x170d   :  { %4564 = vmatprep.subr.mxu1 %v4491_v42 }
0x170e   :  { %4565 = vmatpush1.msra.mxu1 %v4490_v23 }
0x177b   :  { %v4437_v14 = vpop.xlane.xlu0 %4436 }
0x177c   :  { %v4440_v38 = vrot.slane %v4437_v14, 4 }
0x177d   :  { %v4457_v56 = vpop.xlane.xlu1 %4456 }
0x177e   :  { %v4441_v58 = vadd.f32 %v4440_v38, %v4437_v14  ;;  %v4460_v15 = vrot.slane %v4457_v56, 4  ;;  %v4531_v14 = vrot.slane %v4522_v53, %v4530_v43 }
0x177f   :  { %v4439_v31 = vpop.xlane.xlu0 %4438 }
0x1780   :  { %v4442_v60 = vrot.slane %v4441_v58, 2  ;;  %v4461_v17 = vadd.f32 %v4460_v15, %v4457_v56  ;;  %v4446_v61 = vrot.slane %v4439_v31, 4 }
0x1782   :  { %v4443_v36 = vadd.f32 %v4442_v60, %v4441_v58  ;;  %v4462_v26 = vrot.slane %v4461_v17, 2  ;;  %v4447_v21 = vadd.f32 %v4446_v61, %v4439_v31 }
0x1783   :  { %v4459_v63 = vpop.xlane.xlu0 %4458 }
0x1784   :  { %v4444_v27 = vrot.slane %v4443_v36, 1  ;;  %v4463_v1 = vadd.f32 %v4462_v26, %v4461_v17  ;;  %v4448_v2 = vrot.slane %v4447_v21, 2  ;;  %v4466_v20 = vrot.slane %v4459_v63, 4 }
0x1786   :  { %v4445_v33 = vadd.f32 %v4444_v27, %v4443_v36  ;;  %v4464_v28 = vrot.slane %v4463_v1, 1  ;;  %v4449_v3 = vadd.f32 %v4448_v2, %v4447_v21  ;;  %v4467_v32 = vadd.f32 %v4466_v20, %v4459_v63 }
0x1788   :  { %v4452_v4 = vmul.f32 0.0009765625, %v4445_v33  ;;  %v4465_v5 = vadd.f32 %v4464_v28, %v4463_v1  ;;  %v4450_v6 = vrot.slane %v4449_v3, 1  ;;  %v4468_v54 = vrot.slane %v4467_v32, 2  ;;  %v4919_v1 = vld [vmem:[%s6497_s19] ss:$0 sm:$0xff]  ;;  %s6343_s19 = smov [#allocation38]  }
0x1789   :  { %s4794_s7 = sshll.u32 %s6343_s19, 4  ;;  %s4795_s7 = int_to_ptr.vmem [resolvable:$true] %s4794_s7 }
0x178a   :  { %v4474_v7 = vmul.f32 %v4452_v4, %v4452_v4  ;;  %v4472_v8 = vmul.f32 0.0009765625, %v4465_v5  ;;  %v4451_v9 = vadd.f32 %v4450_v6, %v4449_v3  ;;  %v4469_v11 = vadd.f32 %v4468_v54, %v4467_v32  ;;  %s6235_s10 = scalar_lea.vmem %s4795_s7, 256  ;;  %p6240_p4 = scmp.lt.s32.totalorder %s4795_s7, %s4795_s7 }
0x178b   :  { %v4478_v0 = vsub.f32 %v6949_v57, %v4452_v4  ;;  %v4633_v57 = vld [vmem:[#allocation37 + $0x90] sm:$0xff]  ;;  %p6236_p3 = scmp.ne.s32.totalorder %s4795_s7, %s6235_s10  ;;  %p6241_p5 = scmp.lt.s32.totalorder %s6235_s10, %s6235_s10 }
0x178c   :  { %v4476_v12 = vsub.f32 %v4472_v8, %v4474_v7  ;;  %v4453_v13 = vmul.f32 0.0009765625, %v4451_v9  ;;  %v4470_v62 = vrot.slane %v4469_v11, 1  ;;  %5166 = vmatprep.subr.mxu0 %v4633_v57 }
0x178d   :  { %5167 = vmatpush3.msra.mxu0 %v4617_v24  ;;  %p6242_p6 = por %p6241_p5, %p6240_p4 }
0x178e   :  { %v4480_v16 = vadd.f32 1e-05, %v4476_v12  ;;  %v4471_v18 = vadd.f32 %v4470_v62, %v4469_v11  ;;  %v4475_v19 = vmul.f32 %v4453_v13, %v4453_v13  ;;  %v4479_v22 = vsub.f32 %v6955_v59, %v4453_v13  ;;  %5168 = vmatprep.subr.mxu0 %v4632_v44  ;;  %v4616_v59 = vld [vmem:[#allocation37 + $0x8] sm:$0xff] }
0x178f   :  { %5169 = vmatpush3.msra.mxu0 %v4616_v59  ;;  %p6243_p7 = pnand %p6242_p6, %p6236_p3 }
0x1790   :  { %5767 = vrsqrt.f32 %v4480_v16  ;;  %v4473_v42 = vmul.f32 0.0009765625, %v4471_v18  ;;  %5170 = vmatprep.subr.mxu0 %v4631_v49 }
0x1792   :  { %v4477_v23 = vsub.f32 %v4473_v42, %v4475_v19 }
0x1794   :  { %v4481_v25 = vadd.f32 1e-05, %v4477_v23 }
0x1796   :  { %5769 = vrsqrt.f32 %v4481_v25 }
0x179d   :  { %v5768_v29 = vpop.eup %5767 }
0x179e   :  { %v4484_v37 = vmul.f32 %v5768_v29, %v4478_v0 }
0x17a0   :  { %v4486_v35 = vmul.f32 %v4484_v37, %v4434_v30 }
0x17a2   :  { %v4488_v39 = vadd.f32 %v4486_v35, %v4435_v10 }
0x17a3   :  { %v5770_v40 = vpop.eup %5769 }
0x17a4   :  { %4599 = vmatmul.mubr.f32.vlgmr.msra.gmra.mxu1 %v4488_v39  ;;  %v4485_v45 = vmul.f32 %v5770_v40, %v4479_v22 }
0x17a5   :  { %4604 = vmatprep.mubr.f32.mxu1 %v6338_v34  ;;  %v4615_v34 = vld [vmem:[#allocation37] sm:$0xff] }
0x17a6   :  { %v4487_v46 = vmul.f32 %v4485_v45, %v4434_v30  ;;  %5171 = vmatpush3.msra.mxu0 %v4615_v34 }
0x17a8   :  { %v4489_v47 = vadd.f32 %v4487_v46, %v4435_v10 }
0x17aa   :  { %4605 = vmatmul.mubr.f32.gmra.mxu1 %v4489_v47 }
0x1864   :  { %v4600_v38 = vpop.f32.mrf.mxu1 }
0x1865   :  { %v4601_v56 = vadd.f32 %v4600_v38, %v4527_v55 }
0x1866   :  { %v4602_v58 = vpop.f32.mrf.mxu1 }
0x1867   :  { %v4603_v15 = vadd.f32 %v4602_v58, %v4531_v14  ;;  %v4611_v60 = vmax.f32 %v4601_v56, 0.0  ;;  %v4731_v56 = vld [vmem:[%s6998_s8] sm:$0xff] }
0x1869   :  { %v4612_v31 = vmax.f32 %v4603_v15, 0.0 }
0x186a   :  { %v4606_v17 = vpop.f32.mrf.mxu1 }
0x186b   :  { %4718 = vmatprep.mubr.f32.mxu0 %v4612_v31  ;;  %v4607_v61 = vadd.f32 %v4606_v17, %v4527_v55 }
0x186c   :  { %4719 = vmatmul.mubr.f32.vlgmr.msra.gmra.mxu0 %v4611_v60  ;;  %v4608_v36 = vpop.f32.mrf.mxu1  ;;  %v4732_v60 = vld [vmem:[#allocation34] sm:$0xff] }
0x186d   :  { %v4609_v26 = vadd.f32 %v4608_v36, %v4531_v14  ;;  %v4613_v63 = vmax.f32 %v4607_v61, 0.0 }
0x186f   :  { %v4614_v21 = vmax.f32 %v4609_v26, 0.0 }
0x1871   :  { %4723 = vmatprep.mubr.f32.mxu0 %v4614_v21 }
0x1872   :  { %4724 = vmatmul.mubr.f32.gmra.mxu0 %v4613_v63 }
0x192c   :  { %v5172_v27 = vpop.f32.mrf.mxu0 }
0x192e   :  { %v5173_v2 = vpop.f32.mrf.mxu0 }
0x192f   :  { %v5174_v20 = vadd.f32 %v5173_v2, %v5172_v27 }
0x1931   :  { %v4721_v33 = vadd.f32 %v5174_v20, %v4919_v1 }
0x1932   :  { %v5175_v28 = vpop.f32.mrf.mxu0 }
0x1933   :  { %v4729_v3 = vadd.f32 %v4721_v33, %v4488_v39 }
0x1934   :  { %v5176_v32 = vpop.f32.mrf.mxu0 }
0x1935   :  { %4733 = vadd.xlane.f32.xlu0 %v4729_v3  ;;  %v5177_v4 = vadd.f32 %v5176_v32, %v5175_v28  ;;  %v4751_v7 = vmul.f32 %v4729_v3, %v4729_v3 }
0x1937   :  { %v4726_v5 = vadd.f32 %v5177_v4, %v4919_v1 }
0x1939   :  { %v4730_v6 = vadd.f32 %v4726_v5, %v4489_v47 }
0x193b   :  { %4735 = vadd.xlane.f32.xlu0 %v4730_v6  ;;  %v4752_v54 = vmul.f32 %v4730_v6, %v4730_v6 }
0x193d   :  { %4755 = vadd.xlane.f32.xlu1 %v4752_v54 }
0x193f   :  { %4753 = vadd.xlane.f32.xlu0 %v4751_v7 }
0x19be   :  { %v4734_v8 = vpop.xlane.xlu0 %4733 }
0x19bf   :  { %v4737_v9 = vrot.slane %v4734_v8, 4 }
0x19c1   :  { %v4738_v11 = vadd.f32 %v4737_v9, %v4734_v8 }
0x19c3   :  { %v4739_v12 = vrot.slane %v4738_v11, 2 }
0x19c4   :  { %v4736_v13 = vpop.xlane.xlu0 %4735 }
0x19c5   :  { %v4740_v62 = vadd.f32 %v4739_v12, %v4738_v11  ;;  %v4743_v16 = vrot.slane %v4736_v13, 4 }
0x19c6   :  { %v4756_v18 = vpop.xlane.xlu1 %4755 }
0x19c7   :  { %v4744_v19 = vadd.f32 %v4743_v16, %v4736_v13  ;;  %v4763_v42 = vrot.slane %v4756_v18, 4  ;;  %v4741_v25 = vrot.slane %v4740_v62, 1 }
0x19c8   :  { %v4754_v23 = vpop.xlane.xlu0 %4753 }
0x19c9   :  { %v4745_v0 = vrot.slane %v4744_v19, 2  ;;  %v4764_v29 = vadd.f32 %v4763_v42, %v4756_v18  ;;  %v4757_v30 = vrot.slane %v4754_v23, 4  ;;  %v4742_v39 = vadd.f32 %v4741_v25, %v4740_v62 }
0x19cb   :  { %v4746_v37 = vadd.f32 %v4745_v0, %v4744_v19  ;;  %v4765_v10 = vrot.slane %v4764_v29, 2  ;;  %v4758_v35 = vadd.f32 %v4757_v30, %v4754_v23  ;;  %v4749_v41 = vmul.f32 0.0009765625, %v4742_v39 }
0x19cd   :  { %v4747_v22 = vrot.slane %v4746_v37, 1  ;;  %v4766_v40 = vadd.f32 %v4765_v10, %v4764_v29  ;;  %v4759_v45 = vrot.slane %v4758_v35, 2  ;;  %v4771_v50 = vmul.f32 %v4749_v41, %v4749_v41 }
0x19ce   :  { %v4775_v58 = vsub.f32 %v4729_v3, %v4749_v41 }
0x19cf   :  { %v4748_v46 = vadd.f32 %v4747_v22, %v4746_v37  ;;  %v4767_v47 = vrot.slane %v4766_v40, 1  ;;  %v4760_v48 = vadd.f32 %v4759_v45, %v4758_v35 }
0x19d1   :  { %v4750_v57 = vmul.f32 0.0009765625, %v4748_v46  ;;  %v4768_v24 = vadd.f32 %v4767_v47, %v4766_v40  ;;  %v4761_v44 = vrot.slane %v4760_v48, 1 }
0x19d3   :  { %v4772_v59 = vmul.f32 %v4750_v57, %v4750_v57  ;;  %v4770_v49 = vmul.f32 0.0009765625, %v4768_v24  ;;  %v4762_v34 = vadd.f32 %v4761_v44, %v4760_v48  ;;  %v4776_v14 = vsub.f32 %v4730_v6, %v4750_v57 }
0x19d5   :  { %v4774_v51 = vsub.f32 %v4770_v49, %v4772_v59  ;;  %v4769_v52 = vmul.f32 0.0009765625, %v4762_v34 }
0x19d7   :  { %v4778_v53 = vadd.f32 1e-05, %v4774_v51  ;;  %v4773_v43 = vsub.f32 %v4769_v52, %v4771_v50 }
0x19d9   :  { %5771 = vrsqrt.f32 %v4778_v53  ;;  %v4777_v55 = vadd.f32 1e-05, %v4773_v43 }
0x19db   :  { %5773 = vrsqrt.f32 %v4777_v55 }
0x19e6   :  { %v5772_v38 = vpop.eup %5771 }
0x19e7   :  { %v4782_v15 = vmul.f32 %v5772_v38, %v4776_v14 }
0x19e8   :  { %v5774_v31 = vpop.eup %5773 }
0x19e9   :  { %v4781_v17 = vmul.f32 %v5774_v31, %v4775_v58  ;;  %v4784_v61 = vmul.f32 %v4782_v15, %v4731_v56 }
0x19eb   :  { %v4783_v36 = vmul.f32 %v4781_v17, %v4731_v56  ;;  %v4786_v26 = vadd.f32 %v4784_v61, %v4732_v60 }
0x19ed   :  { %v4785_v21 = vadd.f32 %v4783_v36, %v4732_v60  ;;  %4788 = vst [vmem:[#allocation38 + $0x8] sm:$0xff] %v4786_v26 }
0x19ef   :  { %4787 = vst [vmem:[#allocation38] sm:$0xff] %v4785_v21 }
0x19f0   :  { %6246 = shalt.err (!%p6243_p7)
}
0x19f1   :  { %4800 = dma.vmem_to_hbm [thread:$0]  %s4795_s7, 256, %s6502_s29, [#allocation4], %s6313_s23, %s6313_s23, %s6314_s26  }
0x19f2   :  { %6279 = dma.done.wait [#allocation4], 256  }
0x19f3   :  { %6280 = vsyncadd [#allocation4], 4294967040 }
0x19f4   :  { %4804 = vsyncpa [#allocation3], 1 }
0x19f5   :  { %4805 = vsyncpa [#allocation6], 1 }
0x19f6   :  { %4806 = vsyncpa [#allocation9], 1 }
0x19f7   :  { %4807 = vsyncpa [#allocation12], 1 }
0x19f8   :  { %4808 = vsyncpa [#allocation15], 1 }
0x19f9   :  { %4809 = vsyncpa [#allocation18], 1 }
0x19fa   :  { %4810 = vsyncpa [#allocation21], 1 }
0x19fb   :  { %4811 = vsyncpa [#allocation24], 1 }
0x19fc   :  { %4812 = vsyncpa [#allocation27], 1 }
0x19fd   :  { %4813 = vsyncpa [#allocation30], 1 }
0x19fe   :  { %4814 = vsyncpa [#allocation33], 1 }
0x19ff   :  { %4815 = vsyncpa [#allocation36], 1 }
0x1a00   :  { %4816 = vsyncpa [#allocation4], 1 }

</bundles_post_ra>
